<compile_context>
chip_gen: v5e
topology: v5e:2x2
jax: 0.10.0
libtpu: 0.0.40
codegen_flags: <defaults>
</compile_context>

<pallas_src>
import jax
import jax.numpy as jnp
from jax.experimental import pallas as pl
from jax.experimental.pallas import tpu as pltpu

N_BODIES = 3
INPUT_DIM = 7
FEAT_PAD = 8                      # input features padded 7 -> 8 lanes
HIDDEN_DIM = 128
OUTPUT_DIM = N_BODIES * 6         # 18
OUT_LANES = 128                   # output padded to 128 lanes (unmasked stores)
HEADS = 2

# Row offsets inside the packed (272, 256) weight slab.
_W1_LO, _W1_HI = 0, 8             # [w_rel1 | w_root1 + w_res], zero-padded to 8 rows
_W2_LO, _W2_HI = 8, 136           # [w_rel2 | w_root2]
_WG_LO, _WG_HI = 136, 264         # [w_gat0 | w_gat1]
_ASRC = 264                       # [att_src head0 | att_src head1]
_ADST = 265                       # [att_dst head0 | att_dst head1]
_B12 = 266                        # [b_rel1 + b_res | b_rel2]
_BGAT = 267                       # [b_gat | 0]
WIDE_ROWS = 272

# fc slab: per-body (128, 128-padded) blocks stacked, then bias row, then pad.
FC_BIAS_ROW = N_BODIES * HIDDEN_DIM     # 384
FC_ROWS = 392

# SMEM adjacency layout (flattened, shared by every graph in the batch).
_ADJ_OFF = 0                      # adj[i, j]   (no self loops)  -> GraphConv aggregation
_ADJ_SL_OFF = N_BODIES * N_BODIES  # adj_sl[i,j] (with self loops) -> GAT attention mask

NEG_BIG = -1e30                   # finite "-inf" (NaN-safe even for empty rows)


def nbody_gnn_kernel(adj_ref, x_ref, wide_ref, fc_ref, out_ref):
    f32 = jnp.float32
    H = HIDDEN_DIM

    # Node-plane layout: plane p holds node p of every graph in this block.
    x = [x_ref[p] for p in range(N_BODIES)]                       # each (BG, 8)

    b1 = wide_ref[_B12:_B12 + 1, 0:H]
    b2 = wide_ref[_B12:_B12 + 1, H:2 * H]
    b_gat = wide_ref[_BGAT:_BGAT + 1, 0:H]
    a_src = wide_ref[_ASRC:_ASRC + 1, :]                          # (1, 256)
    a_dst = wide_ref[_ADST:_ADST + 1, :]                          # (1, 256)

    def adj_combine(vals, base):
        # h_i = sum_j adj[i, j] * vals_j  -- 3-term select/add on the VPU;
        # adjacency scalars come from SMEM (no MXU push, no lane-offset slices).
        outs = []
        for i in range(N_BODIES):
            acc = None
            for j in range(N_BODIES):
                term = jnp.where(adj_ref[base + N_BODIES * i + j] != 0, vals[j], 0.0)
                acc = term if acc is None else acc + term
            outs.append(acc)
        return outs

    # ---- GraphConv1 + residual (folded into root weight / bias) ----
    y1 = [jnp.dot(x[p], wide_ref[_W1_LO:_W1_HI, :], preferred_element_type=f32)
          for p in range(N_BODIES)]                               # (BG, 256)
    rel1 = adj_combine([y[:, 0:H] for y in y1], _ADJ_OFF)
    x1 = [jnp.maximum(rel1[p] + y1[p][:, H:2 * H] + b1, 0.0) for p in range(N_BODIES)]
    # TODO(synk): Dropout(p=0.3) not reproduced (inference mode -> identity).

    # ---- GraphConv2 ----
    y2 = [jnp.dot(x1[p], wide_ref[_W2_LO:_W2_HI, :], preferred_element_type=f32)
          for p in range(N_BODIES)]                               # (BG, 256)
    rel2 = adj_combine([y[:, 0:H] for y in y2], _ADJ_OFF)
    x2 = [jnp.maximum(rel2[p] + y2[p][:, H:2 * H] + b2, 0.0) for p in range(N_BODIES)]

    # ---- GATConv (2 heads, concat=False -> mean, negative_slope=0.2, self loops) ----
    xh = [jnp.dot(x2[p], wide_ref[_WG_LO:_WG_HI, :], preferred_element_type=f32)
          for p in range(N_BODIES)]                               # (BG, 256) = [head0|head1]

    def both_head_scores(v, a):
        # One 256-lane multiply, per-head lane reduces at the aligned 128 boundary.
        prod = v * a
        s0 = jnp.sum(prod[:, 0:H], axis=1, keepdims=True)         # (BG, 1) head 0
        s1 = jnp.sum(prod[:, H:2 * H], axis=1, keepdims=True)     # (BG, 1) head 1
        return jnp.concatenate([s0, s1], axis=1)                  # (BG, 2)

    s_src = [both_head_scores(xh[p], a_src) for p in range(N_BODIES)]
    s_dst = [both_head_scores(xh[p], a_dst) for p in range(N_BODIES)]

    x3 = []
    for i in range(N_BODIES):
        e = []
        for j in range(N_BODIES):
            eij = s_dst[i] + s_src[j]                              # (BG, 2) both heads
            eij = jnp.where(eij > 0, eij, 0.2 * eij)               # leaky_relu(0.2)
            eij = jnp.where(adj_ref[_ADJ_SL_OFF + N_BODIES * i + j] != 0, eij, NEG_BIG)
            e.append(eij)
        m = jnp.maximum(jnp.maximum(e[0], e[1]), e[2])
        p = [jnp.exp(e[j] - m) for j in range(N_BODIES)]
        denom = p[0] + p[1] + p[2]
        inv = pl.reciprocal(denom, approx=True)                    # EUP seed
        inv = inv * (2.0 - denom * inv)                            # one Newton step
        acc = None
        for j in range(N_BODIES):
            alpha = p[j] * inv                                     # (BG, 2)
            term = (alpha[:, 0:1] * xh[j][:, 0:H]
                    + alpha[:, 1:2] * xh[j][:, H:2 * H])           # sum over heads
            acc = term if acc is None else acc + term
        x3.append(jnp.maximum(0.5 * acc + b_gat, 0.0))             # (BG, 128)

    # ---- fc over the per-graph flattened (1, 3*128): three (BG,128)@(128,128) ----
    out = jnp.dot(x3[0], fc_ref[0:H, :], preferred_element_type=f32)
    out = out + jnp.dot(x3[1], fc_ref[H:2 * H, :], preferred_element_type=f32)
    out = out + jnp.dot(x3[2], fc_ref[2 * H:3 * H, :], preferred_element_type=f32)
    out_ref[...] = out + fc_ref[FC_BIAS_ROW:FC_BIAS_ROW + 1, :]    # zero-padded lanes 18..127


def pack_weight_slabs(p):
    """Fold + pack all weights into two f32 slabs (host-side, once per model)."""
    f32 = jnp.float32
    w1 = jnp.concatenate([p["w_rel1"], p["w_root1"] + p["w_res"]], axis=1)      # (7, 256)
    w1 = jnp.pad(w1, ((0, 8 - INPUT_DIM), (0, 0)))                              # (8, 256)
    w2 = jnp.concatenate([p["w_rel2"], p["w_root2"]], axis=1)                   # (128, 256)
    wg = jnp.concatenate([p["w_gat0"], p["w_gat1"]], axis=1)                    # (128, 256)
    a_src = p["att_src"].reshape(1, HEADS * HIDDEN_DIM)                         # (1, 256)
    a_dst = p["att_dst"].reshape(1, HEADS * HIDDEN_DIM)                         # (1, 256)
    b12 = jnp.concatenate([p["b_rel1"] + p["b_res"], p["b_rel2"]], axis=1)      # (1, 256)
    bgat = jnp.concatenate([p["b_gat"], jnp.zeros((1, HIDDEN_DIM), f32)], axis=1)
    pad = jnp.zeros((WIDE_ROWS - 268, 2 * HIDDEN_DIM), f32)
    wide = jnp.concatenate([w1, w2, wg, a_src, a_dst, b12, bgat, pad], axis=0)
    assert wide.shape == (WIDE_ROWS, 2 * HIDDEN_DIM)

    # fc: lane-aligned per-body blocks (each padded 18 -> 128 output lanes).
    blocks = [jnp.pad(p["w_fc"][i], ((0, 0), (0, OUT_LANES - OUTPUT_DIM)))
              for i in range(N_BODIES)]                                         # (128, 128) x3
    bias = jnp.pad(p["b_fc"], ((0, 0), (0, OUT_LANES - OUTPUT_DIM)))            # (1, 128)
    padr = jnp.zeros((FC_ROWS - FC_BIAS_ROW - 1, OUT_LANES), f32)
    fc = jnp.concatenate(blocks + [bias, padr], axis=0)
    assert fc.shape == (FC_ROWS, OUT_LANES)
    return wide, fc


def pack_graph_batch(x_batch):
    """(B, 3, 7) node features -> node-major planes (3, B, 8)."""
    planes = jnp.transpose(x_batch, (1, 0, 2))                                  # (3, B, 7)
    return jnp.pad(planes, ((0, 0), (0, 0), (0, FEAT_PAD - INPUT_DIM)))         # (3, B, 8)


def pack_adjacency(adj, adj_sl):
    """Flattened int32 adjacency masks for SMEM scalar prefetch (shared per batch)."""
    a = (adj > 0).astype(jnp.int32).reshape(-1)        # adj[i, j] at index 3*i + j
    b = (adj_sl > 0).astype(jnp.int32).reshape(-1)
    return jnp.concatenate([a, b], axis=0)             # (18,)


def nbody_gnn_forward(adj_flat, x_planes, wide_slab, fc_slab, *, block_graphs=None):
    n_nodes, batch, feat = x_planes.shape
    assert n_nodes == N_BODIES and feat == FEAT_PAD
    if block_graphs is None:
        block_graphs = batch
    assert batch % block_graphs == 0
    assert block_graphs == batch or block_graphs % 8 == 0
    grid = (batch // block_graphs,)

    grid_spec = pltpu.PrefetchScalarGridSpec(
        num_scalar_prefetch=1,                                   # adjacency scalars -> SMEM
        grid=grid,
        in_specs=[
            # Only the small per-block graph slab streams; weights stay resident
            # (constant index_map -> fetched once, reused across the whole grid).
            pl.BlockSpec((N_BODIES, block_graphs, FEAT_PAD), lambda i, adj: (0, i, 0)),
            pl.BlockSpec((WIDE_ROWS, 2 * HIDDEN_DIM), lambda i, adj: (0, 0)),
            pl.BlockSpec((FC_ROWS, OUT_LANES), lambda i, adj: (0, 0)),
        ],
        out_specs=pl.BlockSpec((block_graphs, OUT_LANES), lambda i, adj: (i, 0)),
    )
    out = pl.pallas_call(
        nbody_gnn_kernel,
        out_shape=jax.ShapeDtypeStruct((batch, OUT_LANES), jnp.float32),
        grid_spec=grid_spec,
        compiler_params=pltpu.CompilerParams(
            dimension_semantics=("parallel",),                   # megacore sharding (v7x)
            vmem_limit_bytes=48 * 1024 * 1024,
        ),
    )(adj_flat, x_planes, wide_slab, fc_slab)
    return out[:, :OUTPUT_DIM]


def nbody_gnn_reference(x, adj, adj_sl, p):
    """Plain-JAX single-graph reference with the original (unfused) math."""
    x_res = x @ p["w_res"] + p["b_res"]
    h1 = (adj @ x) @ p["w_rel1"] + p["b_rel1"] + x @ p["w_root1"]
    x1 = jnp.maximum(h1 + x_res, 0.0)
    h2 = (adj @ x1) @ p["w_rel2"] + p["b_rel2"] + x1 @ p["w_root2"]
    x2 = jnp.maximum(h2, 0.0)

    def head(w, a_src, a_dst):
        xh = x2 @ w
        e = (xh @ a_dst.T) + (xh @ a_src.T).T
        e = jnp.where(e > 0, e, 0.2 * e)
        e = jnp.where(adj_sl > 0, e, -jnp.inf)
        alpha = jax.nn.softmax(e, axis=1)
        return alpha @ xh

    o0 = head(p["w_gat0"], p["att_src"][0:1], p["att_dst"][0:1])
    o1 = head(p["w_gat1"], p["att_src"][1:2], p["att_dst"][1:2])
    x3 = jnp.maximum(0.5 * (o0 + o1) + p["b_gat"], 0.0)
    flat = x3.reshape(1, -1)
    w_fc_flat = p["w_fc"].reshape(N_BODIES * HIDDEN_DIM, OUTPUT_DIM)
    return flat @ w_fc_flat + p["b_fc"]


def make_params(key):
    ks = jax.random.split(key, 16)
    u = lambda k, shape, scale: jax.random.uniform(k, shape, jnp.float32, -scale, scale)
    params = {
        # residual: Linear(7 -> 128)
        "w_res": u(ks[0], (INPUT_DIM, HIDDEN_DIM), 1.0 / INPUT_DIM ** 0.5),
        "b_res": u(ks[1], (1, HIDDEN_DIM), 1.0 / INPUT_DIM ** 0.5),
        # GraphConv1: 7 -> 128
        "w_rel1": u(ks[2], (INPUT_DIM, HIDDEN_DIM), 1.0 / INPUT_DIM ** 0.5),
        "b_rel1": u(ks[3], (1, HIDDEN_DIM), 1.0 / INPUT_DIM ** 0.5),
        "w_root1": u(ks[4], (INPUT_DIM, HIDDEN_DIM), 1.0 / INPUT_DIM ** 0.5),
        # GraphConv2: 128 -> 128
        "w_rel2": u(ks[5], (HIDDEN_DIM, HIDDEN_DIM), 1.0 / HIDDEN_DIM ** 0.5),
        "b_rel2": u(ks[6], (1, HIDDEN_DIM), 1.0 / HIDDEN_DIM ** 0.5),
        "w_root2": u(ks[7], (HIDDEN_DIM, HIDDEN_DIM), 1.0 / HIDDEN_DIM ** 0.5),
        # GATConv: 128 -> 128, heads=2 (per-head weights, pre-transposed)
        "w_gat0": u(ks[8], (HIDDEN_DIM, HIDDEN_DIM), 1.0 / HIDDEN_DIM ** 0.5),
        "w_gat1": u(ks[9], (HIDDEN_DIM, HIDDEN_DIM), 1.0 / HIDDEN_DIM ** 0.5),
        "att_src": u(ks[10], (HEADS, HIDDEN_DIM), 1.0 / HIDDEN_DIM ** 0.5),
        "att_dst": u(ks[11], (HEADS, HIDDEN_DIM), 1.0 / HIDDEN_DIM ** 0.5),
        "b_gat": u(ks[12], (1, HIDDEN_DIM), 1.0 / HIDDEN_DIM ** 0.5),
        # fc: Linear(384 -> 18), xavier-uniform, stored as (n_bodies, 128, 18)
        "w_fc": u(ks[13], (N_BODIES, HIDDEN_DIM, OUTPUT_DIM),
                  (6.0 / (N_BODIES * HIDDEN_DIM + OUTPUT_DIM)) ** 0.5),
        "b_fc": u(ks[14], (1, OUTPUT_DIM), 1.0 / (N_BODIES * HIDDEN_DIM) ** 0.5),
    }
    return params, ks[15]


if __name__ == "__main__":
    key = jax.random.PRNGKey(0)
    params, kx = make_params(key)

    # Small batched demo: 64 independent 3-body graphs, 32 graphs per grid block.
    BATCH = 64
    BLOCK = 32
    x_batch = jax.random.normal(kx, (BATCH, N_BODIES, INPUT_DIM), jnp.float32)

    # Dense adjacency from edge_index = all (i, j), i != j; adj[dst, src] = 1.
    edges = [(i, j) for i in range(N_BODIES) for j in range(N_BODIES) if i != j]
    adj = jnp.zeros((N_BODIES, N_BODIES), jnp.float32)
    for src, dst in edges:
        adj = adj.at[dst, src].set(1.0)
    adj_sl = adj + jnp.eye(N_BODIES, dtype=jnp.float32)   # GATConv adds self loops

    # Pack once (weight slabs and adjacency reusable across calls), then run.
    wide_slab, fc_slab = pack_weight_slabs(params)
    adj_flat = pack_adjacency(adj, adj_sl)
    x_planes = pack_graph_batch(x_batch)

    out = nbody_gnn_forward(adj_flat, x_planes, wide_slab, fc_slab, block_graphs=BLOCK)
    out = jax.block_until_ready(out)

    ref = jax.vmap(lambda xg: nbody_gnn_reference(xg, adj, adj_sl, params)[0])(x_batch)
    assert out.shape == (BATCH, OUTPUT_DIM)
    assert jnp.allclose(out, ref, rtol=1e-3, atol=1e-3), float(jnp.max(jnp.abs(out - ref)))

    print("KERNEL_OK")
</pallas_src>

<mosaic_0001>
module attributes {stable_mosaic.version = 11 : i64} {
  func.func @nbody_gnn_kernel(%arg0: i32, %arg1: memref<18xi32, #tpu.memory_space<smem>>, %arg2: memref<3x32x8xf32, #tpu.memory_space<vmem>>, %arg3: memref<272x256xf32, #tpu.memory_space<vmem>>, %arg4: memref<392x128xf32, #tpu.memory_space<vmem>>, %arg5: memref<32x128xf32, #tpu.memory_space<vmem>>) attributes {dimension_semantics = [#tpu.dimension_semantics<parallel>], iteration_bounds = array<i64: 2>, scalar_prefetch = 1 : i64, scratch_operands = 0 : i64, tpu.core_type = #tpu.core_type<tc>, window_params = [{transform_indices = @transform_0, window_bounds = array<i64: 3, 32, 8>}, {pipeline_mode = #tpu.pipeline_mode<synchronous>, transform_indices = @transform_1, window_bounds = array<i64: 272, 256>}, {pipeline_mode = #tpu.pipeline_mode<synchronous>, transform_indices = @transform_2, window_bounds = array<i64: 392, 128>}, {transform_indices = @transform_3, window_bounds = array<i64: 32, 128>}]} {
    %c0 = arith.constant 0 : index
    %c0_0 = arith.constant 0 : index
    %c0_1 = arith.constant 0 : index
    %0 = vector.load %arg2[%c0, %c0_0, %c0_1] : memref<3x32x8xf32, #tpu.memory_space<vmem>>, vector<1x32x8xf32>
    %1 = vector.shape_cast %0 : vector<1x32x8xf32> to vector<32x8xf32>
    %c1 = arith.constant 1 : index
    %c0_2 = arith.constant 0 : index
    %c0_3 = arith.constant 0 : index
    %2 = vector.load %arg2[%c1, %c0_2, %c0_3] : memref<3x32x8xf32, #tpu.memory_space<vmem>>, vector<1x32x8xf32>
    %3 = vector.shape_cast %2 : vector<1x32x8xf32> to vector<32x8xf32>
    %c2 = arith.constant 2 : index
    %c0_4 = arith.constant 0 : index
    %c0_5 = arith.constant 0 : index
    %4 = vector.load %arg2[%c2, %c0_4, %c0_5] : memref<3x32x8xf32, #tpu.memory_space<vmem>>, vector<1x32x8xf32>
    %5 = vector.shape_cast %4 : vector<1x32x8xf32> to vector<32x8xf32>
    %c266 = arith.constant 266 : index
    %c0_6 = arith.constant 0 : index
    %6 = vector.load %arg3[%c266, %c0_6] : memref<272x256xf32, #tpu.memory_space<vmem>>, vector<1x128xf32>
    %c266_7 = arith.constant 266 : index
    %c128 = arith.constant 128 : index
    %7 = vector.load %arg3[%c266_7, %c128] : memref<272x256xf32, #tpu.memory_space<vmem>>, vector<1x128xf32>
    %c267 = arith.constant 267 : index
    %c0_8 = arith.constant 0 : index
    %8 = vector.load %arg3[%c267, %c0_8] : memref<272x256xf32, #tpu.memory_space<vmem>>, vector<1x128xf32>
    %c264 = arith.constant 264 : index
    %c0_9 = arith.constant 0 : index
    %9 = vector.load %arg3[%c264, %c0_9] : memref<272x256xf32, #tpu.memory_space<vmem>>, vector<1x256xf32>
    %c265 = arith.constant 265 : index
    %c0_10 = arith.constant 0 : index
    %10 = vector.load %arg3[%c265, %c0_10] : memref<272x256xf32, #tpu.memory_space<vmem>>, vector<1x256xf32>
    %c0_11 = arith.constant 0 : index
    %c0_12 = arith.constant 0 : index
    %11 = vector.load %arg3[%c0_11, %c0_12] : memref<272x256xf32, #tpu.memory_space<vmem>>, vector<8x256xf32>
    %cst = arith.constant dense<0.000000e+00> : vector<32x256xf32>
    %12 = tpu.matmul %1, %11, %cst {dimension_numbers = #tpu.dot_dimension_numbers<[1], [0], [0], [1], [0, 0, 1, 1], [], []>} : vector<32x8xf32>, vector<8x256xf32>, vector<32x256xf32> -> vector<32x256xf32>
    %c0_13 = arith.constant 0 : index
    %c0_14 = arith.constant 0 : index
    %13 = vector.load %arg3[%c0_13, %c0_14] : memref<272x256xf32, #tpu.memory_space<vmem>>, vector<8x256xf32>
    %cst_15 = arith.constant dense<0.000000e+00> : vector<32x256xf32>
    %14 = tpu.matmul %3, %13, %cst_15 {dimension_numbers = #tpu.dot_dimension_numbers<[1], [0], [0], [1], [0, 0, 1, 1], [], []>} : vector<32x8xf32>, vector<8x256xf32>, vector<32x256xf32> -> vector<32x256xf32>
    %c0_16 = arith.constant 0 : index
    %c0_17 = arith.constant 0 : index
    %15 = vector.load %arg3[%c0_16, %c0_17] : memref<272x256xf32, #tpu.memory_space<vmem>>, vector<8x256xf32>
    %cst_18 = arith.constant dense<0.000000e+00> : vector<32x256xf32>
    %16 = tpu.matmul %5, %15, %cst_18 {dimension_numbers = #tpu.dot_dimension_numbers<[1], [0], [0], [1], [0, 0, 1, 1], [], []>} : vector<32x8xf32>, vector<8x256xf32>, vector<32x256xf32> -> vector<32x256xf32>
    %17 = vector.extract_strided_slice %12 {offsets = [0, 0], sizes = [32, 128], strides = [1, 1]} : vector<32x256xf32> to vector<32x128xf32>
    %18 = vector.extract_strided_slice %14 {offsets = [0, 0], sizes = [32, 128], strides = [1, 1]} : vector<32x256xf32> to vector<32x128xf32>
    %19 = vector.extract_strided_slice %16 {offsets = [0, 0], sizes = [32, 128], strides = [1, 1]} : vector<32x256xf32> to vector<32x128xf32>
    %c0_19 = arith.constant 0 : index
    %20 = memref.load %arg1[%c0_19] : memref<18xi32, #tpu.memory_space<smem>>
    %c0_i32 = arith.constant 0 : i32
    %21 = arith.cmpi ne, %20, %c0_i32 : i32
    %cst_20 = arith.constant 0.000000e+00 : f32
    %22 = vector.broadcast %cst_20 : f32 to vector<32x128xf32>
    %23 = arith.select %21, %17, %22 : vector<32x128xf32>
    %c1_21 = arith.constant 1 : index
    %24 = memref.load %arg1[%c1_21] : memref<18xi32, #tpu.memory_space<smem>>
    %c0_i32_22 = arith.constant 0 : i32
    %25 = arith.cmpi ne, %24, %c0_i32_22 : i32
    %cst_23 = arith.constant 0.000000e+00 : f32
    %26 = vector.broadcast %cst_23 : f32 to vector<32x128xf32>
    %27 = arith.select %25, %18, %26 : vector<32x128xf32>
    %28 = arith.addf %23, %27 : vector<32x128xf32>
    %c2_24 = arith.constant 2 : index
    %29 = memref.load %arg1[%c2_24] : memref<18xi32, #tpu.memory_space<smem>>
    %c0_i32_25 = arith.constant 0 : i32
    %30 = arith.cmpi ne, %29, %c0_i32_25 : i32
    %cst_26 = arith.constant 0.000000e+00 : f32
    %31 = vector.broadcast %cst_26 : f32 to vector<32x128xf32>
    %32 = arith.select %30, %19, %31 : vector<32x128xf32>
    %33 = arith.addf %28, %32 : vector<32x128xf32>
    %c3 = arith.constant 3 : index
    %34 = memref.load %arg1[%c3] : memref<18xi32, #tpu.memory_space<smem>>
    %c0_i32_27 = arith.constant 0 : i32
    %35 = arith.cmpi ne, %34, %c0_i32_27 : i32
    %cst_28 = arith.constant 0.000000e+00 : f32
    %36 = vector.broadcast %cst_28 : f32 to vector<32x128xf32>
    %37 = arith.select %35, %17, %36 : vector<32x128xf32>
    %c4 = arith.constant 4 : index
    %38 = memref.load %arg1[%c4] : memref<18xi32, #tpu.memory_space<smem>>
    %c0_i32_29 = arith.constant 0 : i32
    %39 = arith.cmpi ne, %38, %c0_i32_29 : i32
    %cst_30 = arith.constant 0.000000e+00 : f32
    %40 = vector.broadcast %cst_30 : f32 to vector<32x128xf32>
    %41 = arith.select %39, %18, %40 : vector<32x128xf32>
    %42 = arith.addf %37, %41 : vector<32x128xf32>
    %c5 = arith.constant 5 : index
    %43 = memref.load %arg1[%c5] : memref<18xi32, #tpu.memory_space<smem>>
    %c0_i32_31 = arith.constant 0 : i32
    %44 = arith.cmpi ne, %43, %c0_i32_31 : i32
    %cst_32 = arith.constant 0.000000e+00 : f32
    %45 = vector.broadcast %cst_32 : f32 to vector<32x128xf32>
    %46 = arith.select %44, %19, %45 : vector<32x128xf32>
    %47 = arith.addf %42, %46 : vector<32x128xf32>
    %c6 = arith.constant 6 : index
    %48 = memref.load %arg1[%c6] : memref<18xi32, #tpu.memory_space<smem>>
    %c0_i32_33 = arith.constant 0 : i32
    %49 = arith.cmpi ne, %48, %c0_i32_33 : i32
    %cst_34 = arith.constant 0.000000e+00 : f32
    %50 = vector.broadcast %cst_34 : f32 to vector<32x128xf32>
    %51 = arith.select %49, %17, %50 : vector<32x128xf32>
    %c7 = arith.constant 7 : index
    %52 = memref.load %arg1[%c7] : memref<18xi32, #tpu.memory_space<smem>>
    %c0_i32_35 = arith.constant 0 : i32
    %53 = arith.cmpi ne, %52, %c0_i32_35 : i32
    %cst_36 = arith.constant 0.000000e+00 : f32
    %54 = vector.broadcast %cst_36 : f32 to vector<32x128xf32>
    %55 = arith.select %53, %18, %54 : vector<32x128xf32>
    %56 = arith.addf %51, %55 : vector<32x128xf32>
    %c8 = arith.constant 8 : index
    %57 = memref.load %arg1[%c8] : memref<18xi32, #tpu.memory_space<smem>>
    %c0_i32_37 = arith.constant 0 : i32
    %58 = arith.cmpi ne, %57, %c0_i32_37 : i32
    %cst_38 = arith.constant 0.000000e+00 : f32
    %59 = vector.broadcast %cst_38 : f32 to vector<32x128xf32>
    %60 = arith.select %58, %19, %59 : vector<32x128xf32>
    %61 = arith.addf %56, %60 : vector<32x128xf32>
    %62 = vector.extract_strided_slice %12 {offsets = [0, 128], sizes = [32, 128], strides = [1, 1]} : vector<32x256xf32> to vector<32x128xf32>
    %63 = arith.addf %33, %62 : vector<32x128xf32>
    %64 = vector.broadcast %6 : vector<1x128xf32> to vector<32x128xf32>
    %65 = arith.addf %63, %64 : vector<32x128xf32>
    %cst_39 = arith.constant 0.000000e+00 : f32
    %66 = vector.broadcast %cst_39 : f32 to vector<32x128xf32>
    %67 = arith.maximumf %65, %66 : vector<32x128xf32>
    %68 = vector.extract_strided_slice %14 {offsets = [0, 128], sizes = [32, 128], strides = [1, 1]} : vector<32x256xf32> to vector<32x128xf32>
    %69 = arith.addf %47, %68 : vector<32x128xf32>
    %70 = vector.broadcast %6 : vector<1x128xf32> to vector<32x128xf32>
    %71 = arith.addf %69, %70 : vector<32x128xf32>
    %cst_40 = arith.constant 0.000000e+00 : f32
    %72 = vector.broadcast %cst_40 : f32 to vector<32x128xf32>
    %73 = arith.maximumf %71, %72 : vector<32x128xf32>
    %74 = vector.extract_strided_slice %16 {offsets = [0, 128], sizes = [32, 128], strides = [1, 1]} : vector<32x256xf32> to vector<32x128xf32>
    %75 = arith.addf %61, %74 : vector<32x128xf32>
    %76 = vector.broadcast %6 : vector<1x128xf32> to vector<32x128xf32>
    %77 = arith.addf %75, %76 : vector<32x128xf32>
    %cst_41 = arith.constant 0.000000e+00 : f32
    %78 = vector.broadcast %cst_41 : f32 to vector<32x128xf32>
    %79 = arith.maximumf %77, %78 : vector<32x128xf32>
    %c8_42 = arith.constant 8 : index
    %c0_43 = arith.constant 0 : index
    %80 = vector.load %arg3[%c8_42, %c0_43] : memref<272x256xf32, #tpu.memory_space<vmem>>, vector<128x256xf32>
    %cst_44 = arith.constant dense<0.000000e+00> : vector<32x256xf32>
    %81 = tpu.matmul %67, %80, %cst_44 {dimension_numbers = #tpu.dot_dimension_numbers<[1], [0], [0], [1], [0, 0, 1, 1], [], []>} : vector<32x128xf32>, vector<128x256xf32>, vector<32x256xf32> -> vector<32x256xf32>
    %c8_45 = arith.constant 8 : index
    %c0_46 = arith.constant 0 : index
    %82 = vector.load %arg3[%c8_45, %c0_46] : memref<272x256xf32, #tpu.memory_space<vmem>>, vector<128x256xf32>
    %cst_47 = arith.constant dense<0.000000e+00> : vector<32x256xf32>
    %83 = tpu.matmul %73, %82, %cst_47 {dimension_numbers = #tpu.dot_dimension_numbers<[1], [0], [0], [1], [0, 0, 1, 1], [], []>} : vector<32x128xf32>, vector<128x256xf32>, vector<32x256xf32> -> vector<32x256xf32>
    %c8_48 = arith.constant 8 : index
    %c0_49 = arith.constant 0 : index
    %84 = vector.load %arg3[%c8_48, %c0_49] : memref<272x256xf32, #tpu.memory_space<vmem>>, vector<128x256xf32>
    %cst_50 = arith.constant dense<0.000000e+00> : vector<32x256xf32>
    %85 = tpu.matmul %79, %84, %cst_50 {dimension_numbers = #tpu.dot_dimension_numbers<[1], [0], [0], [1], [0, 0, 1, 1], [], []>} : vector<32x128xf32>, vector<128x256xf32>, vector<32x256xf32> -> vector<32x256xf32>
    %86 = vector.extract_strided_slice %81 {offsets = [0, 0], sizes = [32, 128], strides = [1, 1]} : vector<32x256xf32> to vector<32x128xf32>
    %87 = vector.extract_strided_slice %83 {offsets = [0, 0], sizes = [32, 128], strides = [1, 1]} : vector<32x256xf32> to vector<32x128xf32>
    %88 = vector.extract_strided_slice %85 {offsets = [0, 0], sizes = [32, 128], strides = [1, 1]} : vector<32x256xf32> to vector<32x128xf32>
    %c0_51 = arith.constant 0 : index
    %89 = memref.load %arg1[%c0_51] : memref<18xi32, #tpu.memory_space<smem>>
    %c0_i32_52 = arith.constant 0 : i32
    %90 = arith.cmpi ne, %89, %c0_i32_52 : i32
    %cst_53 = arith.constant 0.000000e+00 : f32
    %91 = vector.broadcast %cst_53 : f32 to vector<32x128xf32>
    %92 = arith.select %90, %86, %91 : vector<32x128xf32>
    %c1_54 = arith.constant 1 : index
    %93 = memref.load %arg1[%c1_54] : memref<18xi32, #tpu.memory_space<smem>>
    %c0_i32_55 = arith.constant 0 : i32
    %94 = arith.cmpi ne, %93, %c0_i32_55 : i32
    %cst_56 = arith.constant 0.000000e+00 : f32
    %95 = vector.broadcast %cst_56 : f32 to vector<32x128xf32>
    %96 = arith.select %94, %87, %95 : vector<32x128xf32>
    %97 = arith.addf %92, %96 : vector<32x128xf32>
    %c2_57 = arith.constant 2 : index
    %98 = memref.load %arg1[%c2_57] : memref<18xi32, #tpu.memory_space<smem>>
    %c0_i32_58 = arith.constant 0 : i32
    %99 = arith.cmpi ne, %98, %c0_i32_58 : i32
    %cst_59 = arith.constant 0.000000e+00 : f32
    %100 = vector.broadcast %cst_59 : f32 to vector<32x128xf32>
    %101 = arith.select %99, %88, %100 : vector<32x128xf32>
    %102 = arith.addf %97, %101 : vector<32x128xf32>
    %c3_60 = arith.constant 3 : index
    %103 = memref.load %arg1[%c3_60] : memref<18xi32, #tpu.memory_space<smem>>
    %c0_i32_61 = arith.constant 0 : i32
    %104 = arith.cmpi ne, %103, %c0_i32_61 : i32
    %cst_62 = arith.constant 0.000000e+00 : f32
    %105 = vector.broadcast %cst_62 : f32 to vector<32x128xf32>
    %106 = arith.select %104, %86, %105 : vector<32x128xf32>
    %c4_63 = arith.constant 4 : index
    %107 = memref.load %arg1[%c4_63] : memref<18xi32, #tpu.memory_space<smem>>
    %c0_i32_64 = arith.constant 0 : i32
    %108 = arith.cmpi ne, %107, %c0_i32_64 : i32
    %cst_65 = arith.constant 0.000000e+00 : f32
    %109 = vector.broadcast %cst_65 : f32 to vector<32x128xf32>
    %110 = arith.select %108, %87, %109 : vector<32x128xf32>
    %111 = arith.addf %106, %110 : vector<32x128xf32>
    %c5_66 = arith.constant 5 : index
    %112 = memref.load %arg1[%c5_66] : memref<18xi32, #tpu.memory_space<smem>>
    %c0_i32_67 = arith.constant 0 : i32
    %113 = arith.cmpi ne, %112, %c0_i32_67 : i32
    %cst_68 = arith.constant 0.000000e+00 : f32
    %114 = vector.broadcast %cst_68 : f32 to vector<32x128xf32>
    %115 = arith.select %113, %88, %114 : vector<32x128xf32>
    %116 = arith.addf %111, %115 : vector<32x128xf32>
    %c6_69 = arith.constant 6 : index
    %117 = memref.load %arg1[%c6_69] : memref<18xi32, #tpu.memory_space<smem>>
    %c0_i32_70 = arith.constant 0 : i32
    %118 = arith.cmpi ne, %117, %c0_i32_70 : i32
    %cst_71 = arith.constant 0.000000e+00 : f32
    %119 = vector.broadcast %cst_71 : f32 to vector<32x128xf32>
    %120 = arith.select %118, %86, %119 : vector<32x128xf32>
    %c7_72 = arith.constant 7 : index
    %121 = memref.load %arg1[%c7_72] : memref<18xi32, #tpu.memory_space<smem>>
    %c0_i32_73 = arith.constant 0 : i32
    %122 = arith.cmpi ne, %121, %c0_i32_73 : i32
    %cst_74 = arith.constant 0.000000e+00 : f32
    %123 = vector.broadcast %cst_74 : f32 to vector<32x128xf32>
    %124 = arith.select %122, %87, %123 : vector<32x128xf32>
    %125 = arith.addf %120, %124 : vector<32x128xf32>
    %c8_75 = arith.constant 8 : index
    %126 = memref.load %arg1[%c8_75] : memref<18xi32, #tpu.memory_space<smem>>
    %c0_i32_76 = arith.constant 0 : i32
    %127 = arith.cmpi ne, %126, %c0_i32_76 : i32
    %cst_77 = arith.constant 0.000000e+00 : f32
    %128 = vector.broadcast %cst_77 : f32 to vector<32x128xf32>
    %129 = arith.select %127, %88, %128 : vector<32x128xf32>
    %130 = arith.addf %125, %129 : vector<32x128xf32>
    %131 = vector.extract_strided_slice %81 {offsets = [0, 128], sizes = [32, 128], strides = [1, 1]} : vector<32x256xf32> to vector<32x128xf32>
    %132 = arith.addf %102, %131 : vector<32x128xf32>
    %133 = vector.broadcast %7 : vector<1x128xf32> to vector<32x128xf32>
    %134 = arith.addf %132, %133 : vector<32x128xf32>
    %cst_78 = arith.constant 0.000000e+00 : f32
    %135 = vector.broadcast %cst_78 : f32 to vector<32x128xf32>
    %136 = arith.maximumf %134, %135 : vector<32x128xf32>
    %137 = vector.extract_strided_slice %83 {offsets = [0, 128], sizes = [32, 128], strides = [1, 1]} : vector<32x256xf32> to vector<32x128xf32>
    %138 = arith.addf %116, %137 : vector<32x128xf32>
    %139 = vector.broadcast %7 : vector<1x128xf32> to vector<32x128xf32>
    %140 = arith.addf %138, %139 : vector<32x128xf32>
    %cst_79 = arith.constant 0.000000e+00 : f32
    %141 = vector.broadcast %cst_79 : f32 to vector<32x128xf32>
    %142 = arith.maximumf %140, %141 : vector<32x128xf32>
    %143 = vector.extract_strided_slice %85 {offsets = [0, 128], sizes = [32, 128], strides = [1, 1]} : vector<32x256xf32> to vector<32x128xf32>
    %144 = arith.addf %130, %143 : vector<32x128xf32>
    %145 = vector.broadcast %7 : vector<1x128xf32> to vector<32x128xf32>
    %146 = arith.addf %144, %145 : vector<32x128xf32>
    %cst_80 = arith.constant 0.000000e+00 : f32
    %147 = vector.broadcast %cst_80 : f32 to vector<32x128xf32>
    %148 = arith.maximumf %146, %147 : vector<32x128xf32>
    %c136 = arith.constant 136 : index
    %c0_81 = arith.constant 0 : index
    %149 = vector.load %arg3[%c136, %c0_81] : memref<272x256xf32, #tpu.memory_space<vmem>>, vector<128x256xf32>
    %cst_82 = arith.constant dense<0.000000e+00> : vector<32x256xf32>
    %150 = tpu.matmul %136, %149, %cst_82 {dimension_numbers = #tpu.dot_dimension_numbers<[1], [0], [0], [1], [0, 0, 1, 1], [], []>} : vector<32x128xf32>, vector<128x256xf32>, vector<32x256xf32> -> vector<32x256xf32>
    %c136_83 = arith.constant 136 : index
    %c0_84 = arith.constant 0 : index
    %151 = vector.load %arg3[%c136_83, %c0_84] : memref<272x256xf32, #tpu.memory_space<vmem>>, vector<128x256xf32>
    %cst_85 = arith.constant dense<0.000000e+00> : vector<32x256xf32>
    %152 = tpu.matmul %142, %151, %cst_85 {dimension_numbers = #tpu.dot_dimension_numbers<[1], [0], [0], [1], [0, 0, 1, 1], [], []>} : vector<32x128xf32>, vector<128x256xf32>, vector<32x256xf32> -> vector<32x256xf32>
    %c136_86 = arith.constant 136 : index
    %c0_87 = arith.constant 0 : index
    %153 = vector.load %arg3[%c136_86, %c0_87] : memref<272x256xf32, #tpu.memory_space<vmem>>, vector<128x256xf32>
    %cst_88 = arith.constant dense<0.000000e+00> : vector<32x256xf32>
    %154 = tpu.matmul %148, %153, %cst_88 {dimension_numbers = #tpu.dot_dimension_numbers<[1], [0], [0], [1], [0, 0, 1, 1], [], []>} : vector<32x128xf32>, vector<128x256xf32>, vector<32x256xf32> -> vector<32x256xf32>
    %155 = vector.broadcast %9 : vector<1x256xf32> to vector<32x256xf32>
    %156 = arith.mulf %150, %155 : vector<32x256xf32>
    %157 = vector.extract_strided_slice %156 {offsets = [0, 0], sizes = [32, 128], strides = [1, 1]} : vector<32x256xf32> to vector<32x128xf32>
    %cst_89 = arith.constant dense<0.000000e+00> : vector<32xf32>
    %158 = vector.multi_reduction <add>, %157, %cst_89 [1] : vector<32x128xf32> to vector<32xf32>
    %159 = vector.shape_cast %158 : vector<32xf32> to vector<32x1xf32>
    %160 = vector.extract_strided_slice %156 {offsets = [0, 128], sizes = [32, 128], strides = [1, 1]} : vector<32x256xf32> to vector<32x128xf32>
    %cst_90 = arith.constant dense<0.000000e+00> : vector<32xf32>
    %161 = vector.multi_reduction <add>, %160, %cst_90 [1] : vector<32x128xf32> to vector<32xf32>
    %162 = vector.shape_cast %161 : vector<32xf32> to vector<32x1xf32>
    %163 = tpu.concatenate %159, %162 in 1 : vector<32x1xf32>, vector<32x1xf32> -> vector<32x2xf32>
    %164 = vector.broadcast %9 : vector<1x256xf32> to vector<32x256xf32>
    %165 = arith.mulf %152, %164 : vector<32x256xf32>
    %166 = vector.extract_strided_slice %165 {offsets = [0, 0], sizes = [32, 128], strides = [1, 1]} : vector<32x256xf32> to vector<32x128xf32>
    %cst_91 = arith.constant dense<0.000000e+00> : vector<32xf32>
    %167 = vector.multi_reduction <add>, %166, %cst_91 [1] : vector<32x128xf32> to vector<32xf32>
    %168 = vector.shape_cast %167 : vector<32xf32> to vector<32x1xf32>
    %169 = vector.extract_strided_slice %165 {offsets = [0, 128], sizes = [32, 128], strides = [1, 1]} : vector<32x256xf32> to vector<32x128xf32>
    %cst_92 = arith.constant dense<0.000000e+00> : vector<32xf32>
    %170 = vector.multi_reduction <add>, %169, %cst_92 [1] : vector<32x128xf32> to vector<32xf32>
    %171 = vector.shape_cast %170 : vector<32xf32> to vector<32x1xf32>
    %172 = tpu.concatenate %168, %171 in 1 : vector<32x1xf32>, vector<32x1xf32> -> vector<32x2xf32>
    %173 = vector.broadcast %9 : vector<1x256xf32> to vector<32x256xf32>
    %174 = arith.mulf %154, %173 : vector<32x256xf32>
    %175 = vector.extract_strided_slice %174 {offsets = [0, 0], sizes = [32, 128], strides = [1, 1]} : vector<32x256xf32> to vector<32x128xf32>
    %cst_93 = arith.constant dense<0.000000e+00> : vector<32xf32>
    %176 = vector.multi_reduction <add>, %175, %cst_93 [1] : vector<32x128xf32> to vector<32xf32>
    %177 = vector.shape_cast %176 : vector<32xf32> to vector<32x1xf32>
    %178 = vector.extract_strided_slice %174 {offsets = [0, 128], sizes = [32, 128], strides = [1, 1]} : vector<32x256xf32> to vector<32x128xf32>
    %cst_94 = arith.constant dense<0.000000e+00> : vector<32xf32>
    %179 = vector.multi_reduction <add>, %178, %cst_94 [1] : vector<32x128xf32> to vector<32xf32>
    %180 = vector.shape_cast %179 : vector<32xf32> to vector<32x1xf32>
    %181 = tpu.concatenate %177, %180 in 1 : vector<32x1xf32>, vector<32x1xf32> -> vector<32x2xf32>
    %182 = vector.broadcast %10 : vector<1x256xf32> to vector<32x256xf32>
    %183 = arith.mulf %150, %182 : vector<32x256xf32>
    %184 = vector.extract_strided_slice %183 {offsets = [0, 0], sizes = [32, 128], strides = [1, 1]} : vector<32x256xf32> to vector<32x128xf32>
    %cst_95 = arith.constant dense<0.000000e+00> : vector<32xf32>
    %185 = vector.multi_reduction <add>, %184, %cst_95 [1] : vector<32x128xf32> to vector<32xf32>
    %186 = vector.shape_cast %185 : vector<32xf32> to vector<32x1xf32>
    %187 = vector.extract_strided_slice %183 {offsets = [0, 128], sizes = [32, 128], strides = [1, 1]} : vector<32x256xf32> to vector<32x128xf32>
    %cst_96 = arith.constant dense<0.000000e+00> : vector<32xf32>
    %188 = vector.multi_reduction <add>, %187, %cst_96 [1] : vector<32x128xf32> to vector<32xf32>
    %189 = vector.shape_cast %188 : vector<32xf32> to vector<32x1xf32>
    %190 = tpu.concatenate %186, %189 in 1 : vector<32x1xf32>, vector<32x1xf32> -> vector<32x2xf32>
    %191 = vector.broadcast %10 : vector<1x256xf32> to vector<32x256xf32>
    %192 = arith.mulf %152, %191 : vector<32x256xf32>
    %193 = vector.extract_strided_slice %192 {offsets = [0, 0], sizes = [32, 128], strides = [1, 1]} : vector<32x256xf32> to vector<32x128xf32>
    %cst_97 = arith.constant dense<0.000000e+00> : vector<32xf32>
    %194 = vector.multi_reduction <add>, %193, %cst_97 [1] : vector<32x128xf32> to vector<32xf32>
    %195 = vector.shape_cast %194 : vector<32xf32> to vector<32x1xf32>
    %196 = vector.extract_strided_slice %192 {offsets = [0, 128], sizes = [32, 128], strides = [1, 1]} : vector<32x256xf32> to vector<32x128xf32>
    %cst_98 = arith.constant dense<0.000000e+00> : vector<32xf32>
    %197 = vector.multi_reduction <add>, %196, %cst_98 [1] : vector<32x128xf32> to vector<32xf32>
    %198 = vector.shape_cast %197 : vector<32xf32> to vector<32x1xf32>
    %199 = tpu.concatenate %195, %198 in 1 : vector<32x1xf32>, vector<32x1xf32> -> vector<32x2xf32>
    %200 = vector.broadcast %10 : vector<1x256xf32> to vector<32x256xf32>
    %201 = arith.mulf %154, %200 : vector<32x256xf32>
    %202 = vector.extract_strided_slice %201 {offsets = [0, 0], sizes = [32, 128], strides = [1, 1]} : vector<32x256xf32> to vector<32x128xf32>
    %cst_99 = arith.constant dense<0.000000e+00> : vector<32xf32>
    %203 = vector.multi_reduction <add>, %202, %cst_99 [1] : vector<32x128xf32> to vector<32xf32>
    %204 = vector.shape_cast %203 : vector<32xf32> to vector<32x1xf32>
    %205 = vector.extract_strided_slice %201 {offsets = [0, 128], sizes = [32, 128], strides = [1, 1]} : vector<32x256xf32> to vector<32x128xf32>
    %cst_100 = arith.constant dense<0.000000e+00> : vector<32xf32>
    %206 = vector.multi_reduction <add>, %205, %cst_100 [1] : vector<32x128xf32> to vector<32xf32>
    %207 = vector.shape_cast %206 : vector<32xf32> to vector<32x1xf32>
    %208 = tpu.concatenate %204, %207 in 1 : vector<32x1xf32>, vector<32x1xf32> -> vector<32x2xf32>
    %209 = arith.addf %190, %163 : vector<32x2xf32>
    %cst_101 = arith.constant 0.000000e+00 : f32
    %210 = vector.broadcast %cst_101 : f32 to vector<32x2xf32>
    %211 = arith.cmpf ogt, %209, %210 : vector<32x2xf32>
    %cst_102 = arith.constant 2.000000e-01 : f32
    %212 = vector.broadcast %cst_102 : f32 to vector<32x2xf32>
    %213 = arith.mulf %212, %209 : vector<32x2xf32>
    %214 = arith.select %211, %209, %213 : vector<32x2xi1>, vector<32x2xf32>
    %c9 = arith.constant 9 : index
    %215 = memref.load %arg1[%c9] : memref<18xi32, #tpu.memory_space<smem>>
    %c0_i32_103 = arith.constant 0 : i32
    %216 = arith.cmpi ne, %215, %c0_i32_103 : i32
    %cst_104 = arith.constant -1.000000e+30 : f32
    %217 = vector.broadcast %cst_104 : f32 to vector<32x2xf32>
    %218 = arith.select %216, %214, %217 : vector<32x2xf32>
    %219 = arith.addf %190, %172 : vector<32x2xf32>
    %cst_105 = arith.constant 0.000000e+00 : f32
    %220 = vector.broadcast %cst_105 : f32 to vector<32x2xf32>
    %221 = arith.cmpf ogt, %219, %220 : vector<32x2xf32>
    %cst_106 = arith.constant 2.000000e-01 : f32
    %222 = vector.broadcast %cst_106 : f32 to vector<32x2xf32>
    %223 = arith.mulf %222, %219 : vector<32x2xf32>
    %224 = arith.select %221, %219, %223 : vector<32x2xi1>, vector<32x2xf32>
    %c10 = arith.constant 10 : index
    %225 = memref.load %arg1[%c10] : memref<18xi32, #tpu.memory_space<smem>>
    %c0_i32_107 = arith.constant 0 : i32
    %226 = arith.cmpi ne, %225, %c0_i32_107 : i32
    %cst_108 = arith.constant -1.000000e+30 : f32
    %227 = vector.broadcast %cst_108 : f32 to vector<32x2xf32>
    %228 = arith.select %226, %224, %227 : vector<32x2xf32>
    %229 = arith.addf %190, %181 : vector<32x2xf32>
    %cst_109 = arith.constant 0.000000e+00 : f32
    %230 = vector.broadcast %cst_109 : f32 to vector<32x2xf32>
    %231 = arith.cmpf ogt, %229, %230 : vector<32x2xf32>
    %cst_110 = arith.constant 2.000000e-01 : f32
    %232 = vector.broadcast %cst_110 : f32 to vector<32x2xf32>
    %233 = arith.mulf %232, %229 : vector<32x2xf32>
    %234 = arith.select %231, %229, %233 : vector<32x2xi1>, vector<32x2xf32>
    %c11 = arith.constant 11 : index
    %235 = memref.load %arg1[%c11] : memref<18xi32, #tpu.memory_space<smem>>
    %c0_i32_111 = arith.constant 0 : i32
    %236 = arith.cmpi ne, %235, %c0_i32_111 : i32
    %cst_112 = arith.constant -1.000000e+30 : f32
    %237 = vector.broadcast %cst_112 : f32 to vector<32x2xf32>
    %238 = arith.select %236, %234, %237 : vector<32x2xf32>
    %239 = arith.maximumf %218, %228 : vector<32x2xf32>
    %240 = arith.maximumf %239, %238 : vector<32x2xf32>
    %241 = arith.subf %218, %240 : vector<32x2xf32>
    %242 = math.exp %241 : vector<32x2xf32>
    %243 = arith.subf %228, %240 : vector<32x2xf32>
    %244 = math.exp %243 : vector<32x2xf32>
    %245 = arith.subf %238, %240 : vector<32x2xf32>
    %246 = math.exp %245 : vector<32x2xf32>
    %247 = arith.addf %242, %244 : vector<32x2xf32>
    %248 = arith.addf %247, %246 : vector<32x2xf32>
    %249 = tpu.reciprocal %248 {approx = true} : vector<32x2xf32> -> vector<32x2xf32>
    %250 = arith.mulf %248, %249 : vector<32x2xf32>
    %cst_113 = arith.constant 2.000000e+00 : f32
    %251 = vector.broadcast %cst_113 : f32 to vector<32x2xf32>
    %252 = arith.subf %251, %250 : vector<32x2xf32>
    %253 = arith.mulf %249, %252 : vector<32x2xf32>
    %254 = arith.mulf %242, %253 : vector<32x2xf32>
    %255 = vector.extract_strided_slice %254 {offsets = [0, 0], sizes = [32, 1], strides = [1, 1]} : vector<32x2xf32> to vector<32x1xf32>
    %256 = vector.extract_strided_slice %150 {offsets = [0, 0], sizes = [32, 128], strides = [1, 1]} : vector<32x256xf32> to vector<32x128xf32>
    %257 = vector.broadcast %255 : vector<32x1xf32> to vector<32x128xf32>
    %258 = arith.mulf %257, %256 : vector<32x128xf32>
    %259 = vector.extract_strided_slice %254 {offsets = [0, 1], sizes = [32, 1], strides = [1, 1]} : vector<32x2xf32> to vector<32x1xf32>
    %260 = vector.extract_strided_slice %150 {offsets = [0, 128], sizes = [32, 128], strides = [1, 1]} : vector<32x256xf32> to vector<32x128xf32>
    %261 = vector.broadcast %259 : vector<32x1xf32> to vector<32x128xf32>
    %262 = arith.mulf %261, %260 : vector<32x128xf32>
    %263 = arith.addf %258, %262 : vector<32x128xf32>
    %264 = arith.mulf %244, %253 : vector<32x2xf32>
    %265 = vector.extract_strided_slice %264 {offsets = [0, 0], sizes = [32, 1], strides = [1, 1]} : vector<32x2xf32> to vector<32x1xf32>
    %266 = vector.extract_strided_slice %152 {offsets = [0, 0], sizes = [32, 128], strides = [1, 1]} : vector<32x256xf32> to vector<32x128xf32>
    %267 = vector.broadcast %265 : vector<32x1xf32> to vector<32x128xf32>
    %268 = arith.mulf %267, %266 : vector<32x128xf32>
    %269 = vector.extract_strided_slice %264 {offsets = [0, 1], sizes = [32, 1], strides = [1, 1]} : vector<32x2xf32> to vector<32x1xf32>
    %270 = vector.extract_strided_slice %152 {offsets = [0, 128], sizes = [32, 128], strides = [1, 1]} : vector<32x256xf32> to vector<32x128xf32>
    %271 = vector.broadcast %269 : vector<32x1xf32> to vector<32x128xf32>
    %272 = arith.mulf %271, %270 : vector<32x128xf32>
    %273 = arith.addf %268, %272 : vector<32x128xf32>
    %274 = arith.addf %263, %273 : vector<32x128xf32>
    %275 = arith.mulf %246, %253 : vector<32x2xf32>
    %276 = vector.extract_strided_slice %275 {offsets = [0, 0], sizes = [32, 1], strides = [1, 1]} : vector<32x2xf32> to vector<32x1xf32>
    %277 = vector.extract_strided_slice %154 {offsets = [0, 0], sizes = [32, 128], strides = [1, 1]} : vector<32x256xf32> to vector<32x128xf32>
    %278 = vector.broadcast %276 : vector<32x1xf32> to vector<32x128xf32>
    %279 = arith.mulf %278, %277 : vector<32x128xf32>
    %280 = vector.extract_strided_slice %275 {offsets = [0, 1], sizes = [32, 1], strides = [1, 1]} : vector<32x2xf32> to vector<32x1xf32>
    %281 = vector.extract_strided_slice %154 {offsets = [0, 128], sizes = [32, 128], strides = [1, 1]} : vector<32x256xf32> to vector<32x128xf32>
    %282 = vector.broadcast %280 : vector<32x1xf32> to vector<32x128xf32>
    %283 = arith.mulf %282, %281 : vector<32x128xf32>
    %284 = arith.addf %279, %283 : vector<32x128xf32>
    %285 = arith.addf %274, %284 : vector<32x128xf32>
    %cst_114 = arith.constant 5.000000e-01 : f32
    %286 = vector.broadcast %cst_114 : f32 to vector<32x128xf32>
    %287 = arith.mulf %286, %285 : vector<32x128xf32>
    %288 = vector.broadcast %8 : vector<1x128xf32> to vector<32x128xf32>
    %289 = arith.addf %287, %288 : vector<32x128xf32>
    %cst_115 = arith.constant 0.000000e+00 : f32
    %290 = vector.broadcast %cst_115 : f32 to vector<32x128xf32>
    %291 = arith.maximumf %289, %290 : vector<32x128xf32>
    %292 = arith.addf %199, %163 : vector<32x2xf32>
    %cst_116 = arith.constant 0.000000e+00 : f32
    %293 = vector.broadcast %cst_116 : f32 to vector<32x2xf32>
    %294 = arith.cmpf ogt, %292, %293 : vector<32x2xf32>
    %cst_117 = arith.constant 2.000000e-01 : f32
    %295 = vector.broadcast %cst_117 : f32 to vector<32x2xf32>
    %296 = arith.mulf %295, %292 : vector<32x2xf32>
    %297 = arith.select %294, %292, %296 : vector<32x2xi1>, vector<32x2xf32>
    %c12 = arith.constant 12 : index
    %298 = memref.load %arg1[%c12] : memref<18xi32, #tpu.memory_space<smem>>
    %c0_i32_118 = arith.constant 0 : i32
    %299 = arith.cmpi ne, %298, %c0_i32_118 : i32
    %cst_119 = arith.constant -1.000000e+30 : f32
    %300 = vector.broadcast %cst_119 : f32 to vector<32x2xf32>
    %301 = arith.select %299, %297, %300 : vector<32x2xf32>
    %302 = arith.addf %199, %172 : vector<32x2xf32>
    %cst_120 = arith.constant 0.000000e+00 : f32
    %303 = vector.broadcast %cst_120 : f32 to vector<32x2xf32>
    %304 = arith.cmpf ogt, %302, %303 : vector<32x2xf32>
    %cst_121 = arith.constant 2.000000e-01 : f32
    %305 = vector.broadcast %cst_121 : f32 to vector<32x2xf32>
    %306 = arith.mulf %305, %302 : vector<32x2xf32>
    %307 = arith.select %304, %302, %306 : vector<32x2xi1>, vector<32x2xf32>
    %c13 = arith.constant 13 : index
    %308 = memref.load %arg1[%c13] : memref<18xi32, #tpu.memory_space<smem>>
    %c0_i32_122 = arith.constant 0 : i32
    %309 = arith.cmpi ne, %308, %c0_i32_122 : i32
    %cst_123 = arith.constant -1.000000e+30 : f32
    %310 = vector.broadcast %cst_123 : f32 to vector<32x2xf32>
    %311 = arith.select %309, %307, %310 : vector<32x2xf32>
    %312 = arith.addf %199, %181 : vector<32x2xf32>
    %cst_124 = arith.constant 0.000000e+00 : f32
    %313 = vector.broadcast %cst_124 : f32 to vector<32x2xf32>
    %314 = arith.cmpf ogt, %312, %313 : vector<32x2xf32>
    %cst_125 = arith.constant 2.000000e-01 : f32
    %315 = vector.broadcast %cst_125 : f32 to vector<32x2xf32>
    %316 = arith.mulf %315, %312 : vector<32x2xf32>
    %317 = arith.select %314, %312, %316 : vector<32x2xi1>, vector<32x2xf32>
    %c14 = arith.constant 14 : index
    %318 = memref.load %arg1[%c14] : memref<18xi32, #tpu.memory_space<smem>>
    %c0_i32_126 = arith.constant 0 : i32
    %319 = arith.cmpi ne, %318, %c0_i32_126 : i32
    %cst_127 = arith.constant -1.000000e+30 : f32
    %320 = vector.broadcast %cst_127 : f32 to vector<32x2xf32>
    %321 = arith.select %319, %317, %320 : vector<32x2xf32>
    %322 = arith.maximumf %301, %311 : vector<32x2xf32>
    %323 = arith.maximumf %322, %321 : vector<32x2xf32>
    %324 = arith.subf %301, %323 : vector<32x2xf32>
    %325 = math.exp %324 : vector<32x2xf32>
    %326 = arith.subf %311, %323 : vector<32x2xf32>
    %327 = math.exp %326 : vector<32x2xf32>
    %328 = arith.subf %321, %323 : vector<32x2xf32>
    %329 = math.exp %328 : vector<32x2xf32>
    %330 = arith.addf %325, %327 : vector<32x2xf32>
    %331 = arith.addf %330, %329 : vector<32x2xf32>
    %332 = tpu.reciprocal %331 {approx = true} : vector<32x2xf32> -> vector<32x2xf32>
    %333 = arith.mulf %331, %332 : vector<32x2xf32>
    %cst_128 = arith.constant 2.000000e+00 : f32
    %334 = vector.broadcast %cst_128 : f32 to vector<32x2xf32>
    %335 = arith.subf %334, %333 : vector<32x2xf32>
    %336 = arith.mulf %332, %335 : vector<32x2xf32>
    %337 = arith.mulf %325, %336 : vector<32x2xf32>
    %338 = vector.extract_strided_slice %337 {offsets = [0, 0], sizes = [32, 1], strides = [1, 1]} : vector<32x2xf32> to vector<32x1xf32>
    %339 = vector.extract_strided_slice %150 {offsets = [0, 0], sizes = [32, 128], strides = [1, 1]} : vector<32x256xf32> to vector<32x128xf32>
    %340 = vector.broadcast %338 : vector<32x1xf32> to vector<32x128xf32>
    %341 = arith.mulf %340, %339 : vector<32x128xf32>
    %342 = vector.extract_strided_slice %337 {offsets = [0, 1], sizes = [32, 1], strides = [1, 1]} : vector<32x2xf32> to vector<32x1xf32>
    %343 = vector.extract_strided_slice %150 {offsets = [0, 128], sizes = [32, 128], strides = [1, 1]} : vector<32x256xf32> to vector<32x128xf32>
    %344 = vector.broadcast %342 : vector<32x1xf32> to vector<32x128xf32>
    %345 = arith.mulf %344, %343 : vector<32x128xf32>
    %346 = arith.addf %341, %345 : vector<32x128xf32>
    %347 = arith.mulf %327, %336 : vector<32x2xf32>
    %348 = vector.extract_strided_slice %347 {offsets = [0, 0], sizes = [32, 1], strides = [1, 1]} : vector<32x2xf32> to vector<32x1xf32>
    %349 = vector.extract_strided_slice %152 {offsets = [0, 0], sizes = [32, 128], strides = [1, 1]} : vector<32x256xf32> to vector<32x128xf32>
    %350 = vector.broadcast %348 : vector<32x1xf32> to vector<32x128xf32>
    %351 = arith.mulf %350, %349 : vector<32x128xf32>
    %352 = vector.extract_strided_slice %347 {offsets = [0, 1], sizes = [32, 1], strides = [1, 1]} : vector<32x2xf32> to vector<32x1xf32>
    %353 = vector.extract_strided_slice %152 {offsets = [0, 128], sizes = [32, 128], strides = [1, 1]} : vector<32x256xf32> to vector<32x128xf32>
    %354 = vector.broadcast %352 : vector<32x1xf32> to vector<32x128xf32>
    %355 = arith.mulf %354, %353 : vector<32x128xf32>
    %356 = arith.addf %351, %355 : vector<32x128xf32>
    %357 = arith.addf %346, %356 : vector<32x128xf32>
    %358 = arith.mulf %329, %336 : vector<32x2xf32>
    %359 = vector.extract_strided_slice %358 {offsets = [0, 0], sizes = [32, 1], strides = [1, 1]} : vector<32x2xf32> to vector<32x1xf32>
    %360 = vector.extract_strided_slice %154 {offsets = [0, 0], sizes = [32, 128], strides = [1, 1]} : vector<32x256xf32> to vector<32x128xf32>
    %361 = vector.broadcast %359 : vector<32x1xf32> to vector<32x128xf32>
    %362 = arith.mulf %361, %360 : vector<32x128xf32>
    %363 = vector.extract_strided_slice %358 {offsets = [0, 1], sizes = [32, 1], strides = [1, 1]} : vector<32x2xf32> to vector<32x1xf32>
    %364 = vector.extract_strided_slice %154 {offsets = [0, 128], sizes = [32, 128], strides = [1, 1]} : vector<32x256xf32> to vector<32x128xf32>
    %365 = vector.broadcast %363 : vector<32x1xf32> to vector<32x128xf32>
    %366 = arith.mulf %365, %364 : vector<32x128xf32>
    %367 = arith.addf %362, %366 : vector<32x128xf32>
    %368 = arith.addf %357, %367 : vector<32x128xf32>
    %cst_129 = arith.constant 5.000000e-01 : f32
    %369 = vector.broadcast %cst_129 : f32 to vector<32x128xf32>
    %370 = arith.mulf %369, %368 : vector<32x128xf32>
    %371 = vector.broadcast %8 : vector<1x128xf32> to vector<32x128xf32>
    %372 = arith.addf %370, %371 : vector<32x128xf32>
    %cst_130 = arith.constant 0.000000e+00 : f32
    %373 = vector.broadcast %cst_130 : f32 to vector<32x128xf32>
    %374 = arith.maximumf %372, %373 : vector<32x128xf32>
    %375 = arith.addf %208, %163 : vector<32x2xf32>
    %cst_131 = arith.constant 0.000000e+00 : f32
    %376 = vector.broadcast %cst_131 : f32 to vector<32x2xf32>
    %377 = arith.cmpf ogt, %375, %376 : vector<32x2xf32>
    %cst_132 = arith.constant 2.000000e-01 : f32
    %378 = vector.broadcast %cst_132 : f32 to vector<32x2xf32>
    %379 = arith.mulf %378, %375 : vector<32x2xf32>
    %380 = arith.select %377, %375, %379 : vector<32x2xi1>, vector<32x2xf32>
    %c15 = arith.constant 15 : index
    %381 = memref.load %arg1[%c15] : memref<18xi32, #tpu.memory_space<smem>>
    %c0_i32_133 = arith.constant 0 : i32
    %382 = arith.cmpi ne, %381, %c0_i32_133 : i32
    %cst_134 = arith.constant -1.000000e+30 : f32
    %383 = vector.broadcast %cst_134 : f32 to vector<32x2xf32>
    %384 = arith.select %382, %380, %383 : vector<32x2xf32>
    %385 = arith.addf %208, %172 : vector<32x2xf32>
    %cst_135 = arith.constant 0.000000e+00 : f32
    %386 = vector.broadcast %cst_135 : f32 to vector<32x2xf32>
    %387 = arith.cmpf ogt, %385, %386 : vector<32x2xf32>
    %cst_136 = arith.constant 2.000000e-01 : f32
    %388 = vector.broadcast %cst_136 : f32 to vector<32x2xf32>
    %389 = arith.mulf %388, %385 : vector<32x2xf32>
    %390 = arith.select %387, %385, %389 : vector<32x2xi1>, vector<32x2xf32>
    %c16 = arith.constant 16 : index
    %391 = memref.load %arg1[%c16] : memref<18xi32, #tpu.memory_space<smem>>
    %c0_i32_137 = arith.constant 0 : i32
    %392 = arith.cmpi ne, %391, %c0_i32_137 : i32
    %cst_138 = arith.constant -1.000000e+30 : f32
    %393 = vector.broadcast %cst_138 : f32 to vector<32x2xf32>
    %394 = arith.select %392, %390, %393 : vector<32x2xf32>
    %395 = arith.addf %208, %181 : vector<32x2xf32>
    %cst_139 = arith.constant 0.000000e+00 : f32
    %396 = vector.broadcast %cst_139 : f32 to vector<32x2xf32>
    %397 = arith.cmpf ogt, %395, %396 : vector<32x2xf32>
    %cst_140 = arith.constant 2.000000e-01 : f32
    %398 = vector.broadcast %cst_140 : f32 to vector<32x2xf32>
    %399 = arith.mulf %398, %395 : vector<32x2xf32>
    %400 = arith.select %397, %395, %399 : vector<32x2xi1>, vector<32x2xf32>
    %c17 = arith.constant 17 : index
    %401 = memref.load %arg1[%c17] : memref<18xi32, #tpu.memory_space<smem>>
    %c0_i32_141 = arith.constant 0 : i32
    %402 = arith.cmpi ne, %401, %c0_i32_141 : i32
    %cst_142 = arith.constant -1.000000e+30 : f32
    %403 = vector.broadcast %cst_142 : f32 to vector<32x2xf32>
    %404 = arith.select %402, %400, %403 : vector<32x2xf32>
    %405 = arith.maximumf %384, %394 : vector<32x2xf32>
    %406 = arith.maximumf %405, %404 : vector<32x2xf32>
    %407 = arith.subf %384, %406 : vector<32x2xf32>
    %408 = math.exp %407 : vector<32x2xf32>
    %409 = arith.subf %394, %406 : vector<32x2xf32>
    %410 = math.exp %409 : vector<32x2xf32>
    %411 = arith.subf %404, %406 : vector<32x2xf32>
    %412 = math.exp %411 : vector<32x2xf32>
    %413 = arith.addf %408, %410 : vector<32x2xf32>
    %414 = arith.addf %413, %412 : vector<32x2xf32>
    %415 = tpu.reciprocal %414 {approx = true} : vector<32x2xf32> -> vector<32x2xf32>
    %416 = arith.mulf %414, %415 : vector<32x2xf32>
    %cst_143 = arith.constant 2.000000e+00 : f32
    %417 = vector.broadcast %cst_143 : f32 to vector<32x2xf32>
    %418 = arith.subf %417, %416 : vector<32x2xf32>
    %419 = arith.mulf %415, %418 : vector<32x2xf32>
    %420 = arith.mulf %408, %419 : vector<32x2xf32>
    %421 = vector.extract_strided_slice %420 {offsets = [0, 0], sizes = [32, 1], strides = [1, 1]} : vector<32x2xf32> to vector<32x1xf32>
    %422 = vector.extract_strided_slice %150 {offsets = [0, 0], sizes = [32, 128], strides = [1, 1]} : vector<32x256xf32> to vector<32x128xf32>
    %423 = vector.broadcast %421 : vector<32x1xf32> to vector<32x128xf32>
    %424 = arith.mulf %423, %422 : vector<32x128xf32>
    %425 = vector.extract_strided_slice %420 {offsets = [0, 1], sizes = [32, 1], strides = [1, 1]} : vector<32x2xf32> to vector<32x1xf32>
    %426 = vector.extract_strided_slice %150 {offsets = [0, 128], sizes = [32, 128], strides = [1, 1]} : vector<32x256xf32> to vector<32x128xf32>
    %427 = vector.broadcast %425 : vector<32x1xf32> to vector<32x128xf32>
    %428 = arith.mulf %427, %426 : vector<32x128xf32>
    %429 = arith.addf %424, %428 : vector<32x128xf32>
    %430 = arith.mulf %410, %419 : vector<32x2xf32>
    %431 = vector.extract_strided_slice %430 {offsets = [0, 0], sizes = [32, 1], strides = [1, 1]} : vector<32x2xf32> to vector<32x1xf32>
    %432 = vector.extract_strided_slice %152 {offsets = [0, 0], sizes = [32, 128], strides = [1, 1]} : vector<32x256xf32> to vector<32x128xf32>
    %433 = vector.broadcast %431 : vector<32x1xf32> to vector<32x128xf32>
    %434 = arith.mulf %433, %432 : vector<32x128xf32>
    %435 = vector.extract_strided_slice %430 {offsets = [0, 1], sizes = [32, 1], strides = [1, 1]} : vector<32x2xf32> to vector<32x1xf32>
    %436 = vector.extract_strided_slice %152 {offsets = [0, 128], sizes = [32, 128], strides = [1, 1]} : vector<32x256xf32> to vector<32x128xf32>
    %437 = vector.broadcast %435 : vector<32x1xf32> to vector<32x128xf32>
    %438 = arith.mulf %437, %436 : vector<32x128xf32>
    %439 = arith.addf %434, %438 : vector<32x128xf32>
    %440 = arith.addf %429, %439 : vector<32x128xf32>
    %441 = arith.mulf %412, %419 : vector<32x2xf32>
    %442 = vector.extract_strided_slice %441 {offsets = [0, 0], sizes = [32, 1], strides = [1, 1]} : vector<32x2xf32> to vector<32x1xf32>
    %443 = vector.extract_strided_slice %154 {offsets = [0, 0], sizes = [32, 128], strides = [1, 1]} : vector<32x256xf32> to vector<32x128xf32>
    %444 = vector.broadcast %442 : vector<32x1xf32> to vector<32x128xf32>
    %445 = arith.mulf %444, %443 : vector<32x128xf32>
    %446 = vector.extract_strided_slice %441 {offsets = [0, 1], sizes = [32, 1], strides = [1, 1]} : vector<32x2xf32> to vector<32x1xf32>
    %447 = vector.extract_strided_slice %154 {offsets = [0, 128], sizes = [32, 128], strides = [1, 1]} : vector<32x256xf32> to vector<32x128xf32>
    %448 = vector.broadcast %446 : vector<32x1xf32> to vector<32x128xf32>
    %449 = arith.mulf %448, %447 : vector<32x128xf32>
    %450 = arith.addf %445, %449 : vector<32x128xf32>
    %451 = arith.addf %440, %450 : vector<32x128xf32>
    %cst_144 = arith.constant 5.000000e-01 : f32
    %452 = vector.broadcast %cst_144 : f32 to vector<32x128xf32>
    %453 = arith.mulf %452, %451 : vector<32x128xf32>
    %454 = vector.broadcast %8 : vector<1x128xf32> to vector<32x128xf32>
    %455 = arith.addf %453, %454 : vector<32x128xf32>
    %cst_145 = arith.constant 0.000000e+00 : f32
    %456 = vector.broadcast %cst_145 : f32 to vector<32x128xf32>
    %457 = arith.maximumf %455, %456 : vector<32x128xf32>
    %c0_146 = arith.constant 0 : index
    %c0_147 = arith.constant 0 : index
    %458 = vector.load %arg4[%c0_146, %c0_147] : memref<392x128xf32, #tpu.memory_space<vmem>>, vector<128x128xf32>
    %cst_148 = arith.constant dense<0.000000e+00> : vector<32x128xf32>
    %459 = tpu.matmul %291, %458, %cst_148 {dimension_numbers = #tpu.dot_dimension_numbers<[1], [0], [0], [1], [0, 0, 1, 1], [], []>} : vector<32x128xf32>, vector<128x128xf32>, vector<32x128xf32> -> vector<32x128xf32>
    %c128_149 = arith.constant 128 : index
    %c0_150 = arith.constant 0 : index
    %460 = vector.load %arg4[%c128_149, %c0_150] : memref<392x128xf32, #tpu.memory_space<vmem>>, vector<128x128xf32>
    %cst_151 = arith.constant dense<0.000000e+00> : vector<32x128xf32>
    %461 = tpu.matmul %374, %460, %cst_151 {dimension_numbers = #tpu.dot_dimension_numbers<[1], [0], [0], [1], [0, 0, 1, 1], [], []>} : vector<32x128xf32>, vector<128x128xf32>, vector<32x128xf32> -> vector<32x128xf32>
    %462 = arith.addf %459, %461 : vector<32x128xf32>
    %c256 = arith.constant 256 : index
    %c0_152 = arith.constant 0 : index
    %463 = vector.load %arg4[%c256, %c0_152] : memref<392x128xf32, #tpu.memory_space<vmem>>, vector<128x128xf32>
    %cst_153 = arith.constant dense<0.000000e+00> : vector<32x128xf32>
    %464 = tpu.matmul %457, %463, %cst_153 {dimension_numbers = #tpu.dot_dimension_numbers<[1], [0], [0], [1], [0, 0, 1, 1], [], []>} : vector<32x128xf32>, vector<128x128xf32>, vector<32x128xf32> -> vector<32x128xf32>
    %465 = arith.addf %462, %464 : vector<32x128xf32>
    %c384 = arith.constant 384 : index
    %c0_154 = arith.constant 0 : index
    %466 = vector.load %arg4[%c384, %c0_154] : memref<392x128xf32, #tpu.memory_space<vmem>>, vector<1x128xf32>
    %467 = vector.broadcast %466 : vector<1x128xf32> to vector<32x128xf32>
    %468 = arith.addf %465, %467 : vector<32x128xf32>
    %c0_155 = arith.constant 0 : index
    %c0_156 = arith.constant 0 : index
    %469 = vector.load %arg5[%c0_155, %c0_156] : memref<32x128xf32, #tpu.memory_space<vmem>>, vector<32x128xf32>
    tpu.vector_store %arg5[%c0_155, %c0_156], %468 {strides = array<i32>} : memref<32x128xf32, #tpu.memory_space<vmem>>, vector<32x128xf32>,
    return
  }
  func.func @transform_0(%arg0: i32, %arg1: memref<18xi32, #tpu.memory_space<smem>>) -> (i32, i32, i32) {
    %c0_i32 = arith.constant 0 : i32
    %c0_i32_0 = arith.constant 0 : i32
    %c0_i32_1 = arith.constant 0 : i32
    return %c0_i32, %arg0, %c0_i32_0 : i32, i32, i32
  }
  func.func @transform_1(%arg0: i32, %arg1: memref<18xi32, #tpu.memory_space<smem>>) -> (i32, i32) {
    %c0_i32 = arith.constant 0 : i32
    %c0_i32_0 = arith.constant 0 : i32
    %c0_i32_1 = arith.constant 0 : i32
    return %c0_i32, %c0_i32_0 : i32, i32
  }
  func.func @transform_2(%arg0: i32, %arg1: memref<18xi32, #tpu.memory_space<smem>>) -> (i32, i32) {
    %c0_i32 = arith.constant 0 : i32
    %c0_i32_0 = arith.constant 0 : i32
    %c0_i32_1 = arith.constant 0 : i32
    return %c0_i32, %c0_i32_0 : i32, i32
  }
  func.func @transform_3(%arg0: i32, %arg1: memref<18xi32, #tpu.memory_space<smem>>) -> (i32, i32) {
    %c0_i32 = arith.constant 0 : i32
    %c0_i32_0 = arith.constant 0 : i32
    return %arg0, %c0_i32 : i32, i32
  }
}

</mosaic_0001>

<bundles_post_ra>
// kernel: tpu_custom_call.1
= control target key start
LH: loop header
LB: loop body
LE: loop exit
PB: predicated region body
PF: predicated region fallthrough
CT: control target
= control target key end

     0   :  { %s2973_s18 = smov [#allocation3]   ;;  %s4827_s0 = inlined_call_operand.vmem [shape: s32[18], index: 0, kind: input, shape index: {}]   ;;  %s4828_s1 = inlined_call_operand.vmem [shape: f32[3,64,8], index: 1, kind: input, shape index: {}]   ;;  %s4829_s2 = inlined_call_operand.hbm [shape: f32[272,256], index: 2, kind: input, shape index: {}]   ;;  %s4830_s3 = inlined_call_operand.hbm [shape: f32[392,128], index: 3, kind: input, shape index: {}]   ;;  %s4831_s4 = inlined_call_operand.hbm [shape: f32[64,128], index: 4, kind: output, shape index: {}]  }
   0x1   :  { %s10_s17 = sshll.u32 %s4827_s0, 4  ;;  %s11_s17 = int_to_ptr.vmem [resolvable:$true] %s10_s17 }
   0x2   :  { %13 = dma.vmem_to_smem %s11_s17, 16, %s2973_s18, [#allocation2] }
   0x3   :  { %2943 = dma.done.wait [#allocation2], 16 }
   0x4   :  { %2944 = vsyncadd [#allocation2], 4294967280 }
   0x5   :  { %16 = sfence }
   0x6   :  { %17 = vsyncpa [#allocation6], 0 }
   0x7   :  { %18 = vsyncpa [#allocation9], 0 }
   0x8   :  { %19 = vsyncpa [#allocation7], 0 }
   0x9   :  { %21 = vsyncpa [#allocation7 + $0x1], 0  ;;  %s3012_s19 = smov 0   ;;  %s3014_s20 = smov 0  }
   0xa   :  { %s3016_s21 = smov 0   ;;  %s3018_s22 = smov 0  }
   0xb LB: > { %s3033_s0 = sadd.s32 4294967295, %s2971_s22   ;;  %s2568_s23 = sadd.s32 4294967294, %s2971_s22   ;;  %s2971_s22 = sphi %s3018_s22, %s4971_s22   ;;  %s2967_s21 = sphi %s3016_s21, %s4970_s21   ;;  %s2963_s20 = sphi %s3014_s20, %s4969_s20   ;;  %s2959_s19 = sphi %s3012_s19, %s4968_s19  }
   0xc   : > { %s3037_s24 = sadd.s32 1, %s2971_s22   ;;  %s34_s25 = sadd.s32 1, %s2967_s21 }
   0xd   : > { %s31_s26 = ssub.s32 %s2971_s22, %s3037_s24  ;;  %p41_p0 = scmp.ne.s32.totalorder %s2967_s21, %s2963_s20 }
   0xe   : > { %p32_p1 = scmp.eq.s32.totalorder %s31_s26, 0  ;;  %p42_p2 = scmp.eq.s32.totalorder %s2971_s22, 0 }
   0xf   : > { %p113_p3 = scmp.eq.s32.totalorder %s3033_s0, 1  ;;  %p118_p4 = scmp.ne.s32.totalorder %s2963_s20, %s2959_s19 }
  0x10   : > { %s3049_s27 = scalar_select %p32_p1, %s2967_s21, %s34_s25  }
  0x11   : > { %p3051_p5 = por %p42_p2, %p41_p0  ;;  %p3055_p6 = por %p113_p3, %p41_p0 }
  0x12   : > { %p119_p7 = scmp.eq.s32.totalorder %s2568_s23, 1  ;;  %p2569_p8 = scmp.ge.s32.totalorder %s2971_s22, 1 }
  0x13   : > { %p126_p9 = scmp.lt.s32.totalorder %s2971_s22, 3  ;;  %p2661_p11 = scmp.eq.s32.totalorder %s3033_s0, 0 }
  0x14   : > { %p3061_p10 = por %p119_p7, %p118_p4  ;;  %s137_s8 = sshll.u32 %s4829_s2, 4  ;;  %s138_s8 = int_to_ptr.hbm [resolvable:$true] %s137_s8 }
  0x15   : > { %p3066_p12 = pnand %p2569_p8, %p126_p9  ;;  %s2974_s9 = smov [#allocation5]  }
  0x16   : > { %s139_s10 = sshll.u32 %s2974_s9, 4  ;;  %s151_s13 = sshll.u32 %s4830_s3, 4  ;;  %s140_s10 = int_to_ptr.vmem [resolvable:$true] %s139_s10  ;;  %s152_s13 = int_to_ptr.hbm [resolvable:$true] %s151_s13 }
  0x17   : > { %p2650_p13 = pneg %p3066_p12  ;;  %s2975_s14 = smov 256  }
  0x18   : > { %s2976_s15 = smov 16   ;;  %s2977_s16 = smov [#allocation8]  }
  0x19   : > { %p2651_p0 = pnand %p2661_p11, %p2650_p13  ;;  %s153_s17 = sshll.u32 %s2977_s16, 4  ;;  %s154_s17 = int_to_ptr.vmem [resolvable:$true] %s153_s17 }
  0x1a   : > { %s2978_s18 = smov 128   ;;  %s2979_s23 = smov 8  }
  0x1b   : > { %2653 = dma.hbm_to_vmem [thread:$0]  (!%p2651_p0), %s138_s8, 8704, %s140_s10, [#allocation6], %s2975_s14, %s2975_s14, %s2976_s15  }
  0x1c   : > { %2656 = dma.hbm_to_vmem [thread:$0]  (!%p2651_p0), %s152_s13, 6272, %s154_s17, [#allocation9], %s2978_s18, %s2978_s18, %s2979_s23  }
  0x1d   : > { %p2572_p1 = scmp.ge.s32.totalorder %s2971_s22, 2 }
  0x1f   : > { %163 = sbr.rel (%p2572_p1) target bundleno = 52 (0x34), region = 24 }
  0x24   : > { %166 = sbr.rel (!%p3051_p5) target bundleno = 52 (0x34), region = 28  ;;  %s168_s25 = sand.u32 (%p3051_p5), 1, %s2967_s21  }
  0x25   : > { %s2633_s26 = sshll.u32 (%p3051_p5), %s2971_s22, 5  ;;  %s2638_s6 = smul.u32 (%p3051_p5), 96, %s168_s25 }
  0x26   : > { %s173_s9 = scalar_lea.vmem (%p3051_p5), %s4828_s1, %s2633_s26 }
  0x27   : > { %v224_v0 = vld [vmem:[%s173_s9] sm:$0xff] (%p3051_p5)  ;;  %v226_v1 = vld [vmem:[%s173_s9 + $0x8] sm:$0xff] (%p3051_p5)  ;;  %v228_v2 = vld [vmem:[%s173_s9 + $0x10] sm:$0xff] (%p3051_p5)  ;;  %s170_s10 = scalar_lea.vmem (%p3051_p5), [#allocation4], %s2638_s6 }
  0x28   : > { %225 = vst [vmem:[%s170_s10] sm:$0xff] (%p3051_p5), %v224_v0  ;;  %v230_v3 = vld [vmem:[%s173_s9 + $0x18] sm:$0xff] (%p3051_p5)  ;;  %v232_v4 = vld [vmem:[%s173_s9 + $0x40] sm:$0xff] (%p3051_p5)  ;;  %v234_v5 = vld [vmem:[%s173_s9 + $0x48] sm:$0xff] (%p3051_p5) }
  0x29   : > { %227 = vst [vmem:[%s170_s10 + $0x8] sm:$0xff] %v226_v1  ;;  %v236_v6 = vld [vmem:[%s173_s9 + $0x50] sm:$0xff]  ;;  %v238_v7 = vld [vmem:[%s173_s9 + $0x58] sm:$0xff]  ;;  %v240_v8 = vld [vmem:[%s173_s9 + $0x80] sm:$0xff] }
  0x2a   : > { %229 = vst [vmem:[%s170_s10 + $0x10] sm:$0xff] %v228_v2  ;;  %v242_v9 = vld [vmem:[%s173_s9 + $0x88] sm:$0xff]  ;;  %v244_v10 = vld [vmem:[%s173_s9 + $0x90] sm:$0xff]  ;;  %v246_v11 = vld [vmem:[%s173_s9 + $0x98] sm:$0xff] }
  0x2b   : > { %231 = vst [vmem:[%s170_s10 + $0x18] sm:$0xff] %v230_v3 }
  0x2c   : > { %233 = vst [vmem:[%s170_s10 + $0x20] sm:$0xff] %v232_v4 }
  0x2d   : > { %235 = vst [vmem:[%s170_s10 + $0x28] sm:$0xff] %v234_v5 }
  0x2e   : > { %237 = vst [vmem:[%s170_s10 + $0x30] sm:$0xff] %v236_v6 }
  0x2f   : > { %239 = vst [vmem:[%s170_s10 + $0x38] sm:$0xff] %v238_v7 }
  0x30   : > { %241 = vst [vmem:[%s170_s10 + $0x40] sm:$0xff] %v240_v8 }
  0x31   : > { %243 = vst [vmem:[%s170_s10 + $0x48] sm:$0xff] %v242_v9 }
  0x32   : > { %245 = vst [vmem:[%s170_s10 + $0x50] sm:$0xff] %v244_v10 }
  0x33   : > { %247 = vst [vmem:[%s170_s10 + $0x58] sm:$0xff] %v246_v11 }
  0x34 PF: > { %256 = sbr.rel (%p3066_p12) target bundleno = 1260 (0x4ec), region = 66 }
  0x39   : > { %s3093_s28 = sand.u32 1, %s2963_s20  }
  0x3a   : > { %s2639_s11 = smul.u32 96, %s3093_s28 }
  0x3c   : > { %s3096_s12 = scalar_lea.vmem [#allocation4], %s2639_s11 }
  0x3d   : > { %2946 = dma.done.wait (%p2661_p11), [#allocation6], 8704  }
  0x3e   : > { %2948 = vsyncadd (%p2661_p11), [#allocation6], 4294958592 }
  0x3f   : > { %2950 = dma.done.wait (%p2661_p11), [#allocation9], 6272  }
  0x40   : > { %2952 = vsyncadd (%p2661_p11), [#allocation9], 4294961024  ;;  %vm317_vm0 = vcmask 64512   ;;  %v315_v12 = vld [vmem:[#allocation5] sm:$0xff]  ;;  %v295_v13 = vld [vmem:[%s3096_s12 + $0x8] sm:$0xff]  ;;  %s3234_s5 = sld [smem:[#allocation3]] }
  0x41   : > { %v296_v14 = vld [vmem:[%s3096_s12 + $0x10] sm:$0xff]  ;;  %2635 = vmatpush.msra.mxu1 %v315_v12  ;;  %2636 = vmatpush.msra.mxu2 %v315_v12  ;;  %v297_v15 = vld [vmem:[%s3096_s12 + $0x18] sm:$0xff]  ;;  %v316_v16 = vld [vmem:[#allocation5 + $0x8] sm:$0xff]  ;;  %s3252_s13 = sld [smem:[#allocation3 + $0x3]]  ;;  %vm1206_vm10 = vcmask 7168  }
  0x42   : > { %2588 = vmatmul.msk.f32.vlgmr.msra.gmra.mxu1 %vm317_vm0, %v295_v13  ;;  %2589 = vmatmul.msk.f32.vlgmr.msra.gmra.mxu2 %vm317_vm0, %v296_v14  ;;  %v294_v17 = vld [vmem:[%s3096_s12] sm:$0xff]  ;;  %v2580_v20 = vld [vmem:[%s3096_s12 + $0x28] sm:$0xff]  ;;  %v2581_v22 = vld [vmem:[%s3096_s12 + $0x30] sm:$0xff]  ;;  %s3256_s14 = sld [smem:[#allocation3 + $0x1]] }
  0x43   : > { %415 = vmatpush.msrb.mxu2 %v315_v12  ;;  %2637 = vmatpush.msra.mxu3 %v315_v12  ;;  %v2579_v18 = vld [vmem:[%s3096_s12 + $0x20] sm:$0xff]  ;;  %v2584_v21 = vld [vmem:[%s3096_s12 + $0x48] sm:$0xff]  ;;  %v2585_v23 = vld [vmem:[%s3096_s12 + $0x50] sm:$0xff]  ;;  %s3264_s15 = sld [smem:[#allocation3 + $0x4]] }
  0x44   : > { %2590 = vmatmul.msk.f32.vlgmr.msra.gmra.mxu3 %vm317_vm0, %v297_v15  ;;  %345 = vmatpush.msra.mxu0 %v315_v12  ;;  %v2583_v19 = vld [vmem:[%s3096_s12 + $0x40] sm:$0xff]  ;;  %v2582_v24 = vld [vmem:[%s3096_s12 + $0x38] sm:$0xff]  ;;  %v3138_v27 = vld [vmem:[#allocation5 + $0x108] sm:$0xff]  ;;  %s3268_s16 = sld [smem:[#allocation3 + $0x2]] }
  0x45   : > { %374 = vmatpush.msrb.mxu1 %v316_v16  ;;  %2587 = vmatmul.msk.f32.vlgmr.msra.gmra.mxu0 %vm317_vm0, %v294_v17  ;;  %v2586_v25 = vld [vmem:[%s3096_s12 + $0x58] sm:$0xff]  ;;  %v3136_v26 = vld [vmem:[#allocation5 + $0x100] sm:$0xff]  ;;  %v3142_v28 = vld [vmem:[#allocation5 + $0xf0] sm:$0xff]  ;;  %s2615_s17 = sld [smem:[#allocation3 + $0x5]] }
  0x46   : > { %485 = vmatpush.msrb.mxu0 %v315_v12  ;;  %444 = vmatpush.msrb.mxu3 %v316_v16  ;;  %v3144_v29 = vld [vmem:[#allocation5 + $0xf8] sm:$0xff]  ;;  %v3150_v30 = vld [vmem:[#allocation5 + $0xe0] sm:$0xff]  ;;  %v3152_v31 = vld [vmem:[#allocation5 + $0xe8] sm:$0xff]  ;;  %p529_p2 = scmp.ne.s32.totalorder %s3234_s5, 0  ;;  %s3340_s8 = sld [smem:[#allocation3 + $0x7]] }
  0x47   : > { %514 = vmatpush.msra.mxu1 %v316_v16  ;;  %701 = vmatpush.msra.mxu2 %v3136_v26  ;;  %v3166_v32 = vld [vmem:[#allocation5 + $0xd0] sm:$0xff]  ;;  %v3168_v33 = vld [vmem:[#allocation5 + $0xd8] sm:$0xff]  ;;  %v3172_v34 = vld [vmem:[#allocation5 + $0xc0] sm:$0xff]  ;;  %p564_p7 = scmp.ne.s32.totalorder %s3252_s13, 0  ;;  %s3368_s9 = sld [smem:[#allocation3 + $0x6]] }
  0x48   : > { %730 = vmatpush.msra.mxu3 %v3138_v27  ;;  %759 = vmatpush.msra.mxu0 %v3136_v26  ;;  %v3174_v35 = vld [vmem:[#allocation5 + $0xc8] sm:$0xff]  ;;  %v3178_v36 = vld [vmem:[#allocation5 + $0xb0] sm:$0xff]  ;;  %v3180_v37 = vld [vmem:[#allocation5 + $0xb8] sm:$0xff]  ;;  %s3283_s18 = scalar_select %p529_p2, 1, 0 }
  0x49   : > { %702 = vmatpush.msra.mxu2 %v3142_v28  ;;  %v3190_v38 = vld [vmem:[#allocation5 + $0xa0] sm:$0xff]  ;;  %v3192_v39 = vld [vmem:[#allocation5 + $0xa8] sm:$0xff]  ;;  %v3198_v40 = vld [vmem:[#allocation5 + $0x90] sm:$0xff]  ;;  %p538_p3 = scmp.ne.s32.totalorder %s3256_s14, 0  ;;  %p573_p4 = scmp.ne.s32.totalorder %s3264_s15, 0 }
  0x4a   : > { %2591 = vmatmul.msk.f32.vlgmr.msrb.gmra.mxu1 %vm317_vm0, %v294_v17  ;;  %2595 = vmatmul.msk.f32.vlgmr.msrb.gmra.mxu2 %vm317_vm0, %v2579_v18  ;;  %v3200_v41 = vld [vmem:[#allocation5 + $0x98] sm:$0xff]  ;;  %v3202_v42 = vld [vmem:[#allocation5 + $0x80] sm:$0xff]  ;;  %v3206_v43 = vld [vmem:[#allocation5 + $0x88] sm:$0xff]  ;;  %p551_p5 = scmp.ne.s32.totalorder %s3268_s16, 0  ;;  %v531_v3 = vstv %s3283_s18  ;;  %s3374_s10 = sld [smem:[#allocation3 + $0x8]] }
  0x4b   : > { %788 = vmatpush.msrb.mxu1 %v3138_v27  ;;  %731 = vmatpush.msra.mxu3 %v3144_v29  ;;  %v3210_v44 = vld [vmem:[#allocation5 + $0x70] sm:$0xff]  ;;  %v3212_v45 = vld [vmem:[#allocation5 + $0x78] sm:$0xff]  ;;  %v3222_v46 = vld [vmem:[#allocation5 + $0x60] sm:$0xff]  ;;  %p586_p8 = scmp.ne.s32.totalorder %s2615_s17, 0  ;;  %vm3332_vm5 = vcmp.eq.s32.totalorder %v531_v3, 1  ;;  %s2619_s13 = sld [smem:[#allocation3 + $0x9]] }
  0x4c   : > { %2599 = vmatmul.msk.f32.vlgmr.msrb.gmra.mxu3 %vm317_vm0, %v2579_v18  ;;  %760 = vmatpush.msra.mxu0 %v3142_v28  ;;  %v3224_v47 = vld [vmem:[#allocation5 + $0x68] sm:$0xff]  ;;  %v3230_v48 = vld [vmem:[#allocation5 + $0x50] sm:$0xff]  ;;  %v3232_v49 = vld [vmem:[#allocation5 + $0x58] sm:$0xff]  ;;  %s539_s23 = scalar_select %p538_p3, 1, 0 }
  0x4d   : > { %2603 = vmatmul.msk.f32.vlgmr.msrb.gmra.mxu0 %vm317_vm0, %v2583_v19  ;;  %789 = vmatpush.msrb.mxu1 %v3144_v29  ;;  %v3240_v50 = vld [vmem:[#allocation5 + $0x40] sm:$0xff]  ;;  %v3242_v51 = vld [vmem:[#allocation5 + $0x48] sm:$0xff]  ;;  %v3248_v52 = vld [vmem:[#allocation5 + $0x30] sm:$0xff]  ;;  %s574_s25 = scalar_select %p573_p4, 1, 0 }
  0x4e   : > { %703 = vmatpush.msra.mxu2 %v3150_v30  ;;  %732 = vmatpush.msra.mxu3 %v3152_v31  ;;  %v3250_v53 = vld [vmem:[#allocation5 + $0x38] sm:$0xff]  ;;  %v3260_v54 = vld [vmem:[#allocation5 + $0x20] sm:$0xff]  ;;  %v3262_v55 = vld [vmem:[#allocation5 + $0x28] sm:$0xff]  ;;  %s552_s26 = scalar_select %p551_p5, 1, 0  ;;  %v540_v63 = vstv %s539_s23 }
  0x4f   : > { %761 = vmatpush.msra.mxu0 %v3150_v30  ;;  %790 = vmatpush.msrb.mxu1 %v3152_v31  ;;  %v3272_v56 = vld [vmem:[#allocation5 + $0x10] sm:$0xff]  ;;  %v3274_v57 = vld [vmem:[#allocation5 + $0x18] sm:$0xff]  ;;  %s587_s6 = scalar_select %p586_p8, 1, 0  ;;  %v575_v0 = vstv %s574_s25  ;;  %vm3316_vm1 = vcmp.eq.s32.totalorder %v540_v63, 1 }
  0x50   : > { %704 = vmatpush.msra.mxu2 %v3166_v32  ;;  %733 = vmatpush.msra.mxu3 %v3168_v33  ;;  %s565_s7 = scalar_select %p564_p7, 1, 0  ;;  %v553_v1 = vstv %s552_s26  ;;  %vm3320_vm2 = vcmp.eq.s32.totalorder %v575_v0, 1 }
  0x51   : > { %762 = vmatpush.msra.mxu0 %v3166_v32  ;;  %791 = vmatpush.msrb.mxu1 %v3168_v33  ;;  %v588_v2 = vstv %s587_s6  ;;  %vm3324_vm3 = vcmp.eq.s32.totalorder %v553_v1, 1  ;;  %p608_p9 = scmp.ne.s32.totalorder %s3340_s8, 0  ;;  %p599_p11 = scmp.ne.s32.totalorder %s3368_s9, 0 }
  0x52   : > { %2592 = vmatmul.msk.f32.gmra.mxu1 %vm317_vm0, %v295_v13  ;;  %2596 = vmatmul.msk.f32.gmra.mxu2 %vm317_vm0, %v2580_v20  ;;  %v566_v4 = vstv %s565_s7  ;;  %vm3328_vm4 = vcmp.eq.s32.totalorder %v588_v2, 1  ;;  %p621_p12 = scmp.ne.s32.totalorder %s3374_s10, 0  ;;  %s2620_s14 = sld [smem:[#allocation3 + $0xa]] }
  0x53   : > { %705 = vmatpush.msra.mxu2 %v3172_v34  ;;  %734 = vmatpush.msra.mxu3 %v3174_v35  ;;  %vm3336_vm6 = vcmp.eq.s32.totalorder %v566_v4, 1  ;;  %s3407_s11 = scalar_select %p608_p9, 1, 0 }
  0x54   : > { %2600 = vmatmul.msk.f32.gmra.mxu3 %vm317_vm0, %v2580_v20  ;;  %763 = vmatpush.msra.mxu0 %v3172_v34  ;;  %s600_s12 = scalar_select %p599_p11, 1, 0 }
  0x55   : > { %2604 = vmatmul.msk.f32.gmra.mxu0 %vm317_vm0, %v2584_v21  ;;  %792 = vmatpush.msrb.mxu1 %v3174_v35  ;;  %s622_s5 = scalar_select %p621_p12, 1, 0 }
  0x56   : > { %706 = vmatpush.msra.mxu2 %v3178_v36  ;;  %735 = vmatpush.msra.mxu3 %v3180_v37  ;;  %s2622_s15 = sld [smem:[#allocation3 + $0xc]]  ;;  %p1373_p13 = scmp.ne.s32.totalorder %s2619_s13, 0 }
  0x57   : > { %764 = vmatpush.msra.mxu0 %v3178_v36  ;;  %793 = vmatpush.msrb.mxu1 %v3180_v37  ;;  %s2623_s16 = sld [smem:[#allocation3 + $0xd]] }
  0x58   : > { %707 = vmatpush.msra.mxu2 %v3190_v38  ;;  %736 = vmatpush.msra.mxu3 %v3192_v39  ;;  %p1398_p0 = scmp.ne.s32.totalorder %s2620_s14, 0  ;;  %s4075_s26 = sld [smem:[#allocation3 + $0xb]] }
  0x59   : > { %765 = vmatpush.msra.mxu0 %v3190_v38  ;;  %794 = vmatpush.msrb.mxu1 %v3192_v39  ;;  %s1374_s17 = scalar_select %p1373_p13, 1, 0 }
  0x5a   : > { %2593 = vmatmul.msk.f32.gmra.mxu1 %vm317_vm0, %v296_v14  ;;  %2597 = vmatmul.msk.f32.gmra.mxu2 %vm317_vm0, %v2581_v22  ;;  %s1399_s18 = scalar_select %p1398_p0, 1, 0 }
  0x5b   : > { %708 = vmatpush.msra.mxu2 %v3198_v40  ;;  %737 = vmatpush.msra.mxu3 %v3200_v41  ;;  %s2624_s6 = sld [smem:[#allocation3 + $0xe]]  ;;  %s2578_s14 = sshll.u32 %s3093_s28, 5 }
  0x5c   : > { %2601 = vmatmul.msk.f32.gmra.mxu3 %vm317_vm0, %v2581_v22  ;;  %766 = vmatpush.msra.mxu0 %v3198_v40  ;;  %p1692_p2 = scmp.ne.s32.totalorder %s2622_s15, 0  ;;  %s4098_s7 = sld [smem:[#allocation3 + $0xf]] }
  0x5d   : > { %2605 = vmatmul.msk.f32.gmra.mxu0 %vm317_vm0, %v2585_v23  ;;  %795 = vmatpush.msrb.mxu1 %v3200_v41  ;;  %p1717_p3 = scmp.ne.s32.totalorder %s2623_s16, 0  ;;  %s4110_s8 = sld [smem:[#allocation3 + $0x10]] }
  0x5e   : > { %709 = vmatpush.msra.mxu2 %v3202_v42  ;;  %738 = vmatpush.msra.mxu3 %v3206_v43  ;;  %s1693_s23 = scalar_select %p1692_p2, 1, 0 }
  0x5f   : > { %767 = vmatpush.msra.mxu0 %v3202_v42  ;;  %796 = vmatpush.msrb.mxu1 %v3206_v43  ;;  %s1718_s25 = scalar_select %p1717_p3, 1, 0 }
  0x60   : > { %710 = vmatpush.msra.mxu2 %v3210_v44  ;;  %739 = vmatpush.msra.mxu3 %v3212_v45  ;;  %p1423_p4 = scmp.ne.s32.totalorder %s4075_s26, 0  ;;  %s4117_s10 = sld [smem:[#allocation3 + $0x11]] }
  0x61   : > { %768 = vmatpush.msra.mxu0 %v3210_v44  ;;  %797 = vmatpush.msrb.mxu1 %v3212_v45  ;;  %p1742_p5 = scmp.ne.s32.totalorder %s2624_s6, 0  ;;  %s4773_s15 = scalar_lea.vmem [#allocation10], %s2578_s14 }
  0x62   : > { %2594 = vmatmul.msk.f32.gmra.mxu1 %vm317_vm0, %v297_v15  ;;  %2598 = vmatmul.msk.f32.gmra.mxu2 %vm317_vm0, %v2582_v24  ;;  %s1424_s9 = scalar_select %p1423_p4, 1, 0 }
  0x63   : > { %711 = vmatpush.msra.mxu2 %v3222_v46  ;;  %740 = vmatpush.msra.mxu3 %v3224_v47  ;;  %p2011_p7 = scmp.ne.s32.totalorder %s4098_s7, 0  ;;  %p2036_p8 = scmp.ne.s32.totalorder %s4110_s8, 0 }
  0x64   : > { %2602 = vmatmul.msk.f32.gmra.mxu3 %vm317_vm0, %v2582_v24  ;;  %769 = vmatpush.msra.mxu0 %v3222_v46  ;;  %s2634_s16 = sshll.u32 %s3033_s0, 5  ;;  %s2463_s6 = scalar_lea.sflag [#allocation7], %s3093_s28 }
  0x65   : > { %2606 = vmatmul.msk.f32.gmra.mxu0 %vm317_vm0, %v2586_v25  ;;  %798 = vmatpush.msrb.mxu1 %v3224_v47 }
  0x66   : > { %712 = vmatpush.msra.mxu2 %v3230_v48  ;;  %741 = vmatpush.msra.mxu3 %v3232_v49  ;;  %p2061_p9 = scmp.ne.s32.totalorder %s4117_s10, 0  ;;  %s2919_s10 = scalar_lea.hbm %s4831_s4, 64 }
  0x67   : > { %770 = vmatpush.msra.mxu0 %v3230_v48  ;;  %799 = vmatpush.msrb.mxu1 %v3232_v49 }
  0x68   : > { %713 = vmatpush.msra.mxu2 %v3240_v50  ;;  %742 = vmatpush.msra.mxu3 %v3242_v51  ;;  %s2062_s13 = scalar_select %p2061_p9, 1, 0 }
  0x69   : > { %771 = vmatpush.msra.mxu0 %v3240_v50  ;;  %800 = vmatpush.msrb.mxu1 %v3242_v51 }
  0x6a   : > { %2607 = vmatmul.msk.f32.vlgmr.msra.gmra.mxu1 %vm317_vm0, %v2583_v19  ;;  %714 = vmatpush.msra.mxu2 %v3248_v52 }
  0x6b   : > { %743 = vmatpush.msra.mxu3 %v3250_v53  ;;  %772 = vmatpush.msra.mxu0 %v3248_v52 }
  0x6c   : > { %801 = vmatpush.msrb.mxu1 %v3250_v53  ;;  %715 = vmatpush.msra.mxu2 %v3260_v54 }
  0x6d   : > { %744 = vmatpush.msra.mxu3 %v3262_v55  ;;  %773 = vmatpush.msra.mxu0 %v3260_v54 }
  0x6e   : > { %802 = vmatpush.msrb.mxu1 %v3262_v55  ;;  %716 = vmatpush.msra.mxu2 %v3272_v56 }
  0x6f   : > { %745 = vmatpush.msra.mxu3 %v3274_v57  ;;  %774 = vmatpush.msra.mxu0 %v3272_v56 }
  0x70   : > { %803 = vmatpush.msrb.mxu1 %v3274_v57  ;;  %817 = vmatpush.msrb.mxu2 %v3136_v26 }
  0x71   : > { %846 = vmatpush.msrb.mxu3 %v3138_v27 }
  0x72   : > { %2608 = vmatmul.msk.f32.gmra.mxu1 %vm317_vm0, %v2584_v21  ;;  %818 = vmatpush.msrb.mxu2 %v3142_v28 }
  0x73   : > { %847 = vmatpush.msrb.mxu3 %v3144_v29 }
  0x74   : > { %819 = vmatpush.msrb.mxu2 %v3150_v30 }
  0x75   : > { %848 = vmatpush.msrb.mxu3 %v3152_v31 }
  0x76   : > { %820 = vmatpush.msrb.mxu2 %v3166_v32 }
  0x77   : > { %849 = vmatpush.msrb.mxu3 %v3168_v33 }
  0x78   : > { %821 = vmatpush.msrb.mxu2 %v3172_v34 }
  0x79   : > { %850 = vmatpush.msrb.mxu3 %v3174_v35 }
  0x7a   : > { %2609 = vmatmul.msk.f32.gmra.mxu1 %vm317_vm0, %v2585_v23  ;;  %822 = vmatpush.msrb.mxu2 %v3178_v36 }
  0x7b   : > { %851 = vmatpush.msrb.mxu3 %v3180_v37 }
  0x7c   : > { %823 = vmatpush.msrb.mxu2 %v3190_v38 }
  0x7d   : > { %852 = vmatpush.msrb.mxu3 %v3192_v39 }
  0x7e   : > { %824 = vmatpush.msrb.mxu2 %v3198_v40 }
  0x7f   : > { %853 = vmatpush.msrb.mxu3 %v3200_v41 }
  0x80   : > { %825 = vmatpush.msrb.mxu2 %v3202_v42 }
  0x81   : > { %854 = vmatpush.msrb.mxu3 %v3206_v43 }
  0x82   : > { %2610 = vmatmul.msk.f32.gmra.mxu1 %vm317_vm0, %v2586_v25  ;;  %826 = vmatpush.msrb.mxu2 %v3210_v44  ;;  %v3370_v25 = vld [vmem:[#allocation5 + $0x212] ss:$0 sm:$0xff] }
  0x83   : > { %855 = vmatpush.msrb.mxu3 %v3212_v45 }
  0x84   : > { %827 = vmatpush.msrb.mxu2 %v3222_v46 }
  0x85   : > { %856 = vmatpush.msrb.mxu3 %v3224_v47 }
  0x86   : > { %828 = vmatpush.msrb.mxu2 %v3230_v48 }
  0x87   : > { %857 = vmatpush.msrb.mxu3 %v3232_v49  ;;  %v610_v49 = vstv %s3407_s11  ;;  %s1743_s11 = scalar_select %p1742_p5, 1, 0 }
  0x88   : > { %829 = vmatpush.msrb.mxu2 %v3240_v50  ;;  %vm3440_vm7 = vcmp.eq.s32.totalorder %v610_v49, 1 }
  0x89   : > { %858 = vmatpush.msrb.mxu3 %v3242_v51 }
  0x8a   : > { %830 = vmatpush.msrb.mxu2 %v3248_v52 }
  0x8b   : > { %859 = vmatpush.msrb.mxu3 %v3250_v53 }
  0x8c   : > { %831 = vmatpush.msrb.mxu2 %v3260_v54 }
  0x8d   : > { %860 = vmatpush.msrb.mxu3 %v3262_v55 }
  0x8e   : > { %832 = vmatpush.msrb.mxu2 %v3272_v56 }
  0x8f   : > { %861 = vmatpush.msrb.mxu3 %v3274_v57 }
  0xbf   : > { %v3291_v58 = vpop.f32.mrf.mxu1 }
  0xc0   : > { %v534_v29 = vsel %vm3332_vm5, %v3291_v58, 0.0  ;;  %v569_v30 = vsel %vm3336_vm6, %v3291_v58, 0.0 }
  0xc2   : > { %v3297_v59 = vpop.f32.mrf.mxu0 }
  0xc3   : > { %v533_v12 = vsel %vm3332_vm5, %v3297_v59, 0.0  ;;  %v568_v13 = vsel %vm3336_vm6, %v3297_v59, 0.0 }
  0xc5   : > { %v3303_v60 = vpop.f32.mrf.mxu2 }
  0xc6   : > { %v535_v50 = vsel %vm3332_vm5, %v3303_v60, 0.0  ;;  %v570_v51 = vsel %vm3336_vm6, %v3303_v60, 0.0 }
  0xc7   : > { %v376_v61 = vpop.f32.mrf.mxu1  ;;  %v3307_v62 = vpop.f32.mrf.mxu3 }
  0xca   : > { %v3312_v5 = vpop.f32.mrf.mxu0 }
  0xcb   : > { %v555_v17 = vsel %vm3324_vm3, %v3312_v5, 0.0  ;;  %v590_v18 = vsel %vm3328_vm4, %v3312_v5, 0.0 }
  0xcd   : > { %v3350_v14 = vpop.f32.mrf.mxu2 }
  0xce   : > { %v542_v15 = vsel %vm3316_vm1, %v3350_v14, 0.0  ;;  %v577_v16 = vsel %vm3320_vm2, %v3350_v14, 0.0 }
  0xcf   : > { %v546_v19 = vadd.f32 %v542_v15, %v533_v12  ;;  %v379_v20 = vpop.f32.mrf.mxu1  ;;  %v446_v21 = vpop.f32.mrf.mxu3  ;;  %v581_v22 = vadd.f32 %v577_v16, %v568_v13  ;;  %v601_v12 = vstv %s600_s12  ;;  %v314_v16 = vld [vmem:[#allocation5 + $0x211] ss:$8 sm:$0x3]  ;;  %s4131_s12 = scalar_select %p2011_p7, 1, 0 }
  0xd0   : > { %vm3446_vm8 = vcmp.eq.s32.totalorder %v601_v12, 1 }
  0xd1   : > { %v559_v23 = vadd.f32 %v555_v17, %v546_v19  ;;  %v594_v24 = vadd.f32 %v590_v18, %v581_v22  ;;  %v623_v17 = vstv %s622_s5  ;;  %v536_v22 = vsel %vm3332_vm5, %v3307_v62, 0.0  ;;  %s2037_s5 = scalar_select %p2036_p8, 1, 0 }
  0xd2   : > { %v3372_v26 = vpop.f32.mrf.mxu0  ;;  %vm3459_vm9 = vcmp.eq.s32.totalorder %v623_v17, 1 }
  0xd3   : > { %v633_v27 = vadd.f32 %v559_v23, %v376_v61  ;;  %v645_v28 = vadd.f32 %v594_v24, %v446_v21  ;;  %v556_v36 = vsel %vm3324_vm3, %v3372_v26, 0.0  ;;  %v591_v37 = vsel %vm3328_vm4, %v3372_v26, 0.0 }
  0xd4   : > { %v571_v23 = vsel %vm3336_vm6, %v3307_v62, 0.0  ;;  %v612_v24 = vsel %vm3440_vm7, %v3350_v14, 0.0 }
  0xd5   : > { %v649_v31 = vadd.f32 %v645_v28, %v3370_v25  ;;  %v3388_v32 = vpop.f32.mrf.mxu2  ;;  %v637_v33 = vadd.f32 %v633_v27, %v3370_v25  ;;  %v3814_v28 = vperm.slane %v314_v16, 1 }
  0xd6   : > { %v543_v34 = vsel %vm3316_vm1, %v3388_v32, 0.0  ;;  %v578_v35 = vsel %vm3320_vm2, %v3388_v32, 0.0 }
  0xd7   : > { %v653_v38 = vmax.f32 %v649_v31, 0.0  ;;  %v547_v39 = vadd.f32 %v543_v34, %v534_v29  ;;  %v382_v40 = vpop.f32.mrf.mxu1  ;;  %v641_v41 = vmax.f32 %v637_v33, 0.0  ;;  %v449_v42 = vpop.f32.mrf.mxu3  ;;  %v582_v43 = vadd.f32 %v578_v35, %v569_v30 }
  0xd9   : > { %v560_v44 = vadd.f32 %v556_v36, %v547_v39  ;;  %717 = vmatmul.f32.vlgmr.msra.gmra.mxu2 %v641_v41  ;;  %746 = vmatmul.f32.vlgmr.msra.gmra.mxu3 %v641_v41  ;;  %v595_v45 = vadd.f32 %v591_v37, %v582_v43 }
  0xda   : > { %775 = vmatmul.f32.vlgmr.msra.gmra.mxu0 %v653_v38  ;;  %804 = vmatmul.f32.vlgmr.msrb.gmra.mxu1 %v653_v38  ;;  %v3412_v46 = vpop.f32.mrf.mxu0 }
  0xdb   : > { %v646_v47 = vadd.f32 %v595_v45, %v449_v42  ;;  %v634_v48 = vadd.f32 %v560_v44, %v379_v20  ;;  %v557_v57 = vsel %vm3324_vm3, %v3412_v46, 0.0  ;;  %v592_v61 = vsel %vm3328_vm4, %v3412_v46, 0.0 }
  0xdc   : > { %v625_v45 = vsel %vm3459_vm9, %v3312_v5, 0.0  ;;  %v604_v5 = vsel %vm3446_vm8, %v3291_v58, 0.0  ;;  %v605_v58 = vsel %vm3446_vm8, %v3303_v60, 0.0 }
  0xdd   : > { %v3422_v52 = vpop.f32.mrf.mxu2  ;;  %v638_v53 = vadd.f32 %v634_v48, %v3370_v25  ;;  %v650_v54 = vadd.f32 %v646_v47, %v3370_v25 }
  0xde   : > { %v544_v55 = vsel %vm3316_vm1, %v3422_v52, 0.0  ;;  %v579_v56 = vsel %vm3320_vm2, %v3422_v52, 0.0 }
  0xdf   : > { %v548_v63 = vadd.f32 %v544_v55, %v535_v50  ;;  %v385_v0 = vpop.f32.mrf.mxu1  ;;  %v642_v1 = vmax.f32 %v638_v53, 0.0  ;;  %v654_v2 = vmax.f32 %v650_v54, 0.0  ;;  %v452_v3 = vpop.f32.mrf.mxu3  ;;  %v583_v4 = vadd.f32 %v579_v56, %v570_v51 }
  0xe1   : > { %v561_v13 = vadd.f32 %v557_v57, %v548_v63  ;;  %720 = vmatmul.f32.gmra.mxu2 %v642_v1  ;;  %749 = vmatmul.f32.gmra.mxu3 %v642_v1  ;;  %v596_v15 = vadd.f32 %v592_v61, %v583_v4  ;;  %v626_v61 = vsel %vm3459_vm9, %v3372_v26, 0.0  ;;  %v627_v26 = vsel %vm3459_vm9, %v3412_v46, 0.0 }
  0xe2   : > { %778 = vmatmul.f32.gmra.mxu0 %v654_v2  ;;  %807 = vmatmul.f32.gmra.mxu1 %v654_v2  ;;  %v3444_v19 = vpop.f32.mrf.mxu0 }
  0xe3   : > { %v647_v18 = vadd.f32 %v596_v15, %v452_v3  ;;  %v635_v20 = vadd.f32 %v561_v13, %v382_v40  ;;  %v558_v34 = vsel %vm3324_vm3, %v3444_v19, 0.0  ;;  %v593_v14 = vsel %vm3328_vm4, %v3444_v19, 0.0 }
  0xe4   : > { %v603_v40 = vsel %vm3446_vm8, %v3297_v59, 0.0  ;;  %v613_v59 = vsel %vm3440_vm7, %v3388_v32, 0.0 }
  0xe5   : > { %v426_v27 = vpop.f32.mrf.mxu2  ;;  %v639_v29 = vadd.f32 %v635_v20, %v3370_v25  ;;  %v651_v30 = vadd.f32 %v647_v18, %v3370_v25  ;;  %v616_v43 = vadd.f32 %v612_v24, %v603_v40  ;;  %v617_v57 = vadd.f32 %v613_v59, %v604_v5  ;;  %v3557_v40 = vld [vmem:[#allocation5 + $0x1a0] sm:$0xff]  ;;  %v3603_v59 = vld [vmem:[#allocation5 + $0x150] sm:$0xff] }
  0xe6   : > { %v545_v31 = vsel %vm3316_vm1, %v426_v27, 0.0  ;;  %v580_v33 = vsel %vm3320_vm2, %v426_v27, 0.0  ;;  %v615_v15 = vsel %vm3440_vm7, %v426_v27, 0.0  ;;  %v628_v20 = vsel %vm3459_vm9, %v3444_v19, 0.0  ;;  %v3519_v19 = vld [vmem:[#allocation5 + $0x1f0] sm:$0xff] }
  0xe7   : > { %v549_v35 = vadd.f32 %v545_v31, %v536_v22  ;;  %v516_v36 = vpop.f32.mrf.mxu1  ;;  %v643_v37 = vmax.f32 %v639_v29, 0.0  ;;  %v655_v38 = vmax.f32 %v651_v30, 0.0  ;;  %v584_v39 = vadd.f32 %v580_v33, %v571_v23  ;;  %v455_v41 = vpop.f32.mrf.mxu3  ;;  %v3513_v30 = vld [vmem:[#allocation5 + $0x200] sm:$0xff]  ;;  %v3515_v31 = vld [vmem:[#allocation5 + $0x208] sm:$0xff]  ;;  %v3521_v33 = vld [vmem:[#allocation5 + $0x1f8] sm:$0xff] }
  0xe8   : > { %v629_v49 = vadd.f32 %v625_v45, %v616_v43  ;;  %v630_v32 = vadd.f32 %v626_v61, %v617_v57  ;;  %1003 = vmatpush.msrb.mxu0 %v3513_v30  ;;  %1032 = vmatpush.msra.mxu1 %v3515_v31  ;;  %v3571_v43 = vld [vmem:[#allocation5 + $0x198] sm:$0xff]  ;;  %v3577_v45 = vld [vmem:[#allocation5 + $0x188] sm:$0xff]  ;;  %v3619_v5 = vld [vmem:[#allocation5 + $0x130] sm:$0xff] }
  0xe9   : > { %v562_v42 = vadd.f32 %v558_v34, %v549_v35  ;;  %723 = vmatmul.f32.gmra.mxu2 %v643_v37  ;;  %752 = vmatmul.f32.gmra.mxu3 %v643_v37  ;;  %v597_v44 = vadd.f32 %v593_v14, %v584_v39  ;;  %v3527_v34 = vld [vmem:[#allocation5 + $0x1e8] sm:$0xff]  ;;  %v3537_v14 = vld [vmem:[#allocation5 + $0x1d0] sm:$0xff]  ;;  %v3539_v35 = vld [vmem:[#allocation5 + $0x1d8] sm:$0xff] }
  0xea   : > { %781 = vmatmul.f32.gmra.mxu0 %v655_v38  ;;  %810 = vmatmul.f32.gmra.mxu1 %v655_v38  ;;  %v657_v53 = vadd.f32 %v629_v49, %v516_v36  ;;  %v3545_v36 = vld [vmem:[#allocation5 + $0x1c0] sm:$0xff]  ;;  %v3547_v37 = vld [vmem:[#allocation5 + $0x1c8] sm:$0xff]  ;;  %v3551_v38 = vld [vmem:[#allocation5 + $0x1b0] sm:$0xff] }
  0xeb   : > { %v648_v47 = vadd.f32 %v597_v44, %v455_v41  ;;  %v636_v48 = vadd.f32 %v562_v42, %v385_v0  ;;  %v614_v0 = vsel %vm3440_vm7, %v3422_v52, 0.0  ;;  %v606_v52 = vsel %vm3446_vm8, %v3307_v62, 0.0  ;;  %1061 = vmatpush.msra.mxu2 %v3513_v30  ;;  %1090 = vmatpush.msra.mxu3 %v3515_v31  ;;  %v3553_v39 = vld [vmem:[#allocation5 + $0x1b8] sm:$0xff]  ;;  %v3559_v41 = vld [vmem:[#allocation5 + $0x1a8] sm:$0xff]  ;;  %v3569_v42 = vld [vmem:[#allocation5 + $0x190] sm:$0xff] }
  0xec   : > { %v661_v63 = vadd.f32 %v657_v53, %v3370_v25  ;;  %v618_v3 = vadd.f32 %v614_v0, %v605_v58  ;;  %v619_v18 = vadd.f32 %v615_v15, %v606_v52  ;;  %1004 = vmatpush.msrb.mxu0 %v3519_v19  ;;  %1033 = vmatpush.msra.mxu1 %v3521_v33  ;;  %v3575_v44 = vld [vmem:[#allocation5 + $0x180] sm:$0xff]  ;;  %v3605_v53 = vld [vmem:[#allocation5 + $0x158] sm:$0xff]  ;;  %v3629_v61 = vld [vmem:[#allocation5 + $0x128] sm:$0xff] }
  0xed   : > { %v640_v50 = vadd.f32 %v636_v48, %v3370_v25  ;;  %v652_v51 = vadd.f32 %v648_v47, %v3370_v25  ;;  %1062 = vmatpush.msra.mxu2 %v3519_v19  ;;  %1091 = vmatpush.msra.mxu3 %v3521_v33  ;;  %v3581_v47 = vld [vmem:[#allocation5 + $0x170] sm:$0xff]  ;;  %v3583_v48 = vld [vmem:[#allocation5 + $0x178] sm:$0xff]  ;;  %v3589_v49 = vld [vmem:[#allocation5 + $0x160] sm:$0xff] }
  0xee   : > { %v665_v1 = vmax.f32 %v661_v63, 0.0  ;;  %v631_v13 = vadd.f32 %v627_v26, %v618_v3  ;;  %v632_v23 = vadd.f32 %v628_v20, %v619_v18  ;;  %1034 = vmatpush.msra.mxu1 %v3527_v34  ;;  %v3627_v57 = vld [vmem:[#allocation5 + $0x120] sm:$0xff]  ;;  %v3639_v0 = vld [vmem:[#allocation5 + $0x118] sm:$0xff] }
  0xef   : > { %v644_v54 = vmax.f32 %v640_v50, 0.0  ;;  %v656_v55 = vmax.f32 %v652_v51, 0.0  ;;  %v519_v56 = vpop.f32.mrf.mxu1  ;;  %1092 = vmatpush.msra.mxu3 %v3527_v34  ;;  %v3591_v50 = vld [vmem:[#allocation5 + $0x168] sm:$0xff] }
  0xf0   : > { %v658_v2 = vadd.f32 %v630_v32, %v519_v56  ;;  %1035 = vmatpush.msra.mxu1 %v3539_v35  ;;  %v3621_v56 = vld [vmem:[#allocation5 + $0x138] sm:$0xff]  ;;  %v3637_v32 = vld [vmem:[#allocation5 + $0x110] sm:$0xff] }
  0xf1   : > { %726 = vmatmul.f32.gmra.mxu2 %v644_v54  ;;  %755 = vmatmul.f32.gmra.mxu3 %v644_v54  ;;  %v3611_v54 = vld [vmem:[#allocation5 + $0x140] sm:$0xff] }
  0xf2   : > { %784 = vmatmul.f32.gmra.mxu0 %v656_v55  ;;  %813 = vmatmul.f32.gmra.mxu1 %v656_v55  ;;  %v662_v12 = vadd.f32 %v658_v2, %v3370_v25  ;;  %v3613_v55 = vld [vmem:[#allocation5 + $0x148] sm:$0xff] }
  0xf3   : > { %1093 = vmatpush.msra.mxu3 %v3539_v35  ;;  %1036 = vmatpush.msra.mxu1 %v3547_v37 }
  0xf4   : > { %v666_v60 = vmax.f32 %v662_v12, 0.0 }
  0xf5   : > { %1094 = vmatpush.msra.mxu3 %v3547_v37  ;;  %1037 = vmatpush.msra.mxu1 %v3553_v39 }
  0xf7   : > { %v522_v4 = vpop.f32.mrf.mxu1  ;;  %1095 = vmatpush.msra.mxu3 %v3553_v39  ;;  %1038 = vmatpush.msra.mxu1 %v3559_v41 }
  0xf8   : > { %v659_v17 = vadd.f32 %v631_v13, %v522_v4 }
  0xf9   : > { %833 = vmatmul.f32.vlgmr.msrb.gmra.mxu2 %v665_v1  ;;  %862 = vmatmul.f32.vlgmr.msrb.gmra.mxu3 %v665_v1 }
  0xfa   : > { %v663_v46 = vadd.f32 %v659_v17, %v3370_v25  ;;  %1096 = vmatpush.msra.mxu3 %v3559_v41  ;;  %1039 = vmatpush.msra.mxu1 %v3571_v43 }
  0xfc   : > { %v667_v29 = vmax.f32 %v663_v46, 0.0  ;;  %1097 = vmatpush.msra.mxu3 %v3571_v43  ;;  %1040 = vmatpush.msra.mxu1 %v3577_v45 }
  0xfe   : > { %1098 = vmatpush.msra.mxu3 %v3577_v45  ;;  %1041 = vmatpush.msra.mxu1 %v3583_v48 }
  0xff   : > { %v525_v22 = vpop.f32.mrf.mxu1 }
 0x100   : > { %v660_v24 = vadd.f32 %v632_v23, %v525_v22  ;;  %1099 = vmatpush.msra.mxu3 %v3583_v48  ;;  %1042 = vmatpush.msra.mxu1 %v3591_v50 }
 0x101   : > { %836 = vmatmul.f32.gmra.mxu2 %v666_v60  ;;  %865 = vmatmul.f32.gmra.mxu3 %v666_v60 }
 0x102   : > { %v664_v62 = vadd.f32 %v660_v24, %v3370_v25  ;;  %v3525_v25 = vld [vmem:[#allocation5 + $0x1e0] sm:$0xff]  ;;  %1100 = vmatpush.msra.mxu3 %v3591_v50  ;;  %1043 = vmatpush.msra.mxu1 %v3605_v53 }
 0x103   : > { %1005 = vmatpush.msrb.mxu0 %v3525_v25  ;;  %1063 = vmatpush.msra.mxu2 %v3525_v25 }
 0x104   : > { %v668_v27 = vmax.f32 %v664_v62, 0.0  ;;  %1101 = vmatpush.msra.mxu3 %v3605_v53  ;;  %1044 = vmatpush.msra.mxu1 %v3613_v55 }
 0x105   : > { %1006 = vmatpush.msrb.mxu0 %v3537_v14  ;;  %1064 = vmatpush.msra.mxu2 %v3537_v14 }
 0x106   : > { %1102 = vmatpush.msra.mxu3 %v3613_v55  ;;  %1045 = vmatpush.msra.mxu1 %v3621_v56 }
 0x107   : > { %1007 = vmatpush.msrb.mxu0 %v3545_v36  ;;  %1065 = vmatpush.msra.mxu2 %v3545_v36 }
 0x108   : > { %1103 = vmatpush.msra.mxu3 %v3621_v56  ;;  %1046 = vmatpush.msra.mxu1 %v3629_v61 }
 0x109   : > { %839 = vmatmul.f32.gmra.mxu2 %v667_v29  ;;  %868 = vmatmul.f32.gmra.mxu3 %v667_v29  ;;  %v3697_v29 = vld [vmem:[#allocation5 + $0x21a] ss:$0 sm:$0xff] }
 0x10a   : > { %1008 = vmatpush.msrb.mxu0 %v3551_v38  ;;  %1066 = vmatpush.msra.mxu2 %v3551_v38 }
 0x10b   : > { %1104 = vmatpush.msra.mxu3 %v3629_v61  ;;  %1047 = vmatpush.msra.mxu1 %v3639_v0 }
 0x10c   : > { %1009 = vmatpush.msrb.mxu0 %v3557_v40  ;;  %1067 = vmatpush.msra.mxu2 %v3557_v40 }
 0x10d   : > { %1105 = vmatpush.msra.mxu3 %v3639_v0  ;;  %1148 = vmatpush.msrb.mxu1 %v3515_v31 }
 0x10e   : > { %1010 = vmatpush.msrb.mxu0 %v3569_v42  ;;  %1068 = vmatpush.msra.mxu2 %v3569_v42 }
 0x10f   : > { %1149 = vmatpush.msrb.mxu1 %v3521_v33 }
 0x110   : > { %1011 = vmatpush.msrb.mxu0 %v3575_v44  ;;  %1069 = vmatpush.msra.mxu2 %v3575_v44 }
 0x111   : > { %842 = vmatmul.f32.gmra.mxu2 %v668_v27  ;;  %871 = vmatmul.f32.gmra.mxu3 %v668_v27 }
 0x112   : > { %1012 = vmatpush.msrb.mxu0 %v3581_v47  ;;  %1070 = vmatpush.msra.mxu2 %v3581_v47 }
 0x113   : > { %1150 = vmatpush.msrb.mxu1 %v3527_v34 }
 0x114   : > { %1013 = vmatpush.msrb.mxu0 %v3589_v49  ;;  %1071 = vmatpush.msra.mxu2 %v3589_v49 }
 0x115   : > { %1151 = vmatpush.msrb.mxu1 %v3539_v35 }
 0x116   : > { %1014 = vmatpush.msrb.mxu0 %v3603_v59  ;;  %1072 = vmatpush.msra.mxu2 %v3603_v59 }
 0x117   : > { %1152 = vmatpush.msrb.mxu1 %v3547_v37 }
 0x118   : > { %1015 = vmatpush.msrb.mxu0 %v3611_v54  ;;  %1073 = vmatpush.msra.mxu2 %v3611_v54 }
 0x119   : > { %1153 = vmatpush.msrb.mxu1 %v3553_v39 }
 0x11a   : > { %1016 = vmatpush.msrb.mxu0 %v3619_v5  ;;  %1074 = vmatpush.msra.mxu2 %v3619_v5 }
 0x11b   : > { %1154 = vmatpush.msrb.mxu1 %v3559_v41 }
 0x11c   : > { %1017 = vmatpush.msrb.mxu0 %v3627_v57  ;;  %1075 = vmatpush.msra.mxu2 %v3627_v57 }
 0x11d   : > { %1155 = vmatpush.msrb.mxu1 %v3571_v43 }
 0x11e   : > { %1018 = vmatpush.msrb.mxu0 %v3637_v32  ;;  %1076 = vmatpush.msra.mxu2 %v3637_v32 }
 0x11f   : > { %1156 = vmatpush.msrb.mxu1 %v3577_v45 }
 0x120   : > { %1119 = vmatpush.msra.mxu0 %v3513_v30 }
 0x121   : > { %1157 = vmatpush.msrb.mxu1 %v3583_v48 }
 0x122   : > { %1120 = vmatpush.msra.mxu0 %v3519_v19 }
 0x123   : > { %1158 = vmatpush.msrb.mxu1 %v3591_v50 }
 0x124   : > { %1121 = vmatpush.msra.mxu0 %v3525_v25 }
 0x125   : > { %1159 = vmatpush.msrb.mxu1 %v3605_v53 }
 0x126   : > { %1122 = vmatpush.msra.mxu0 %v3537_v14 }
 0x127   : > { %1160 = vmatpush.msrb.mxu1 %v3613_v55 }
 0x128   : > { %1123 = vmatpush.msra.mxu0 %v3545_v36 }
 0x129   : > { %1161 = vmatpush.msrb.mxu1 %v3621_v56 }
 0x12a   : > { %1124 = vmatpush.msra.mxu0 %v3551_v38 }
 0x12b   : > { %1162 = vmatpush.msrb.mxu1 %v3629_v61 }
 0x12c   : > { %1125 = vmatpush.msra.mxu0 %v3557_v40 }
 0x12d   : > { %1163 = vmatpush.msrb.mxu1 %v3639_v0 }
 0x12e   : > { %1126 = vmatpush.msra.mxu0 %v3569_v42 }
 0x130   : > { %1127 = vmatpush.msra.mxu0 %v3575_v44 }
 0x132   : > { %1128 = vmatpush.msra.mxu0 %v3581_v47 }
 0x134   : > { %1129 = vmatpush.msra.mxu0 %v3589_v49 }
 0x136   : > { %1130 = vmatpush.msra.mxu0 %v3603_v59 }
 0x138   : > { %1131 = vmatpush.msra.mxu0 %v3611_v54 }
 0x13a   : > { %1132 = vmatpush.msra.mxu0 %v3619_v5 }
 0x13c   : > { %1133 = vmatpush.msra.mxu0 %v3627_v57 }
 0x13e   : > { %1134 = vmatpush.msra.mxu0 %v3637_v32 }
 0x157   : > { %v3657_v58 = vpop.f32.mrf.mxu0  ;;  %v805_v26 = vpop.f32.mrf.mxu1 }
 0x158   : > { %v879_v52 = vsel %vm3316_vm1, %v3657_v58, 0.0  ;;  %v899_v15 = vsel %vm3320_vm2, %v3657_v58, 0.0 }
 0x15c   : > { %v3597_v51 = vpop.f32.mrf.mxu2  ;;  %v747_v2 = vpop.f32.mrf.mxu3 }
 0x15d   : > { %v875_v12 = vsel %vm3332_vm5, %v3597_v51, 0.0  ;;  %v895_v13 = vsel %vm3336_vm6, %v3597_v51, 0.0 }
 0x15e   : > { %v883_v17 = vadd.f32 %v879_v52, %v875_v12  ;;  %v903_v60 = vadd.f32 %v899_v15, %v895_v13 }
 0x15f   : > { %v3683_v18 = vpop.f32.mrf.mxu0  ;;  %v808_v35 = vpop.f32.mrf.mxu1 }
 0x160   : > { %v880_v34 = vsel %vm3316_vm1, %v3683_v18, 0.0  ;;  %v900_v14 = vsel %vm3320_vm2, %v3683_v18, 0.0 }
 0x164   : > { %v3631_v63 = vpop.f32.mrf.mxu2  ;;  %v750_v4 = vpop.f32.mrf.mxu3 }
 0x165   : > { %v876_v30 = vsel %vm3332_vm5, %v3631_v63, 0.0  ;;  %v896_v31 = vsel %vm3336_vm6, %v3631_v63, 0.0  ;;  %v916_v8 = vsel %vm3446_vm8, %v3631_v63, 0.0 }
 0x166   : > { %v884_v36 = vadd.f32 %v880_v34, %v876_v30  ;;  %v904_v37 = vadd.f32 %v900_v14, %v896_v31 }
 0x167   : > { %v3727_v43 = vpop.f32.mrf.mxu0 }
 0x168   : > { %v881_v54 = vsel %vm3316_vm1, %v3727_v43, 0.0  ;;  %v901_v55 = vsel %vm3320_vm2, %v3727_v43, 0.0 }
 0x16c   : > { %v3649_v1 = vpop.f32.mrf.mxu2  ;;  %v753_v19 = vpop.f32.mrf.mxu3 }
 0x16d   : > { %v877_v49 = vsel %vm3332_vm5, %v3649_v1, 0.0  ;;  %v897_v50 = vsel %vm3336_vm6, %v3649_v1, 0.0 }
 0x16e   : > { %v885_v56 = vadd.f32 %v881_v54, %v877_v49  ;;  %v905_v57 = vadd.f32 %v901_v55, %v897_v50  ;;  %v917_v50 = vsel %vm3446_vm8, %v3649_v1, 0.0 }
 0x16f   : > { %v3753_v52 = vpop.f32.mrf.mxu0 }
 0x170   : > { %v902_v10 = vsel %vm3320_vm2, %v3753_v52, 0.0 }
 0x174   : > { %v3661_v3 = vpop.f32.mrf.mxu2  ;;  %v756_v5 = vpop.f32.mrf.mxu3 }
 0x175   : > { %v918_v1 = vsel %vm3446_vm8, %v3661_v3, 0.0 }
 0x17c   : > { %v3685_v20 = vpop.f32.mrf.mxu2 }
 0x17d   : > { %v887_v46 = vsel %vm3324_vm3, %v3685_v20, 0.0  ;;  %v907_v22 = vsel %vm3328_vm4, %v3685_v20, 0.0 }
 0x17e   : > { %v891_v23 = vadd.f32 %v887_v46, %v883_v17  ;;  %v911_v24 = vadd.f32 %v907_v22, %v903_v60  ;;  %v878_v60 = vsel %vm3332_vm5, %v3661_v3, 0.0  ;;  %v898_v46 = vsel %vm3336_vm6, %v3661_v3, 0.0 }
 0x17f   : > { %v906_v30 = vadd.f32 %v902_v10, %v898_v46 }
 0x180   : > { %v935_v62 = vadd.f32 %v891_v23, %v747_v2  ;;  %v947_v27 = vadd.f32 %v911_v24, %v805_v26  ;;  %v811_v2 = vpop.f32.mrf.mxu1  ;;  %v915_v24 = vsel %vm3446_vm8, %v3597_v51, 0.0  ;;  %v927_v51 = vsel %vm3459_vm9, %v3685_v20, 0.0 }
 0x182   : > { %v939_v33 = vadd.f32 %v935_v62, %v3697_v29  ;;  %v951_v25 = vadd.f32 %v947_v27, %v3697_v29  ;;  %v882_v62 = vsel %vm3316_vm1, %v3753_v52, 0.0 }
 0x183   : > { %v886_v27 = vadd.f32 %v882_v62, %v878_v60 }
 0x184   : > { %v3717_v38 = vpop.f32.mrf.mxu2  ;;  %v943_v39 = vmax.f32 %v939_v33, 0.0  ;;  %v955_v40 = vmax.f32 %v951_v25, 0.0  ;;  %v919_v33 = vsel %vm3440_vm7, %v3657_v58, 0.0  ;;  %v863_v25 = vpop.f32.mrf.mxu3 }
 0x185   : > { %v888_v41 = vsel %vm3324_vm3, %v3717_v38, 0.0  ;;  %v908_v42 = vsel %vm3328_vm4, %v3717_v38, 0.0  ;;  %v923_v34 = vadd.f32 %v919_v33, %v915_v24  ;;  %v3830_v24 = vperm.slane %v314_v16, 0 }
 0x186   : > { %v892_v44 = vadd.f32 %v888_v41, %v884_v36  ;;  %v912_v45 = vadd.f32 %v908_v42, %v904_v37  ;;  %1019 = vmatmul.f32.vlgmr.msrb.gmra.mxu0 %v943_v39  ;;  %1048 = vmatmul.f32.vlgmr.msra.gmra.mxu1 %v943_v39 }
 0x187   : > { %1077 = vmatmul.f32.vlgmr.msra.gmra.mxu2 %v955_v40  ;;  %1106 = vmatmul.f32.vlgmr.msra.gmra.mxu3 %v955_v40  ;;  %v931_v58 = vadd.f32 %v927_v51, %v923_v34 }
 0x188   : > { %v936_v47 = vadd.f32 %v892_v44, %v750_v4  ;;  %v948_v48 = vadd.f32 %v912_v45, %v808_v35  ;;  %v814_v36 = vpop.f32.mrf.mxu1  ;;  %v920_v44 = vsel %vm3440_vm7, %v3683_v18, 0.0  ;;  %v928_v45 = vsel %vm3459_vm9, %v3717_v38, 0.0 }
 0x189   : > { %v959_v9 = vadd.f32 %v931_v58, %v863_v25  ;;  %v921_v18 = vsel %vm3440_vm7, %v3727_v43, 0.0  ;;  %v922_v43 = vsel %vm3440_vm7, %v3753_v52, 0.0  ;;  %v312_v52 = vld [vmem:[#allocation5 + $0x210] ss:$8 sm:$0x3] }
 0x18a   : > { %v940_v59 = vadd.f32 %v936_v47, %v3697_v29  ;;  %v952_v53 = vadd.f32 %v948_v48, %v3697_v29  ;;  %v924_v47 = vadd.f32 %v920_v44, %v916_v8  ;;  %v925_v54 = vadd.f32 %v921_v18, %v917_v50 }
 0x18b   : > { %v963_v49 = vadd.f32 %v959_v9, %v3697_v29 }
 0x18c   : > { %v3745_v61 = vpop.f32.mrf.mxu2  ;;  %v944_v32 = vmax.f32 %v940_v59, 0.0  ;;  %v956_v0 = vmax.f32 %v952_v53, 0.0  ;;  %v866_v48 = vpop.f32.mrf.mxu3  ;;  %v932_v63 = vadd.f32 %v928_v45, %v924_v47 }
 0x18d   : > { %v889_v4 = vsel %vm3324_vm3, %v3745_v61, 0.0  ;;  %v909_v26 = vsel %vm3328_vm4, %v3745_v61, 0.0  ;;  %v967_v59 = vmax.f32 %v963_v49, 0.0  ;;  %v929_v38 = vsel %vm3459_vm9, %v3745_v61, 0.0 }
 0x18e   : > { %v893_v12 = vadd.f32 %v889_v4, %v885_v56  ;;  %v913_v13 = vadd.f32 %v909_v26, %v905_v57  ;;  %1022 = vmatmul.f32.gmra.mxu0 %v944_v32  ;;  %1051 = vmatmul.f32.gmra.mxu1 %v944_v32  ;;  %v960_v53 = vadd.f32 %v932_v63, %v866_v48 }
 0x18f   : > { %1080 = vmatmul.f32.gmra.mxu2 %v956_v0  ;;  %1109 = vmatmul.f32.gmra.mxu3 %v956_v0  ;;  %v933_v55 = vadd.f32 %v929_v38, %v925_v54  ;;  %v926_v0 = vadd.f32 %v922_v43, %v918_v1 }
 0x190   : > { %v937_v15 = vadd.f32 %v893_v12, %v753_v19  ;;  %v949_v17 = vadd.f32 %v913_v13, %v811_v2 }
 0x192   : > { %v941_v22 = vadd.f32 %v937_v15, %v3697_v29  ;;  %v953_v23 = vadd.f32 %v949_v17, %v3697_v29  ;;  %v3816_v15 = vperm.slane %v312_v52, 1  ;;  %v3818_v17 = vperm.slane %v312_v52, 0 }
 0x194   : > { %v843_v11 = vpop.f32.mrf.mxu2  ;;  %v945_v31 = vmax.f32 %v941_v22, 0.0  ;;  %v957_v19 = vmax.f32 %v953_v23, 0.0  ;;  %v869_v56 = vpop.f32.mrf.mxu3 }
 0x195   : > { %v890_v6 = vsel %vm3324_vm3, %v843_v11, 0.0  ;;  %v910_v7 = vsel %vm3328_vm4, %v843_v11, 0.0  ;;  %v961_v57 = vadd.f32 %v933_v55, %v869_v56  ;;  %v930_v61 = vsel %vm3459_vm9, %v843_v11, 0.0 }
 0x196   : > { %v894_v14 = vadd.f32 %v890_v6, %v886_v27  ;;  %v914_v35 = vadd.f32 %v910_v7, %v906_v30  ;;  %1025 = vmatmul.f32.gmra.mxu0 %v945_v31  ;;  %1054 = vmatmul.f32.gmra.mxu1 %v945_v31  ;;  %v934_v2 = vadd.f32 %v930_v61, %v926_v0 }
 0x197   : > { %1083 = vmatmul.f32.gmra.mxu2 %v957_v19  ;;  %1112 = vmatmul.f32.gmra.mxu3 %v957_v19  ;;  %v965_v4 = vadd.f32 %v961_v57, %v3697_v29 }
 0x198   : > { %v938_v37 = vadd.f32 %v894_v14, %v756_v5  ;;  %v950_v39 = vadd.f32 %v914_v35, %v814_v36  ;;  %v964_v5 = vadd.f32 %v960_v53, %v3697_v29 }
 0x199   : > { %v969_v13 = vmax.f32 %v965_v4, 0.0 }
 0x19a   : > { %v942_v40 = vadd.f32 %v938_v37, %v3697_v29  ;;  %v954_v20 = vadd.f32 %v950_v39, %v3697_v29  ;;  %v968_v32 = vmax.f32 %v964_v5, 0.0 }
 0x19c   : > { %v946_v41 = vmax.f32 %v942_v40, 0.0  ;;  %v958_v42 = vmax.f32 %v954_v20, 0.0  ;;  %v872_v26 = vpop.f32.mrf.mxu3 }
 0x19d   : > { %v962_v12 = vadd.f32 %v934_v2, %v872_v26 }
 0x19e   : > { %1028 = vmatmul.f32.gmra.mxu0 %v946_v41  ;;  %1057 = vmatmul.f32.gmra.mxu1 %v946_v41 }
 0x19f   : > { %1086 = vmatmul.f32.gmra.mxu2 %v958_v42  ;;  %1115 = vmatmul.f32.gmra.mxu3 %v958_v42  ;;  %v966_v21 = vadd.f32 %v962_v12, %v3697_v29 }
 0x1a1   : > { %v970_v3 = vmax.f32 %v966_v21, 0.0 }
 0x1a6   : > { %1135 = vmatmul.f32.vlgmr.msra.gmra.mxu0 %v967_v59  ;;  %1164 = vmatmul.f32.vlgmr.msrb.gmra.mxu1 %v967_v59 }
 0x1ae   : > { %1138 = vmatmul.f32.gmra.mxu0 %v968_v32  ;;  %1167 = vmatmul.f32.gmra.mxu1 %v968_v32 }
 0x1b6   : > { %1141 = vmatmul.f32.gmra.mxu0 %v969_v13  ;;  %1170 = vmatmul.f32.gmra.mxu1 %v969_v13 }
 0x1be   : > { %1144 = vmatmul.f32.gmra.mxu0 %v970_v3  ;;  %1173 = vmatmul.f32.gmra.mxu1 %v970_v3 }
 0x203   : > { %v3820_v60 = vpop.f32.mrf.mxu0  ;;  %v3822_v46 = vpop.f32.mrf.mxu1 }
 0x204   : > { %v1273_v22 = vmul.f32 %v3814_v28, %v3822_v46  ;;  %v1183_v29 = vmul.f32 %v3816_v15, %v3822_v46  ;;  %v1182_v23 = vmul.f32 %v3818_v17, %v3820_v60  ;;  %v1272_v31 = vmul.f32 %v3830_v24, %v3820_v60 }
 0x206   : > { %1288 = vadd.xlane.f32.xlu1 %v1273_v22  ;;  %1198 = vadd.xlane.f32.xlu2 %v1183_v29 }
 0x207   : > { %1190 = vadd.xlane.f32.xlu0 %v1182_v23 }
 0x20a   : > { %v3832_v62 = vpop.f32.mrf.mxu2  ;;  %v3834_v10 = vpop.f32.mrf.mxu3 }
 0x20b   : > { %4898 = vst [vmem:[#allocation15_spill] sm:$0xff] %v3834_v10  ;;  %v3836_v27 = vpop.f32.mrf.mxu0  ;;  %v1211_v11 = vmul.f32 %v3818_v17, %v3832_v62  ;;  %v1300_v25 = vmul.f32 %v3830_v24, %v3832_v62  ;;  %v1212_v51 = vmul.f32 %v3816_v15, %v3834_v10  ;;  %v3852_v6 = vpop.f32.mrf.mxu1  ;;  %v1301_v14 = vmul.f32 %v3814_v28, %v3834_v10 }
 0x20c   : > { %4899 = vst [vmem:[#allocation16_spill] sm:$0xff] %v3836_v27  ;;  %v1274_v30 = vmul.f32 %v3830_v24, %v3836_v27  ;;  %v1185_v34 = vmul.f32 %v3816_v15, %v3852_v6  ;;  %v1275_v37 = vmul.f32 %v3814_v28, %v3852_v6  ;;  %v1184_v39 = vmul.f32 %v3818_v17, %v3836_v27 }
 0x20d   : > { %4901 = vst [vmem:[#allocation18_spill] sm:$0xff] %v3852_v6 }
 0x20e   : > { %1282 = vadd.xlane.f32.xlu1 %v1274_v30  ;;  %1219 = vadd.xlane.f32.xlu2 %v1211_v11 }
 0x20f   : > { %1280 = vadd.xlane.f32.xlu0 %v1272_v31 }
 0x212   : > { %v3844_v19 = vpop.f32.mrf.mxu3  ;;  %v3860_v35 = vpop.f32.mrf.mxu2 }
 0x213   : > { %4900 = vst [vmem:[#allocation17_spill] sm:$0xff] %v3844_v19  ;;  %v1214_v33 = vmul.f32 %v3816_v15, %v3844_v19  ;;  %v1303_v7 = vmul.f32 %v3814_v28, %v3844_v19  ;;  %v3862_v36 = vpop.f32.mrf.mxu0  ;;  %v1213_v9 = vmul.f32 %v3818_v17, %v3860_v35  ;;  %v1302_v45 = vmul.f32 %v3830_v24, %v3860_v35  ;;  %v3886_v47 = vpop.f32.mrf.mxu1 }
 0x214   : > { %4902 = vst [vmem:[#allocation19_spill] sm:$0xff] %v3860_v35  ;;  %v1186_v58 = vmul.f32 %v3818_v17, %v3862_v36  ;;  %v1276_v20 = vmul.f32 %v3830_v24, %v3862_v36  ;;  %v1187_v50 = vmul.f32 %v3816_v15, %v3886_v47  ;;  %v1277_v54 = vmul.f32 %v3814_v28, %v3886_v47 }
 0x215   : > { %4903 = vst [vmem:[#allocation20_spill] sm:$0xff] %v3862_v36 }
 0x216   : > { %1229 = vadd.xlane.f32.xlu1 %v1214_v33  ;;  %1308 = vadd.xlane.f32.xlu2 %v1300_v25  ;;  %4906 = vst [vmem:[#allocation23_spill] sm:$0xff] %v3886_v47 }
 0x217   : > { %1227 = vadd.xlane.f32.xlu0 %v1212_v51 }
 0x21a   : > { %v3870_v40 = vpop.f32.mrf.mxu2  ;;  %v3878_v41 = vpop.f32.mrf.mxu3 }
 0x21b   : > { %4904 = vst [vmem:[#allocation21_spill] sm:$0xff] %v3870_v40  ;;  %v1215_v8 = vmul.f32 %v3818_v17, %v3870_v40  ;;  %v1216_v42 = vmul.f32 %v3816_v15, %v3878_v41  ;;  %v1304_v44 = vmul.f32 %v3830_v24, %v3870_v40  ;;  %v3888_v48 = vpop.f32.mrf.mxu0  ;;  %v1305_v49 = vmul.f32 %v3814_v28, %v3878_v41  ;;  %v3896_v59 = vpop.f32.mrf.mxu1 }
 0x21c   : > { %4905 = vst [vmem:[#allocation22_spill] sm:$0xff] %v3878_v41  ;;  %v1188_v63 = vmul.f32 %v3818_v17, %v3888_v48  ;;  %v1189_v38 = vmul.f32 %v3816_v15, %v3896_v59  ;;  %v1279_v5 = vmul.f32 %v3814_v28, %v3896_v59  ;;  %v1278_v1 = vmul.f32 %v3830_v24, %v3888_v48 }
 0x21d   : > { %4907 = vst [vmem:[#allocation24_spill] sm:$0xff] %v3888_v48 }
 0x21e   : > { %1318 = vadd.xlane.f32.xlu1 %v1303_v7  ;;  %1200 = vadd.xlane.f32.xlu2 %v1185_v34  ;;  %4908 = vst [vmem:[#allocation25_spill] sm:$0xff] %v3896_v59 }
 0x21f   : > { %1316 = vadd.xlane.f32.xlu0 %v1301_v14 }
 0x222   : > { %v3898_v53 = vpop.f32.mrf.mxu2  ;;  %v3916_v32 = vpop.f32.mrf.mxu3 }
 0x223   : > { %4909 = vst [vmem:[#allocation26_spill] sm:$0xff] %v3898_v53  ;;  %v1217_v18 = vmul.f32 %v3818_v17, %v3898_v53  ;;  %v1306_v55 = vmul.f32 %v3830_v24, %v3898_v53  ;;  %v3910_v56 = vpop.f32.mrf.mxu1  ;;  %v3914_v57 = vpop.f32.mrf.mxu0  ;;  %v1218_v0 = vmul.f32 %v3816_v15, %v3916_v32  ;;  %v1307_v13 = vmul.f32 %v3814_v28, %v3916_v32 }
 0x224   : > { %4910 = vst [vmem:[#allocation27_spill] sm:$0xff] %v3914_v57  ;;  %v1240_v43 = vmul.f32 %v3816_v15, %v3910_v56  ;;  %v1239_v61 = vmul.f32 %v3818_v17, %v3914_v57  ;;  %v1329_v4 = vmul.f32 %v3814_v28, %v3910_v56  ;;  %v1328_v26 = vmul.f32 %v3830_v24, %v3914_v57 }
 0x225   : > { %4911 = vst [vmem:[#allocation28_spill] sm:$0xff] %v3916_v32 }
 0x226   : > { %1194 = vadd.xlane.f32.xlu1 %v1186_v58  ;;  %1290 = vadd.xlane.f32.xlu2 %v1275_v37 }
 0x227   : > { %1192 = vadd.xlane.f32.xlu0 %v1184_v39 }
 0x22b   : > { %v3924_v2 = vpop.f32.mrf.mxu1  ;;  %v3930_v12 = vpop.f32.mrf.mxu0 }
 0x22c   : > { %4912 = vst [vmem:[#allocation29_spill] sm:$0xff] %v3924_v2  ;;  %v1241_v16 = vmul.f32 %v3818_v17, %v3930_v12  ;;  %v1242_v52 = vmul.f32 %v3816_v15, %v3924_v2  ;;  %v1330_v23 = vmul.f32 %v3830_v24, %v3930_v12  ;;  %v1331_v30 = vmul.f32 %v3814_v28, %v3924_v2 }
 0x22d   : > { %4913 = vst [vmem:[#allocation30_spill] sm:$0xff] %v3930_v12 }
 0x22e   : > { %1284 = vadd.xlane.f32.xlu2 %v1276_v20  ;;  %1223 = vadd.xlane.f32.xlu1 %v1215_v8 }
 0x22f   : > { %1221 = vadd.xlane.f32.xlu0 %v1213_v9 }
 0x233   : > { %v3934_v21 = vpop.f32.mrf.mxu1  ;;  %v3942_v22 = vpop.f32.mrf.mxu0 }
 0x234   : > { %4914 = vst [vmem:[#allocation31_spill] sm:$0xff] %v3934_v21  ;;  %v1244_v3 = vmul.f32 %v3816_v15, %v3934_v21  ;;  %v1333_v29 = vmul.f32 %v3814_v28, %v3934_v21  ;;  %v1243_v51 = vmul.f32 %v3818_v17, %v3942_v22 }
 0x235   : > { %4915 = vst [vmem:[#allocation32_spill] sm:$0xff] %v3942_v22 }
 0x236   : > { %1231 = vadd.xlane.f32.xlu2 %v1216_v42  ;;  %1312 = vadd.xlane.f32.xlu1 %v1304_v44  ;;  %v1375_v44 = vstv %s1374_s17 }
 0x237   : > { %1310 = vadd.xlane.f32.xlu0 %v1302_v45  ;;  %vm3979_vm12 = vcmp.eq.s32.totalorder %v1375_v44, 1 }
 0x23b   : > { %v3950_v11 = vpop.f32.mrf.mxu0  ;;  %v3952_v31 = vpop.f32.mrf.mxu1 }
 0x23c   : > { %4916 = vst [vmem:[#allocation33_spill] sm:$0xff] %v3950_v11  ;;  %v1246_v33 = vmul.f32 %v3816_v15, %v3952_v31  ;;  %v1245_v25 = vmul.f32 %v3818_v17, %v3950_v11  ;;  %v1335_v15 = vmul.f32 %v3814_v28, %v3952_v31  ;;  %v1334_v37 = vmul.f32 %v3830_v24, %v3950_v11 }
 0x23d   : > { %4917 = vst [vmem:[#allocation34_spill] sm:$0xff] %v3952_v31  ;;  %v1332_v17 = vmul.f32 %v3830_v24, %v3942_v22 }
 0x23e   : > { %1320 = vadd.xlane.f32.xlu2 %v1305_v49  ;;  %1196 = vadd.xlane.f32.xlu1 %v1188_v63  ;;  %v1400_v63 = vstv %s1399_s18 }
 0x23f   : > { %1202 = vadd.xlane.f32.xlu0 %v1187_v50  ;;  %vm3983_vm13 = vcmp.eq.s32.totalorder %v1400_v63, 1 }
 0x246   : > { %1225 = vadd.xlane.f32.xlu2 %v1217_v18  ;;  %1204 = vadd.xlane.f32.xlu1 %v1189_v38 }
 0x247   : > { %1292 = vadd.xlane.f32.xlu0 %v1277_v54 }
 0x24e   : > { %1314 = vadd.xlane.f32.xlu2 %v1306_v55  ;;  %1294 = vadd.xlane.f32.xlu1 %v1279_v5  ;;  %v2013_v55 = vstv %s4131_s12 }
 0x24f   : > { %1286 = vadd.xlane.f32.xlu0 %v1278_v1 }
 0x256   : > { %1255 = vadd.xlane.f32.xlu2 %v1240_v43  ;;  %1247 = vadd.xlane.f32.xlu1 %v1239_v61 }
 0x257   : > { %1233 = vadd.xlane.f32.xlu0 %v1218_v0 }
 0x25e   : > { %1344 = vadd.xlane.f32.xlu2 %v1329_v4  ;;  %1336 = vadd.xlane.f32.xlu1 %v1328_v26 }
 0x25f   : > { %1322 = vadd.xlane.f32.xlu0 %v1307_v13  ;;  %v1694_v13 = vstv %s1693_s23  ;;  %s2474_s23 = scalar_lea.hbm %s4831_s4, %s2634_s16 }
 0x260   : > { %vm4004_vm15 = vcmp.eq.s32.totalorder %v1694_v13, 1  ;;  %s2477_s26 = sshll.u32 %s2474_s23, 4  ;;  %s2478_s26 = int_to_ptr.hbm [resolvable:$true] %s2477_s26 }
 0x261   : > { %s2913_s7 = sshra.s32 %s2478_s26, 4  ;;  %s2914_s7 = int_to_ptr.hbm [resolvable:$true] %s2913_s7 }
 0x262   : > { %s2915_s0 = scalar_lea.hbm %s2914_s7, 32  ;;  %p2920_p0 = scmp.lt.s32.totalorder %s2914_s7, %s4831_s4 }
 0x263   : > { %p2916_p11 = scmp.ne.s32.totalorder %s2914_s7, %s2915_s0  ;;  %p2921_p2 = scmp.lt.s32.totalorder %s2919_s10, %s2915_s0 }
 0x265   : > { %p2917_p12 = pnand %p2916_p11, %p3055_p6  ;;  %p2922_p3 = por %p2921_p2, %p2920_p0 }
 0x266   : > { %1259 = vadd.xlane.f32.xlu1 %v1244_v3  ;;  %1249 = vadd.xlane.f32.xlu2 %v1241_v16  ;;  %v1719_v3 = vstv %s1718_s25  ;;  %s2475_s25 = sshll.u32 %s4773_s15, 4  ;;  %s2476_s25 = int_to_ptr.vmem [resolvable:$true] %s2475_s25 }
 0x267   : > { %1257 = vadd.xlane.f32.xlu0 %v1242_v52  ;;  %vm4008_vm0 = vcmp.eq.s32.totalorder %v1719_v3, 1  ;;  %p2918_p13 = pneg %p2917_p12 }
 0x269   : > { %p2923_p4 = pnand %p2922_p3, %p2918_p13 }
 0x26e   : > { %1348 = vadd.xlane.f32.xlu1 %v1333_v29  ;;  %1338 = vadd.xlane.f32.xlu2 %v1330_v23 }
 0x26f   : > { %1346 = vadd.xlane.f32.xlu0 %v1331_v30 }
 0x276   : > { %1261 = vadd.xlane.f32.xlu2 %v1246_v33  ;;  %1253 = vadd.xlane.f32.xlu1 %v1245_v25 }
 0x277   : > { %1251 = vadd.xlane.f32.xlu0 %v1243_v51 }
 0x279   : > { %v1289_v7 = vpop.xlane.xlu1 %1288  ;;  %v1199_v34 = vpop.xlane.xlu2 %1198 }
 0x27a   : > { %v1191_v14 = vpop.xlane.xlu0 %1190 }
 0x27b   : > { %v3961_v58 = vsel %vm1206_vm10, %v1191_v14, %v1199_v34 }
 0x27e   : > { %1350 = vadd.xlane.f32.xlu2 %v1335_v15  ;;  %1342 = vadd.xlane.f32.xlu1 %v1334_v37 }
 0x27f   : > { %1340 = vadd.xlane.f32.xlu0 %v1332_v17 }
 0x281   : > { %v1283_v39 = vpop.xlane.xlu1 %1282  ;;  %v1220_v20 = vpop.xlane.xlu2 %1219 }
 0x282   : > { %v1281_v8 = vpop.xlane.xlu0 %1280 }
 0x283   : > { %v3970_v9 = vsel %vm1206_vm10, %v1281_v8, %v1289_v7 }
 0x284   : > { %v1356_v28 = vadd.f32 %v3970_v9, %v3961_v58 }
 0x286   : > { %v1364_v45 = vmul.f32 0.2, %v1356_v28  ;;  %vm1360_vm11 = vcmp.gt.f32.partialorder %v1356_v28, 0.0 }
 0x288   : > { %v1368_v54 = vsel %vm1360_vm11, %v1356_v28, %v1364_v45 }
 0x289   : > { %v1230_v42 = vpop.xlane.xlu1 %1229  ;;  %v1309_v24 = vpop.xlane.xlu2 %1308  ;;  %v3989_v43 = vsel %vm3979_vm12, %v1368_v54, -1e+30 }
 0x28a   : > { %v1228_v49 = vpop.xlane.xlu0 %1227 }
 0x28b   : > { %v3975_v50 = vsel %vm1206_vm10, %v1220_v20, %v1228_v49 }
 0x28c   : > { %v1381_v18 = vadd.f32 %v3970_v9, %v3975_v50 }
 0x28e   : > { %vm1385_vm14 = vcmp.gt.f32.partialorder %v1381_v18, 0.0  ;;  %v1389_v5 = vmul.f32 0.2, %v1381_v18 }
 0x290   : > { %v1393_v1 = vsel %vm1385_vm14, %v1381_v18, %v1389_v5 }
 0x291   : > { %v3993_v61 = vsel %vm3983_vm13, %v1393_v1, -1e+30  ;;  %v1319_v0 = vpop.xlane.xlu1 %1318  ;;  %v1201_v4 = vpop.xlane.xlu2 %1200 }
 0x292   : > { %v1317_v16 = vpop.xlane.xlu0 %1316  ;;  %v4930_v48 = vmax.f32 %v3989_v43, %v3993_v61 }
 0x293   : > { %v3998_v52 = vsel %vm1206_vm10, %v1309_v24, %v1317_v16 }
 0x294   : > { %v1675_v29 = vadd.f32 %v3998_v52, %v3961_v58  ;;  %v1700_v23 = vadd.f32 %v3998_v52, %v3975_v50 }
 0x296   : > { %vm1679_vm1 = vcmp.gt.f32.partialorder %v1675_v29, 0.0  ;;  %v1683_v25 = vmul.f32 0.2, %v1675_v29  ;;  %vm1704_vm2 = vcmp.gt.f32.partialorder %v1700_v23, 0.0  ;;  %v1708_v51 = vmul.f32 0.2, %v1700_v23 }
 0x298   : > { %v1687_v7 = vsel %vm1679_vm1, %v1675_v29, %v1683_v25  ;;  %v1712_v34 = vsel %vm1704_vm2, %v1700_v23, %v1708_v51 }
 0x299   : > { %v4014_v14 = vsel %vm4004_vm15, %v1687_v7, -1e+30  ;;  %v4018_v15 = vsel %vm4008_vm0, %v1712_v34, -1e+30  ;;  %v1195_v37 = vpop.xlane.xlu1 %1194  ;;  %v1291_v17 = vpop.xlane.xlu2 %1290 }
 0x29a   : > { %v1193_v8 = vpop.xlane.xlu0 %1192  ;;  %v4023_v28 = vsel %vm1206_vm10, %v1283_v39, %v1291_v17 }
 0x29b   : > { %v4026_v24 = vsel %vm1206_vm10, %v1193_v8, %v1201_v4 }
 0x29c   : > { %v1357_v44 = vadd.f32 %v4023_v28, %v4026_v24 }
 0x29e   : > { %v1365_v63 = vmul.f32 0.2, %v1357_v44  ;;  %vm1361_vm3 = vcmp.gt.f32.partialorder %v1357_v44, 0.0 }
 0x2a0   : > { %v1369_v1 = vsel %vm1361_vm3, %v1357_v44, %v1365_v63 }
 0x2a1   : > { %v1285_v45 = vpop.xlane.xlu2 %1284  ;;  %v1224_v49 = vpop.xlane.xlu1 %1223  ;;  %v4037_v4 = vsel %vm3979_vm12, %v1369_v1, -1e+30 }
 0x2a2   : > { %v1222_v18 = vpop.xlane.xlu0 %1221 }
 0x2a3   : > { %v4031_v54 = vsel %vm1206_vm10, %v1222_v18, %v1230_v42 }
 0x2a4   : > { %v1382_v5 = vadd.f32 %v4023_v28, %v4031_v54 }
 0x2a6   : > { %vm1386_vm4 = vcmp.gt.f32.partialorder %v1382_v5, 0.0  ;;  %v1390_v39 = vmul.f32 0.2, %v1382_v5 }
 0x2a8   : > { %v1394_v13 = vsel %vm1386_vm4, %v1382_v5, %v1390_v39 }
 0x2a9   : > { %v4041_v3 = vsel %vm3983_vm13, %v1394_v13, -1e+30  ;;  %v1232_v16 = vpop.xlane.xlu2 %1231  ;;  %v1313_v29 = vpop.xlane.xlu1 %1312 }
 0x2aa   : > { %v4046_v23 = vsel %vm1206_vm10, %v1224_v49, %v1232_v16  ;;  %v1311_v25 = vpop.xlane.xlu0 %1310 }
 0x2ab   : > { %v4049_v51 = vsel %vm1206_vm10, %v1311_v25, %v1319_v0 }
 0x2ac   : > { %v1676_v7 = vadd.f32 %v4049_v51, %v4026_v24  ;;  %v1701_v34 = vadd.f32 %v4049_v51, %v4031_v54 }
 0x2ae   : > { %vm1680_vm5 = vcmp.gt.f32.partialorder %v1676_v7, 0.0  ;;  %v1684_v17 = vmul.f32 0.2, %v1676_v7  ;;  %vm1705_vm6 = vcmp.gt.f32.partialorder %v1701_v34, 0.0  ;;  %v1709_v8 = vmul.f32 0.2, %v1701_v34 }
 0x2b0   : > { %v1688_v44 = vsel %vm1680_vm5, %v1676_v7, %v1684_v17  ;;  %v1713_v63 = vsel %vm1705_vm6, %v1701_v34, %v1709_v8 }
 0x2b1   : > { %v4057_v49 = vsel %vm4004_vm15, %v1688_v44, -1e+30  ;;  %v4061_v0 = vsel %vm4008_vm0, %v1713_v63, -1e+30  ;;  %v1321_v18 = vpop.xlane.xlu2 %1320  ;;  %v1197_v5 = vpop.xlane.xlu1 %1196 }
 0x2b2   : > { %v4066_v39 = vsel %vm1206_vm10, %v1313_v29, %v1321_v18  ;;  %v1203_v13 = vpop.xlane.xlu0 %1202 }
 0x2b3   : > { %v1702_v16 = vadd.f32 %v4066_v39, %v4046_v23  ;;  %v4071_v25 = vsel %vm1206_vm10, %v1195_v37, %v1203_v13 }
 0x2b4   : > { %v1677_v7 = vadd.f32 %v4066_v39, %v4071_v25 }
 0x2b5   : > { %vm1706_vm7 = vcmp.gt.f32.partialorder %v1702_v16, 0.0  ;;  %v1710_v34 = vmul.f32 0.2, %v1702_v16 }
 0x2b6   : > { %vm1681_vm8 = vcmp.gt.f32.partialorder %v1677_v7, 0.0  ;;  %v1685_v17 = vmul.f32 0.2, %v1677_v7 }
 0x2b7   : > { %v1714_v8 = vsel %vm1706_vm7, %v1702_v16, %v1710_v34 }
 0x2b8   : > { %v4079_v29 = vsel %vm4008_vm0, %v1714_v8, -1e+30  ;;  %v1689_v44 = vsel %vm1681_vm8, %v1677_v7, %v1685_v17 }
 0x2b9   : > { %v4083_v37 = vsel %vm4004_vm15, %v1689_v44, -1e+30  ;;  %v1226_v63 = vpop.xlane.xlu2 %1225  ;;  %v1205_v18 = vpop.xlane.xlu1 %1204 }
 0x2ba   : > { %v1293_v1 = vpop.xlane.xlu0 %1292  ;;  %v4088_v16 = vsel %vm1206_vm10, %v1197_v5, %v1205_v18 }
 0x2bb   : > { %v4091_v34 = vsel %vm1206_vm10, %v1285_v45, %v1293_v1 }
 0x2bc   : > { %v1358_v7 = vadd.f32 %v4091_v34, %v4071_v25  ;;  %v1383_v17 = vadd.f32 %v4091_v34, %v4046_v23 }
 0x2be   : > { %vm1362_vm9 = vcmp.gt.f32.partialorder %v1358_v7, 0.0  ;;  %v1366_v8 = vmul.f32 0.2, %v1358_v7  ;;  %vm1387_vm11 = vcmp.gt.f32.partialorder %v1383_v17, 0.0  ;;  %v1391_v44 = vmul.f32 0.2, %v1383_v17 }
 0x2c0   : > { %v1370_v13 = vsel %vm1362_vm9, %v1358_v7, %v1366_v8  ;;  %v1395_v42 = vsel %vm1387_vm11, %v1383_v17, %v1391_v44 }
 0x2c1   : > { %v4102_v45 = vsel %vm3979_vm12, %v1370_v13, -1e+30  ;;  %v4106_v5 = vsel %vm3983_vm13, %v1395_v42, -1e+30  ;;  %v1315_v1 = vpop.xlane.xlu2 %1314  ;;  %v1295_v18 = vpop.xlane.xlu1 %1294 }
 0x2c2   : > { %v1287_v26 = vpop.xlane.xlu0 %1286  ;;  %v4940_v57 = vmax.f32 %v4102_v45, %v4106_v5 }
 0x2c3   : > { %v4113_v7 = vsel %vm1206_vm10, %v1287_v26, %v1295_v18  ;;  %v1425_v26 = vstv %s1424_s9  ;;  %v1744_v18 = vstv %s1743_s11 }
 0x2c4   : > { %v1359_v13 = vadd.f32 %v4113_v7, %v4088_v16  ;;  %vm4139_vm1 = vcmp.eq.s32.totalorder %v1744_v18, 1 }
 0x2c6   : > { %vm1363_vm14 = vcmp.gt.f32.partialorder %v1359_v13, 0.0  ;;  %v1367_v42 = vmul.f32 0.2, %v1359_v13 }
 0x2c8   : > { %v1371_v17 = vsel %vm1363_vm14, %v1359_v13, %v1367_v42 }
 0x2c9   : > { %v4122_v8 = vsel %vm3979_vm12, %v1371_v17, -1e+30  ;;  %v1256_v44 = vpop.xlane.xlu2 %1255  ;;  %v1248_v20 = vpop.xlane.xlu1 %1247  ;;  %vm4135_vm12 = vcmp.eq.s32.totalorder %v1425_v26, 1 }
 0x2ca   : > { %v1234_v31 = vpop.xlane.xlu0 %1233  ;;  %v1263_v53 = vsel %vm1206_vm10, %v1248_v20, %v1256_v44 }
 0x2cb   : > { %v4127_v11 = vsel %vm1206_vm10, %v1226_v63, %v1234_v31  ;;  %v1406_v32 = vadd.f32 %v3970_v9, %v1263_v53  ;;  %v1725_v13 = vadd.f32 %v3998_v52, %v1263_v53 }
 0x2cc   : > { %v1384_v38 = vadd.f32 %v4113_v7, %v4127_v11 }
 0x2cd   : > { %vm1410_vm2 = vcmp.gt.f32.partialorder %v1406_v32, 0.0  ;;  %v1414_v31 = vmul.f32 0.2, %v1406_v32  ;;  %vm1729_vm3 = vcmp.gt.f32.partialorder %v1725_v13, 0.0  ;;  %v1733_v9 = vmul.f32 0.2, %v1725_v13 }
 0x2ce   : > { %vm1388_vm4 = vcmp.gt.f32.partialorder %v1384_v38, 0.0  ;;  %v1392_v52 = vmul.f32 0.2, %v1384_v38 }
 0x2cf   : > { %v1418_v63 = vsel %vm1410_vm2, %v1406_v32, %v1414_v31  ;;  %v1737_v17 = vsel %vm1729_vm3, %v1725_v13, %v1733_v9  ;;  %v4931_v32 = vmax.f32 %v4014_v14, %v4018_v15  ;;  %v2063_v9 = vstv %s2062_s13 }
 0x2d0   : > { %v1396_v44 = vsel %vm1388_vm4, %v1384_v38, %v1392_v52  ;;  %v1427_v26 = vsel %vm4135_vm12, %v1418_v63, -1e+30  ;;  %v4150_v18 = vsel %vm4139_vm1, %v1737_v17, -1e+30  ;;  %v2038_v63 = vstv %s2037_s5 }
 0x2d1   : > { %v4154_v59 = vsel %vm3983_vm13, %v1396_v44, -1e+30  ;;  %v4159_v21 = vmax.f32 %v4930_v48, %v1427_v26  ;;  %v4165_v13 = vmax.f32 %v4931_v32, %v4150_v18  ;;  %v1345_v38 = vpop.xlane.xlu2 %1344  ;;  %v1337_v31 = vpop.xlane.xlu1 %1336  ;;  %vm4185_vm13 = vcmp.eq.s32.totalorder %v2013_v55, 1 }
 0x2d2   : > { %v1323_v52 = vpop.xlane.xlu0 %1322  ;;  %v1352_v17 = vsel %vm1206_vm10, %v1337_v31, %v1345_v38  ;;  %vm4189_vm5 = vcmp.eq.s32.totalorder %v2038_v63, 1  ;;  %vm4195_vm8 = vcmp.eq.s32.totalorder %v2063_v9, 1  ;;  %v4943_v42 = vmax.f32 %v4122_v8, %v4154_v59 }
 0x2d3   : > { %v1439_v48 = vsub.f32 %v3989_v43, %v4159_v21  ;;  %v1463_v44 = vsub.f32 %v1427_v26, %v4159_v21  ;;  %v1770_v22 = vsub.f32 %v4018_v15, %v4165_v13  ;;  %v1782_v32 = vsub.f32 %v4150_v18, %v4165_v13 }
 0x2d4   : > { %v4179_v36 = vsel %vm1206_vm10, %v1315_v1, %v1323_v52  ;;  %v1994_v47 = vadd.f32 %v1352_v17, %v3961_v58  ;;  %v2019_v40 = vadd.f32 %v1352_v17, %v3975_v50  ;;  %v2044_v18 = vadd.f32 %v1352_v17, %v1263_v53 }
 0x2d5   : > { %v1678_v38 = vadd.f32 %v4179_v36, %v4088_v16  ;;  %v1703_v1 = vadd.f32 %v4179_v36, %v4127_v11  ;;  %v1443_v58 = vmul.f32 1.442695, %v1439_v48  ;;  %v1467_v63 = vmul.f32 1.442695, %v1463_v44 }
 0x2d6   : > { %vm1998_vm6 = vcmp.gt.f32.partialorder %v1994_v47, 0.0  ;;  %v2002_v26 = vmul.f32 0.2, %v1994_v47  ;;  %vm2023_vm11 = vcmp.gt.f32.partialorder %v2019_v40, 0.0  ;;  %v1774_v41 = vmul.f32 1.442695, %v1770_v22 }
 0x2d7   : > { %vm1682_vm7 = vcmp.gt.f32.partialorder %v1678_v38, 0.0  ;;  %v1686_v50 = vmul.f32 0.2, %v1678_v38  ;;  %vm1707_vm9 = vcmp.gt.f32.partialorder %v1703_v1, 0.0  ;;  %v1711_v52 = vmul.f32 0.2, %v1703_v1 }
 0x2d8   : > { %v2006_v55 = vsel %vm1998_vm6, %v1994_v47, %v2002_v26  ;;  %v2027_v2 = vmul.f32 0.2, %v2019_v40  ;;  %vm2048_vm14 = vcmp.gt.f32.partialorder %v2044_v18, 0.0  ;;  %v2052_v44 = vmul.f32 0.2, %v2044_v18 }
 0x2d9   : > { %v1690_v12 = vsel %vm1682_vm7, %v1678_v38, %v1686_v50  ;;  %v4199_v6 = vpop.xlane.xlu1 %1259  ;;  %v1250_v27 = vpop.xlane.xlu2 %1249  ;;  %v1715_v17 = vsel %vm1707_vm9, %v1703_v1, %v1711_v52  ;;  %v4207_v9 = vsel %vm4185_vm13, %v2006_v55, -1e+30  ;;  %2731 = vpow2.f32 %v1443_v58 }
 0x2da   : > { %v4203_v53 = vsel %vm4004_vm15, %v1690_v12, -1e+30  ;;  %v1258_v48 = vpop.xlane.xlu0 %1257  ;;  %v4211_v47 = vsel %vm4008_vm0, %v1715_v17, -1e+30  ;;  %v2031_v22 = vsel %vm2023_vm11, %v2019_v40, %v2027_v2  ;;  %v2056_v50 = vsel %vm2048_vm14, %v2044_v18, %v2052_v44 }
 0x2db   : > { %v1264_v38 = vsel %vm1206_vm10, %v1250_v27, %v1258_v48  ;;  %v2040_v12 = vsel %vm4189_vm5, %v2031_v22, -1e+30  ;;  %v2065_v33 = vsel %vm4195_vm8, %v2056_v50, -1e+30  ;;  %v4866_v27 = vmov 1  }
 0x2dc   : > { %v1407_v1 = vadd.f32 %v4023_v28, %v1264_v38  ;;  %v1726_v26 = vadd.f32 %v4049_v51, %v1264_v38  ;;  %v2069_v52 = vmax.f32 %v4207_v9, %v2040_v12  ;;  %2710 = vset.pattern.permute.xlu1 %v4866_v27  ;;  %v4864_v2 = vmov 0  }
 0x2dd   : > { %2711 = vset.pattern.permute.xlu2 %v4864_v2  ;;  %2709 = vset.pattern.permute.xlu0 %v4864_v2  ;;  %v1451_v51 = vsub.f32 %v3993_v61, %v4159_v21  ;;  %v1786_v17 = vmul.f32 1.442695, %v1782_v32  ;;  %2733 = vpow2.f32 %v1467_v63  ;;  %v4938_v21 = vmax.f32 %v4037_v4, %v4041_v3 }
 0x2de   : > { %vm1411_vm15 = vcmp.gt.f32.partialorder %v1407_v1, 0.0  ;;  %v1415_v40 = vmul.f32 0.2, %v1407_v1  ;;  %vm1730_vm0 = vcmp.gt.f32.partialorder %v1726_v26, 0.0  ;;  %v4225_v55 = vmax.f32 %v2069_v52, %v2065_v33 }
 0x2df   : > { %v1734_v28 = vmul.f32 0.2, %v1726_v26  ;;  %2735 = vpow2.f32 %v1774_v41 }
 0x2e0   : > { %v1419_v48 = vsel %vm1411_vm15, %v1407_v1, %v1415_v40  ;;  %v2089_v44 = vsub.f32 %v2040_v12, %v4225_v55  ;;  %v2101_v50 = vsub.f32 %v2065_v33, %v4225_v55  ;;  %2737 = vpow2.f32 %v1786_v17 }
 0x2e1   : > { %v1428_v52 = vsel %vm4135_vm12, %v1419_v48, -1e+30  ;;  %v4238_v2 = vpop.xlane.xlu1 %1348  ;;  %v1339_v27 = vpop.xlane.xlu2 %1338  ;;  %v1738_v32 = vsel %vm1730_vm0, %v1726_v26, %v1734_v28  ;;  %v4939_v26 = vmax.f32 %v4057_v49, %v4061_v0 }
 0x2e2   : > { %v4243_v61 = vmax.f32 %v4938_v21, %v1428_v52  ;;  %v1347_v58 = vpop.xlane.xlu0 %1346  ;;  %v2093_v1 = vmul.f32 1.442695, %v2089_v44  ;;  %v2105_v12 = vmul.f32 1.442695, %v2101_v50  ;;  %v1747_v63 = vsel %vm4139_vm1, %v1738_v32, -1e+30 }
 0x2e3   : > { %v1353_v33 = vsel %vm1206_vm10, %v1339_v27, %v1347_v58  ;;  %v4256_v28 = vmax.f32 %v4939_v26, %v1747_v63  ;;  %v4259_v27 = vpop.eup %2731 }
 0x2e4   : > { %v1452_v40 = vsub.f32 %v4041_v3, %v4243_v61  ;;  %v1464_v48 = vsub.f32 %v1428_v52, %v4243_v61  ;;  %v1995_v22 = vadd.f32 %v1353_v33, %v4026_v24  ;;  %v2020_v41 = vadd.f32 %v1353_v33, %v4031_v54  ;;  %v4264_v21 = vpop.eup %2733 }
 0x2e5   : > { %v2045_v44 = vadd.f32 %v1353_v33, %v1264_v38  ;;  %2739 = vpow2.f32 %v2093_v1  ;;  %v1759_v52 = vsub.f32 %v4057_v49, %v4256_v28  ;;  %v1783_v24 = vsub.f32 %v1747_v63, %v4256_v28  ;;  %v4266_v38 = vpop.eup %2735 }
 0x2e6   : > { %v1457_v3 = vmul.f32 1.442695, %v1452_v40  ;;  %v1469_v50 = vmul.f32 1.442695, %v1464_v48  ;;  %vm1999_vm2 = vcmp.gt.f32.partialorder %v1995_v22, 0.0  ;;  %vm2024_vm3 = vcmp.gt.f32.partialorder %v2020_v41, 0.0 }
 0x2e7   : > { %v2003_v17 = vmul.f32 0.2, %v1995_v22  ;;  %2741 = vpow2.f32 %v2105_v12  ;;  %v2028_v32 = vmul.f32 0.2, %v2020_v41  ;;  %vm2049_vm4 = vcmp.gt.f32.partialorder %v2045_v44, 0.0  ;;  %v4275_v12 = vpop.eup %2737 }
 0x2e8   : > { %v2053_v54 = vmul.f32 0.2, %v2045_v44  ;;  %2743 = vpow2.f32 %v1457_v3  ;;  %v1455_v40 = vmul.f32 1.442695, %v1451_v51  ;;  %v1764_v18 = vmul.f32 1.442695, %v1759_v52 }
 0x2e9   : > { %v2007_v58 = vsel %vm1999_vm2, %v1995_v22, %v2003_v17  ;;  %v1262_v1 = vpop.xlane.xlu2 %1261  ;;  %v1254_v33 = vpop.xlane.xlu1 %1253  ;;  %v2032_v48 = vsel %vm2024_vm3, %v2020_v41, %v2028_v32  ;;  %2745 = vpow2.f32 %v1469_v50  ;;  %v1788_v17 = vmul.f32 1.442695, %v1783_v24 }
 0x2ea   : > { %v4270_v49 = vsel %vm4185_vm13, %v2007_v58, -1e+30  ;;  %v2057_v63 = vsel %vm2049_vm4, %v2045_v44, %v2053_v54  ;;  %v1252_v26 = vpop.xlane.xlu0 %1251  ;;  %v4273_v30 = vsel %vm1206_vm10, %v1254_v33, %v1262_v1  ;;  %v2041_v22 = vsel %vm4189_vm5, %v2032_v48, -1e+30 }
 0x2eb   : > { %v4281_v51 = vsel %vm1206_vm10, %v1252_v26, %v4199_v6  ;;  %v4283_v3 = vpop.eup %2739  ;;  %v2070_v41 = vmax.f32 %v4270_v49, %v2041_v22  ;;  %v2066_v50 = vsel %vm4195_vm8, %v2057_v63, -1e+30  ;;  %v1409_v52 = vadd.f32 %v4113_v7, %v4273_v30 }
 0x2ec   : > { %v1408_v44 = vadd.f32 %v4091_v34, %v4281_v51  ;;  %v1727_v32 = vadd.f32 %v4066_v39, %v4281_v51  ;;  %v1728_v6 = vadd.f32 %v4179_v36, %v4273_v30  ;;  %2747 = vpow2.f32 %v1455_v40 }
 0x2ed   : > { %v4296_v54 = vpop.eup %2741  ;;  %v2074_v24 = vmax.f32 %v2070_v41, %v2066_v50  ;;  %vm1413_vm9 = vcmp.gt.f32.partialorder %v1409_v52, 0.0  ;;  %v1417_v39 = vmul.f32 0.2, %v1409_v52  ;;  %2749 = vpow2.f32 %v1764_v18 }
 0x2ee   : > { %vm1412_vm6 = vcmp.gt.f32.partialorder %v1408_v44, 0.0  ;;  %v1416_v58 = vmul.f32 0.2, %v1408_v44  ;;  %vm1731_vm7 = vcmp.gt.f32.partialorder %v1727_v32, 0.0  ;;  %v4298_v34 = vpop.eup %2743  ;;  %v1735_v1 = vmul.f32 0.2, %v1727_v32 }
 0x2ef   : > { %vm1732_vm11 = vcmp.gt.f32.partialorder %v1728_v6, 0.0  ;;  %v2078_v33 = vsub.f32 %v4270_v49, %v2074_v24  ;;  %v2090_v48 = vsub.f32 %v2041_v22, %v2074_v24  ;;  %v2102_v7 = vsub.f32 %v2066_v50, %v2074_v24  ;;  %v4301_v26 = vpop.eup %2745 }
 0x2f0   : > { %v1420_v63 = vsel %vm1412_vm6, %v1408_v44, %v1416_v58  ;;  %v1739_v40 = vsel %vm1731_vm7, %v1727_v32, %v1735_v1  ;;  %v1421_v41 = vsel %vm1413_vm9, %v1409_v52, %v1417_v39  ;;  %v1736_v19 = vmul.f32 0.2, %v1728_v6 }
 0x2f1   : > { %v4305_v36 = vsel %vm4135_vm12, %v1420_v63, -1e+30  ;;  %v2095_v35 = vmul.f32 1.442695, %v2090_v48  ;;  %v4941_v22 = vsub.f32 %v4014_v14, %v4165_v13  ;;  %2751 = vpow2.f32 %v1788_v17 }
 0x2f2   : > { %v4311_v10 = vmax.f32 %v4940_v57, %v4305_v36  ;;  %v1341_v49 = vpop.xlane.xlu0 %1340  ;;  %v4318_v50 = vpop.eup %2747  ;;  %v1748_v32 = vsel %vm4139_vm1, %v1739_v40, -1e+30  ;;  %v1430_v18 = vsel %vm4135_vm12, %v1421_v41, -1e+30  ;;  %v1740_v52 = vsel %vm1732_vm11, %v1728_v6, %v1736_v19 }
 0x2f3   : > { %v4316_v44 = vmul.f32 1.442695, %v4941_v22  ;;  %v2107_v24 = vmul.f32 1.442695, %v2102_v7  ;;  %v4942_v17 = vmax.f32 %v4083_v37, %v4079_v29  ;;  %v4339_v1 = vmax.f32 %v4943_v42, %v1430_v18 }
 0x2f4   : > { %v1441_v57 = vsub.f32 %v4102_v45, %v4311_v10  ;;  %v1453_v14 = vsub.f32 %v4106_v5, %v4311_v10  ;;  %v1465_v13 = vsub.f32 %v4305_v36, %v4311_v10  ;;  %v4343_v19 = vsel %vm4139_vm1, %v1740_v52, -1e+30  ;;  %v1351_v52 = vpop.xlane.xlu2 %1350 }
 0x2f5   : > { %v4334_v58 = vmax.f32 %v4942_v17, %v1748_v32  ;;  %v1354_v45 = vsel %vm1206_vm10, %v1341_v49, %v4238_v2  ;;  %2753 = vpow2.f32 %v2095_v35  ;;  %v4944_v39 = vmax.f32 %v4203_v53, %v4211_v47  ;;  %v4359_v2 = vpop.eup %2749 }
 0x2f6   : > { %v1447_v5 = vmul.f32 1.442695, %v1441_v57  ;;  %v1459_v6 = vmul.f32 1.442695, %v1453_v14  ;;  %v1454_v20 = vsub.f32 %v4154_v59, %v4339_v1  ;;  %v1466_v40 = vsub.f32 %v1430_v18, %v4339_v1 }
 0x2f7   : > { %v4351_v48 = vmax.f32 %v4944_v39, %v4343_v19  ;;  %v1760_v7 = vsub.f32 %v4083_v37, %v4334_v58  ;;  %v1784_v63 = vsub.f32 %v1748_v32, %v4334_v58  ;;  %2755 = vpow2.f32 %v2107_v24  ;;  %v4367_v37 = vpop.eup %2751  ;;  %v1343_v24 = vpop.xlane.xlu1 %1342 }
 0x2f8   : > { %v1475_v49 = vadd.f32 %v4318_v50, %v4259_v27  ;;  %v4945_v22 = vsub.f32 %v4207_v9, %v4225_v55  ;;  %v4372_v32 = vmul.f32 1.442695, %v2078_v33  ;;  %2757 = vpow2.f32 %v1447_v5 }
 0x2f9   : > { %v1773_v35 = vsub.f32 %v4211_v47, %v4351_v48  ;;  %v1785_v41 = vsub.f32 %v4343_v19, %v4351_v48  ;;  %v1766_v18 = vmul.f32 1.442695, %v1760_v7  ;;  %2759 = vpow2.f32 %v1459_v6 }
 0x2fa   : > { %v2081_v59 = vmul.f32 1.442695, %v4945_v22  ;;  %v1790_v47 = vmul.f32 1.442695, %v1784_v63  ;;  %v1461_v57 = vmul.f32 1.442695, %v1454_v20  ;;  %v4375_v14 = vadd.f32 %v4264_v21, %v1475_v49 }
 0x2fb   : > { %v1473_v17 = vmul.f32 1.442695, %v1466_v40  ;;  %v1996_v42 = vadd.f32 %v1354_v45, %v4071_v25  ;;  %v2021_v39 = vadd.f32 %v1354_v45, %v4046_v23  ;;  %v2046_v9 = vadd.f32 %v1354_v45, %v4281_v51  ;;  %v4380_v55 = vpop.eup %2753 }
 0x2fc   : > { %v1780_v33 = vmul.f32 1.442695, %v1773_v35  ;;  %v1355_v5 = vsel %vm1206_vm10, %v1343_v24, %v1351_v52  ;;  %v1771_v6 = vsub.f32 %v4061_v0, %v4256_v28  ;;  %v1440_v7 = vsub.f32 %v4037_v4, %v4243_v61 }
 0x2fd   : > { %2761 = vpow2.f32 %v1766_v18  ;;  %vm2000_vm12 = vcmp.gt.f32.partialorder %v1996_v42, 0.0  ;;  %v2004_v63 = vmul.f32 0.2, %v1996_v42  ;;  %vm2025_vm1 = vcmp.gt.f32.partialorder %v2021_v39, 0.0  ;;  %v4387_v25 = vpop.eup %2755 }
 0x2fe   : > { %2763 = vpow2.f32 %v1790_v47  ;;  %v2029_v23 = vmul.f32 0.2, %v2021_v39  ;;  %vm2050_vm14 = vcmp.gt.f32.partialorder %v2046_v9, 0.0  ;;  %v2054_v51 = vmul.f32 0.2, %v2046_v9  ;;  %v4389_v45 = vpop.eup %2757 }
 0x2ff   : > { %2765 = vpow2.f32 %v1461_v57  ;;  %v2008_v20 = vsel %vm2000_vm12, %v1996_v42, %v2004_v63  ;;  %v1997_v40 = vadd.f32 %v1355_v5, %v4088_v16  ;;  %v2022_v0 = vadd.f32 %v1355_v5, %v4127_v11  ;;  %v4393_v28 = vpop.eup %2759 }
 0x300   : > { %2767 = vpow2.f32 %v1473_v17  ;;  %v2017_v4 = vsel %vm4185_vm13, %v2008_v20, -1e+30  ;;  %v2033_v61 = vsel %vm2025_vm1, %v2021_v39, %v2029_v23  ;;  %v2058_v35 = vsel %vm2050_vm14, %v2046_v9, %v2054_v51 }
 0x301   : > { %2769 = vrcp.f32 %v4375_v14  ;;  %v4400_v49 = vsel %vm4189_vm5, %v2033_v61, -1e+30  ;;  %v2067_v22 = vsel %vm4195_vm8, %v2058_v35, -1e+30  ;;  %vm2001_vm10 = vcmp.gt.f32.partialorder %v1997_v40, 0.0 }
 0x302   : > { %v2071_v11 = vmax.f32 %v2017_v4, %v4400_v49  ;;  %v2005_v16 = vmul.f32 0.2, %v1997_v40  ;;  %vm2026_vm15 = vcmp.gt.f32.partialorder %v2022_v0, 0.0  ;;  %v2030_v18 = vmul.f32 0.2, %v2022_v0 }
 0x303   : > { %v4405_v52 = vpop.eup %2761  ;;  %v2047_v24 = vadd.f32 %v1355_v5, %v4273_v30  ;;  %2771 = vpow2.f32 %v4316_v44  ;;  %v1776_v47 = vmul.f32 1.442695, %v1771_v6  ;;  %v1445_v57 = vmul.f32 1.442695, %v1440_v7 }
 0x304   : > { %v4409_v17 = vpop.eup %2763  ;;  %v4411_v42 = vmax.f32 %v2071_v11, %v2067_v22  ;;  %v2009_v39 = vsel %vm2001_vm10, %v1997_v40, %v2005_v16  ;;  %v2034_v9 = vsel %vm2026_vm15, %v2022_v0, %v2030_v18  ;;  %2773 = vpow2.f32 %v2081_v59 }
 0x305   : > { %v4413_v63 = vpop.eup %2765  ;;  %v2018_v23 = vsel %vm4185_vm13, %v2009_v39, -1e+30  ;;  %v2043_v51 = vsel %vm4189_vm5, %v2034_v9, -1e+30  ;;  %vm2051_vm0 = vcmp.gt.f32.partialorder %v2047_v24, 0.0  ;;  %2775 = vpow2.f32 %v1776_v47 }
 0x306   : > { %v4419_v30 = vpop.eup %2767  ;;  %v2079_v44 = vsub.f32 %v2017_v4, %v4411_v42  ;;  %v2091_v5 = vsub.f32 %v4400_v49, %v4411_v42  ;;  %v2103_v6 = vsub.f32 %v2067_v22, %v4411_v42  ;;  %v2055_v59 = vmul.f32 0.2, %v2047_v24 }
 0x307   : > { %v2770_v7 = vpop.eup %2769  ;;  %v2072_v20 = vmax.f32 %v2018_v23, %v2043_v51  ;;  %2777 = vpow2.f32 %v4372_v32  ;;  %v1772_v43 = vsub.f32 %v4079_v29, %v4334_v58  ;;  %v1442_v15 = vsub.f32 %v4122_v8, %v4339_v1 }
 0x308   : > { %v1471_v40 = vmul.f32 1.442695, %v1465_v13  ;;  %2779 = vpow2.f32 %v1780_v33  ;;  %v1487_v0 = vmul.f32 %v2770_v7, %v4375_v14  ;;  %v2085_v4 = vmul.f32 1.442695, %v2079_v44 }
 0x309   : > { %v4434_v61 = vpop.eup %2771  ;;  %v2059_v35 = vsel %vm2051_vm0, %v2047_v24, %v2055_v59  ;;  %2781 = vpow2.f32 %v1445_v57  ;;  %v2109_v29 = vmul.f32 1.442695, %v2103_v6  ;;  %v1477_v1 = vadd.f32 %v4393_v28, %v4389_v45 }
 0x30a   : > { %v4437_v32 = vpop.eup %2773  ;;  %v1491_v49 = vsub.f32 2.0, %v1487_v0  ;;  %v2068_v8 = vsel %vm4195_vm8, %v2059_v35, -1e+30  ;;  %v1794_v10 = vadd.f32 %v4434_v61, %v4266_v38  ;;  %2783 = vpow2.f32 %v2085_v4 }
 0x30b   : > { %v4443_v36 = vpop.eup %2775  ;;  %v2076_v13 = vmax.f32 %v2072_v20, %v2068_v8  ;;  %v2113_v58 = vadd.f32 %v4437_v32, %v4283_v3  ;;  %2785 = vpow2.f32 %v1471_v40  ;;  %v1778_v0 = vmul.f32 1.442695, %v1772_v43 }
 0x30c   : > { %v1495_v14 = vmul.f32 %v2770_v7, %v1491_v49  ;;  %v1798_v33 = vadd.f32 %v4275_v12, %v1794_v10  ;;  %v1795_v31 = vadd.f32 %v4443_v36, %v4359_v2  ;;  %v2097_v35 = vmul.f32 1.442695, %v2091_v5 }
 0x30d   : > { %v4452_v22 = vpop.eup %2777  ;;  %v2080_v11 = vsub.f32 %v2018_v23, %v2076_v13  ;;  %v2092_v16 = vsub.f32 %v2043_v51, %v2076_v13  ;;  %v2104_v18 = vsub.f32 %v2068_v8, %v2076_v13  ;;  %v2117_v24 = vadd.f32 %v4296_v54, %v2113_v58 }
 0x30e   : > { %v4455_v47 = vpop.eup %2779  ;;  %v1551_v57 = vmul.f32 %v4318_v50, %v1495_v14  ;;  %v1499_v42 = vmul.f32 %v4259_v27, %v1495_v14  ;;  %v1607_v39 = vmul.f32 %v4264_v21, %v1495_v14  ;;  %2787 = vrcp.f32 %v1798_v33 }
 0x30f   : > { %v4460_v9 = vpop.eup %2781  ;;  %2789 = vpow2.f32 %v2109_v29  ;;  %v2087_v44 = vmul.f32 1.442695, %v2080_v11  ;;  %v2099_v6 = vmul.f32 1.442695, %v2092_v16  ;;  %v1799_v23 = vadd.f32 %v4367_v37, %v1795_v31 }
 0x310   : > { %1557 = vperm.xlu2 %2711, %v1551_v57   ;;  %1505 = vperm.xlu0 %2709, %v1499_v42   ;;  %2791 = vrcp.f32 %v2117_v24  ;;  %v2114_v51 = vadd.f32 %v4452_v22, %v4380_v55  ;;  %v1476_v50 = vadd.f32 %v4460_v9, %v4298_v34  ;;  %v1761_v27 = vsub.f32 %v4203_v53, %v4351_v48  ;;  %v4469_v21 = vpop.eup %2783 }
 0x311   : > { %1528 = vperm.xlu1 %2710, %v1499_v42   ;;  %2793 = vpow2.f32 %v2087_v44  ;;  %v4471_v59 = vpop.eup %2785  ;;  %v1449_v29 = vmul.f32 1.442695, %v1442_v15  ;;  %v4946_v43 = vmov 1  }
 0x312   : > { %2795 = vpow2.f32 %v2099_v6  ;;  %v2118_v7 = vadd.f32 %v4387_v25, %v2114_v51  ;;  %v1480_v20 = vadd.f32 %v4301_v26, %v1476_v50  ;;  %v1481_v40 = vadd.f32 %v4471_v59, %v1477_v1 }
 0x313   : > { %2797 = vrcp.f32 %v1799_v23  ;;  %v1768_v10 = vmul.f32 1.442695, %v1761_v27  ;;  %v2111_v1 = vmul.f32 1.442695, %v2104_v18 }
 0x314   : > { %v2788_v4 = vpop.eup %2787  ;;  %2799 = vrcp.f32 %v2118_v7 }
 0x315   : > { %v4476_v49 = vpop.eup %2789  ;;  %v1806_v53 = vmul.f32 %v2788_v4, %v1798_v33  ;;  %2801 = vrcp.f32 %v1480_v20 }
 0x316   : > { %v2792_v8 = vpop.eup %2791  ;;  %2803 = vrcp.f32 %v1481_v40 }
 0x317   : > { %v4478_v13 = vpop.eup %2793  ;;  %v1810_v58 = vsub.f32 2.0, %v1806_v53  ;;  %v2125_v14 = vmul.f32 %v2792_v8, %v2117_v24  ;;  %2805 = vpow2.f32 %v1778_v0  ;;  %v1792_v24 = vmul.f32 1.442695, %v1785_v41 }
 0x318   : > { %v4480_v31 = vpop.eup %2795  ;;  %1613 = vperm.xlu2 %2711, %v1607_v39   ;;  %2712 = vset.pattern.permute.xlu0 %v4946_v43  ;;  %2807 = vpow2.f32 %v2097_v35 }
 0x319   : > { %v2798_v5 = vpop.eup %2797  ;;  %1636 = vperm.xlu1 %2710, %v1607_v39   ;;  %1580 = vperm.xlu0 %2712, %v1551_v57   ;;  %v1814_v33 = vmul.f32 %v2788_v4, %v1810_v58  ;;  %v2129_v15 = vsub.f32 2.0, %v2125_v14  ;;  %2809 = vpow2.f32 %v1449_v29  ;;  %v2116_v11 = vadd.f32 %v4480_v31, %v4478_v13 }
 0x31a   : > { %v2800_v16 = vpop.eup %2799  ;;  %v1807_v42 = vmul.f32 %v2798_v5, %v1799_v23  ;;  %2811 = vpow2.f32 %v1768_v10 }
 0x31b   : > { %v2802_v18 = vpop.eup %2801  ;;  %v1818_v44 = vmul.f32 %v4434_v61, %v1814_v33  ;;  %v1870_v6 = vmul.f32 %v4266_v38, %v1814_v33  ;;  %v4491_v57 = vmul.f32 %v4275_v12, %v1814_v33  ;;  %v2133_v39 = vmul.f32 %v2792_v8, %v2129_v15 }
 0x31c   : > { %v2804_v51 = vpop.eup %2803  ;;  %v1811_v50 = vsub.f32 2.0, %v1807_v42  ;;  %v2126_v27 = vmul.f32 %v2800_v16, %v2118_v7  ;;  %v1488_v0 = vmul.f32 %v2802_v18, %v1480_v20  ;;  %2813 = vpow2.f32 %v2111_v1 }
 0x31d   : > { %v4493_v4 = vpop.eup %2805  ;;  %v4496_v19 = vmul.f32 %v4437_v32, %v2133_v39  ;;  %v4499_v48 = vmul.f32 %v4283_v3, %v2133_v39  ;;  %v4502_v41 = vmul.f32 %v4296_v54, %v2133_v39  ;;  %v1489_v38 = vmul.f32 %v2804_v51, %v1481_v40 }
 0x31e   : > { %v4504_v12 = vpop.eup %2807  ;;  %v1815_v61 = vmul.f32 %v2798_v5, %v1811_v50  ;;  %v2130_v23 = vsub.f32 2.0, %v2126_v27  ;;  %v1492_v35 = vsub.f32 2.0, %v1488_v0  ;;  %v1796_v7 = vadd.f32 %v4493_v4, %v4405_v52 }
 0x31f   : > { %v4508_v20 = vpop.eup %2809  ;;  %2815 = vpow2.f32 %v1792_v24  ;;  %v1493_v32 = vsub.f32 2.0, %v1489_v38  ;;  %v2115_v3 = vadd.f32 %v4504_v12, %v4469_v21 }
 0x320   : > { %v4512_v53 = vpop.eup %2811  ;;  %1824 = vperm.xlu2 %2711, %v1818_v44   ;;  %v4515_v54 = vmul.f32 %v4443_v36, %v1815_v61  ;;  %v4518_v40 = vmul.f32 %v4367_v37, %v1815_v61  ;;  %v2134_v29 = vmul.f32 %v2800_v16, %v2130_v23  ;;  %v1496_v8 = vmul.f32 %v2802_v18, %v1492_v35 }
 0x321   : > { %1899 = vperm.xlu1 %2710, %v1870_v6   ;;  %1847 = vperm.xlu0 %2712, %v1818_v44   ;;  %v1497_v10 = vmul.f32 %v2804_v51, %v1493_v32  ;;  %v1800_v58 = vadd.f32 %v4409_v17, %v1796_v7  ;;  %v2119_v14 = vadd.f32 %v4476_v49, %v2115_v3  ;;  %v4947_v3 = vmov 0  }
 0x322   : > { %v2814_v1 = vpop.eup %2813  ;;  %v4523_v5 = vmul.f32 %v4452_v22, %v2134_v29  ;;  %v4526_v33 = vmul.f32 %v4380_v55, %v2134_v29  ;;  %v4529_v36 = vmul.f32 %v4460_v9, %v1496_v8  ;;  %v4532_v37 = vmul.f32 %v4298_v34, %v1496_v8 }
 0x323   : > { %v4535_v15 = vmul.f32 %v4471_v59, %v1497_v10  ;;  %2817 = vrcp.f32 %v1800_v58  ;;  %v4538_v16 = vmul.f32 %v4301_v26, %v1496_v8  ;;  %v4541_v24 = vmul.f32 %v4359_v2, %v1815_v61 }
 0x324   : > { %2819 = vrcp.f32 %v2119_v14  ;;  %v1478_v55 = vadd.f32 %v4508_v20, %v4413_v63  ;;  %v4546_v22 = vmul.f32 %v4387_v25, %v2134_v29  ;;  %v4549_v34 = vmul.f32 %v4389_v45, %v1497_v10 }
 0x325   : > { %v2816_v9 = vpop.eup %2815  ;;  %v1797_v59 = vadd.f32 %v4512_v53, %v4455_v47  ;;  %v4554_v26 = vmul.f32 %v4393_v28, %v1497_v10  ;;  %v2120_v42 = vadd.f32 %v2814_v1, %v2116_v11 }
 0x326   : > { %v1482_v2 = vadd.f32 %v4419_v30, %v1478_v55 }
 0x327   : > { %v1801_v18 = vadd.f32 %v2816_v9, %v1797_v59  ;;  %2821 = vrcp.f32 %v2120_v42 }
 0x328   : > { %1876 = vperm.xlu2 %2711, %v1870_v6   ;;  %2823 = vrcp.f32 %v1482_v2 }
 0x329   : > { %v2818_v44 = vpop.eup %2817  ;;  %1955 = vperm.xlu1 %2710, %v4491_v57   ;;  %1903 = vperm.xlu0 %2712, %v4515_v54   ;;  %2825 = vrcp.f32 %v1801_v18 }
 0x32a   : > { %v2820_v25 = vpop.eup %2819  ;;  %v1808_v45 = vmul.f32 %v2818_v44, %v1800_v58 }
 0x32b   : > { %v2127_v39 = vmul.f32 %v2820_v25, %v2119_v14 }
 0x32c   : > { %v1812_v51 = vsub.f32 2.0, %v1808_v45  ;;  %v2317_v45 = vld [vmem:[#allocation8 + $0x20] sm:$0xff] }
 0x32d   : > { %v2822_v50 = vpop.eup %2821  ;;  %v2131_v28 = vsub.f32 2.0, %v2127_v39  ;;  %v2339_v39 = vld [vmem:[#allocation8 + $0xd0] sm:$0xff] }
 0x32e   : > { %v2824_v27 = vpop.eup %2823  ;;  %v1816_v11 = vmul.f32 %v2818_v44, %v1812_v51  ;;  %v2128_v0 = vmul.f32 %v2822_v50, %v2120_v42  ;;  %v2341_v44 = vld [vmem:[#allocation8 + $0xe0] sm:$0xff]  ;;  %v2338_v51 = vld [vmem:[#allocation8 + $0xc8] sm:$0xff] }
 0x32f   : > { %v2826_v38 = vpop.eup %2825  ;;  %v2135_v61 = vmul.f32 %v2820_v25, %v2131_v28  ;;  %v1490_v23 = vmul.f32 %v2824_v27, %v1482_v2  ;;  %v2340_v25 = vld [vmem:[#allocation8 + $0xd8] sm:$0xff]  ;;  %v2337_v28 = vld [vmem:[#allocation8 + $0xc0] sm:$0xff] }
 0x330   : > { %1932 = vperm.xlu2 %2711, %v4491_v57   ;;  %v4561_v6 = vmul.f32 %v4493_v4, %v1816_v11  ;;  %v1809_v35 = vmul.f32 %v2826_v38, %v1801_v18  ;;  %v2132_v7 = vsub.f32 2.0, %v2128_v0  ;;  %v4564_v32 = vmul.f32 %v4405_v52, %v1816_v11  ;;  %v2319_v18 = vld [vmem:[#allocation8 + $0x30] sm:$0xff] }
 0x331   : > { %2166 = vperm.xlu1 %2710, %v4496_v19   ;;  %2715 = vset.pattern.permute.xlu0 %v4947_v3  ;;  %v4569_v29 = vmul.f32 %v4504_v12, %v2135_v61  ;;  %v4572_v8 = vmul.f32 %v4476_v49, %v2135_v61  ;;  %v1494_v10 = vsub.f32 2.0, %v1490_v23  ;;  %v4575_v57 = vmul.f32 %v4409_v17, %v1816_v11  ;;  %v2313_v11 = vld [vmem:[#allocation8] sm:$0xff]  ;;  %v2335_v0 = vld [vmem:[#allocation8 + $0xb0] sm:$0xff] }
 0x332   : > { %1937 = vperm.xlu0 %2715, %v4518_v40   ;;  %v1813_v4 = vsub.f32 2.0, %v1809_v35  ;;  %v2136_v58 = vmul.f32 %v2822_v50, %v2132_v7  ;;  %v4579_v52 = vmul.f32 %v4469_v21, %v2135_v61  ;;  %v2315_v50 = vld [vmem:[#allocation8 + $0x10] sm:$0xff]  ;;  %v2334_v35 = vld [vmem:[#allocation8 + $0xa8] sm:$0xff]  ;;  %v2333_v7 = vld [vmem:[#allocation8 + $0xa0] sm:$0xff] }
 0x333   : > { %v1498_v14 = vmul.f32 %v2824_v27, %v1494_v10  ;;  %v2314_v27 = vld [vmem:[#allocation8 + $0x8] sm:$0xff]  ;;  %v2418_v10 = vld [vmem:[#allocation8 + $0x178] sm:$0xff] }
 0x334   : > { %v1817_v55 = vmul.f32 %v2826_v38, %v1813_v4  ;;  %v4581_v59 = vmul.f32 %v2814_v1, %v2136_v58  ;;  %v4584_v12 = vmul.f32 %v4478_v13, %v2136_v58  ;;  %v4587_v49 = vmul.f32 %v4480_v31, %v2136_v58  ;;  %v2325_v31 = vld [vmem:[#allocation8 + $0x60] sm:$0xff]  ;;  %v2332_v4 = vld [vmem:[#allocation8 + $0x98] sm:$0xff]  ;;  %2419 = vmatpush.msrb.mxu0 %v2418_v10  ;;  %v2417_v58 = vld [vmem:[#allocation8 + $0x170] sm:$0xff] }
 0x335   : > { %v4590_v17 = vmul.f32 %v4508_v20, %v1498_v14  ;;  %v4593_v42 = vmul.f32 %v4413_v63, %v1498_v14  ;;  %v4596_v2 = vmul.f32 %v4419_v30, %v1498_v14  ;;  %v2328_v63 = vld [vmem:[#allocation8 + $0x78] sm:$0xff]  ;;  %v2327_v30 = vld [vmem:[#allocation8 + $0x70] sm:$0xff]  ;;  %v2416_v14 = vld [vmem:[#allocation8 + $0x168] sm:$0xff] }
 0x336   : > { %v4599_v21 = vmul.f32 %v4512_v53, %v1817_v55  ;;  %v4602_v1 = vmul.f32 %v4455_v47, %v1817_v55  ;;  %v4604_v13 = vmul.f32 %v2816_v9, %v1817_v55  ;;  %2374 = vmatpush.msrb.mxu3 %v2328_v63  ;;  %v2326_v47 = vld [vmem:[#allocation8 + $0x68] sm:$0xff]  ;;  %v2343_v20 = vld [vmem:[#allocation8 + $0xf0] sm:$0xff]  ;;  %2420 = vmatpush.msrb.mxu0 %v2417_v58  ;;  %v2415_v55 = vld [vmem:[#allocation8 + $0x160] sm:$0xff] }
 0x337   : > { %v2322_v53 = vld [vmem:[#allocation8 + $0x48] sm:$0xff] }
 0x338   : > { %2143 = vperm.xlu2 %2711, %v4496_v19   ;;  %2375 = vmatpush.msrb.mxu3 %v2327_v30  ;;  %v2324_v19 = vld [vmem:[#allocation8 + $0x58] sm:$0xff] }
 0x339   : > { %2218 = vperm.xlu1 %2710, %v4499_v48   ;;  %2421 = vmatpush.msrb.mxu0 %v2416_v14 }
 0x33a   : > { %2148 = vperm.xlu0 %2715, %v4523_v5   ;;  %2376 = vmatpush.msrb.mxu3 %v2326_v47 }
 0x33b   : > { %2422 = vmatpush.msrb.mxu0 %v2415_v55 }
 0x33c   : > { %2377 = vmatpush.msrb.mxu3 %v2325_v31  ;;  %v2330_v31 = vld [vmem:[#allocation8 + $0x88] sm:$0xff] }
 0x33e   : > { %2378 = vmatpush.msrb.mxu3 %v2324_v19 }
 0x340   : > { %2195 = vperm.xlu2 %2711, %v4499_v48   ;;  %v2323_v48 = vld [vmem:[#allocation8 + $0x50] sm:$0xff] }
 0x341   : > { %2713 = vset.pattern.permute.xlu1 %v4947_v3  ;;  %2379 = vmatpush.msrb.mxu3 %v2323_v48 }
 0x342   : > { %2251 = vperm.xlu1 %2713, %v4502_v41   ;;  %2716 = vset.pattern.permute.xlu0 %v4946_v43 }
 0x343   : > { %2222 = vperm.xlu0 %2716, %v4526_v33   ;;  %2380 = vmatpush.msrb.mxu3 %v2322_v53 }
 0x348   : > { %2714 = vset.pattern.permute.xlu2 %v4946_v43 }
 0x349   : > { %2274 = vperm.xlu2 %2714, %v4502_v41   ;;  %v2344_v41 = vld [vmem:[#allocation8 + $0xf8] sm:$0xff] }
 0x34a   : > { %1510 = vperm.xlu1 %2713, %v4529_v36   ;;  %2345 = vmatpush.msrb.mxu2 %v2344_v41  ;;  %v2414_v41 = vld [vmem:[#allocation8 + $0x158] sm:$0xff] }
 0x34b   : > { %2719 = vset.pattern.permute.xlu0 %v4947_v3  ;;  %2423 = vmatpush.msrb.mxu0 %v2414_v41 }
 0x34c   : > { %1623 = vperm.xlu0 %2719, %v4535_v15   ;;  %2346 = vmatpush.msrb.mxu2 %v2343_v20 }
 0x351   : > { %1532 = vperm.xlu2 %2714, %v4529_v36  }
 0x352   : > { %1562 = vperm.xlu1 %2713, %v4532_v37  }
 0x354   : > { %1886 = vperm.xlu0 %2719, %v4561_v6  }
 0x359   : > { %1584 = vperm.xlu2 %2714, %v4532_v37   ;;  %v2321_v37 = vld [vmem:[#allocation8 + $0x40] sm:$0xff] }
 0x35a   : > { %1618 = vperm.xlu1 %2713, %v4538_v16   ;;  %2381 = vmatpush.msrb.mxu3 %v2321_v37  ;;  %v4948_v37 = vld [vmem:[#allocation15_spill] sm:$0xff] }
 0x35c   : > { %2205 = vperm.xlu0 %2719, %v4569_v29  }
 0x361   : > { %1640 = vperm.xlu2 %2714, %v4538_v16   ;;  %v2320_v16 = vld [vmem:[#allocation8 + $0x38] sm:$0xff] }
 0x362   : > { %1829 = vperm.xlu1 %2713, %v4541_v24   ;;  %2382 = vmatpush.msrb.mxu3 %v2320_v16 }
 0x364   : > { %2722 = vset.pattern.permute.xlu0 %v4946_v43  ;;  %2383 = vmatpush.msrb.mxu3 %v2319_v18 }
 0x365   : > { %2282 = vperm.xlu0 %2722, %v4572_v8  }
 0x369   : > { %1851 = vperm.xlu2 %2714, %v4541_v24   ;;  %v2342_v24 = vld [vmem:[#allocation8 + $0xe8] sm:$0xff] }
 0x36a   : > { %1881 = vperm.xlu1 %2713, %v4515_v54   ;;  %v4631_v36 = vpop.permute.xlu2 %1557  ;;  %2347 = vmatpush.msrb.mxu2 %v2342_v24  ;;  %v2318_v54 = vld [vmem:[#allocation8 + $0x28] sm:$0xff]  ;;  %v2329_v24 = vld [vmem:[#allocation8 + $0x80] sm:$0xff] }
 0x36b   : > { %2384 = vmatpush.msrb.mxu3 %v2318_v54  ;;  %v1575_v20 = vmul.f32 %v4631_v36, %v3832_v62  ;;  %v2412_v36 = vld [vmem:[#allocation8 + $0x148] sm:$0xff] }
 0x36c   : > { %2348 = vmatpush.msrb.mxu2 %v2341_v44 }
 0x36d   : > { %1540 = vperm.xlu0 %2722, %v4590_v17   ;;  %2385 = vmatpush.msrb.mxu3 %v2317_v45 }
 0x36e   : > { %2349 = vmatpush.msrb.mxu2 %v2340_v25 }
 0x370   : > { %2350 = vmatpush.msrb.mxu2 %v2339_v39  ;;  %v2413_v39 = vld [vmem:[#allocation8 + $0x150] sm:$0xff] }
 0x371   : > { %1959 = vperm.xlu2 %2714, %v4518_v40   ;;  %v2316_v40 = vld [vmem:[#allocation8 + $0x18] sm:$0xff]  ;;  %2424 = vmatpush.msrb.mxu0 %v2413_v39 }
 0x372   : > { %2200 = vperm.xlu1 %2713, %v4526_v33   ;;  %v4636_v9 = vpop.permute.xlu2 %1613  ;;  %2386 = vmatpush.msrb.mxu3 %v2316_v40 }
 0x373   : > { %2351 = vmatpush.msrb.mxu2 %v2338_v51  ;;  %2425 = vmatpush.msrb.mxu0 %v2412_v36 }
 0x374   : > { %2387 = vmatpush.msrb.mxu3 %v2315_v50  ;;  %v2411_v50 = vld [vmem:[#allocation8 + $0x140] sm:$0xff] }
 0x375   : > { %1592 = vperm.xlu0 %2722, %v4593_v42   ;;  %2352 = vmatpush.msrb.mxu2 %v2337_v28 }
 0x376   : > { %2388 = vmatpush.msrb.mxu3 %v2314_v27  ;;  %2426 = vmatpush.msrb.mxu0 %v2411_v50 }
 0x378   : > { %2389 = vmatpush.msrb.mxu3 %v2313_v11  ;;  %v2410_v11 = vld [vmem:[#allocation8 + $0x138] sm:$0xff] }
 0x379   : > { %2170 = vperm.xlu2 %2714, %v4523_v5   ;;  %v2336_v5 = vld [vmem:[#allocation8 + $0xb8] sm:$0xff]  ;;  %2427 = vmatpush.msrb.mxu0 %v2410_v11 }
 0x37a   : > { %2718 = vset.pattern.permute.xlu1 %v4946_v43  ;;  %v4641_v33 = vpop.permute.xlu2 %1824  ;;  %2353 = vmatpush.msrb.mxu2 %v2336_v5 }
 0x37b   : > { %2278 = vperm.xlu1 %2718, %v4546_v22  }
 0x37c   : > { %2354 = vmatpush.msrb.mxu2 %v2335_v0 }
 0x37d   : > { %1648 = vperm.xlu0 %2722, %v4596_v2  }
 0x37e   : > { %2355 = vmatpush.msrb.mxu2 %v2334_v35 }
 0x380   : > { %2356 = vmatpush.msrb.mxu2 %v2333_v7 }
 0x381   : > { %2717 = vset.pattern.permute.xlu2 %v4947_v3 }
 0x382   : > { %2256 = vperm.xlu2 %2717, %v4546_v22   ;;  %v4647_v38 = vpop.permute.xlu2 %1876  ;;  %v1506_v61 = vpop.permute.xlu0 %1505  ;;  %v2331_v22 = vld [vmem:[#allocation8 + $0x90] sm:$0xff]  ;;  %2357 = vmatpush.msrb.mxu2 %v2332_v4 }
 0x383   : > { %1536 = vperm.xlu1 %2718, %v4549_v34   ;;  %v1529_v23 = vpop.permute.xlu1 %1528  ;;  %v1523_v63 = vmul.f32 %v1506_v61, %v3820_v60  ;;  %v1894_v35 = vmul.f32 %v4647_v38, %v3832_v62  ;;  %v2406_v38 = vld [vmem:[#allocation8 + $0x118] sm:$0xff] }
 0x384   : > { %v1543_v30 = vmul.f32 %v1529_v23, %v3822_v46  ;;  %2358 = vmatpush.msrb.mxu2 %v2331_v22  ;;  %v2409_v23 = vld [vmem:[#allocation8 + $0x130] sm:$0xff] }
 0x385   : > { %1859 = vperm.xlu0 %2722, %v4599_v21   ;;  %2428 = vmatpush.msrb.mxu0 %v2409_v23  ;;  %v4952_v23 = vld [vmem:[#allocation16_spill] sm:$0xff] }
 0x386   : > { %2359 = vmatpush.msrb.mxu2 %v2330_v31  ;;  %v1547_v44 = vadd.f32 %v1543_v30, %v1523_v63  ;;  %v2408_v63 = vld [vmem:[#allocation8 + $0x128] sm:$0xff] }
 0x387   : > { %2429 = vmatpush.msrb.mxu0 %v2408_v63 }
 0x388   : > { %2360 = vmatpush.msrb.mxu2 %v2329_v24 }
 0x38a   : > { %v1933_v47 = vpop.permute.xlu2 %1932  ;;  %1515 = vperm.xlu2 %2717, %v4549_v34   ;;  %v4949_v34 = vld [vmem:[#allocation27_spill] sm:$0xff] }
 0x38b   : > { %1588 = vperm.xlu1 %2718, %v4554_v26   ;;  %v1637_v19 = vpop.permute.xlu1 %1636  ;;  %v1581_v48 = vpop.permute.xlu0 %1580  ;;  %v1631_v18 = vmul.f32 %v4636_v9, %v4949_v34  ;;  %v4666_v9 = vld [vmem:[#allocation5 + $0x213] ss:$0 sm:$0xff]  ;;  %v1950_v22 = vmul.f32 %v1933_v47, %v4949_v34 }
 0x38c   : > { %v1651_v53 = vmul.f32 %v1637_v19, %v3910_v56  ;;  %v1595_v16 = vmul.f32 %v1581_v48, %v4948_v37  ;;  %v2405_v48 = vld [vmem:[#allocation8 + $0x110] sm:$0xff] }
 0x38d   : > { %1911 = vperm.xlu0 %2722, %v4602_v1  }
 0x38e   : > { %v1599_v54 = vadd.f32 %v1595_v16, %v1575_v20  ;;  %v1655_v25 = vadd.f32 %v1651_v53, %v1631_v18  ;;  %v2404_v20 = vld [vmem:[#allocation8 + $0x108] sm:$0xff]  ;;  %v2403_v16 = vld [vmem:[#allocation8 + $0x100] sm:$0xff] }
 0x390   : > { %v1603_v45 = vadd.f32 %v1599_v54, %v1547_v44 }
 0x392   : > { %v1659_v40 = vadd.f32 %v1655_v25, %v1603_v45  ;;  %v4662_v51 = vpop.permute.xlu2 %2143  ;;  %1567 = vperm.xlu2 %2717, %v4554_v26  }
 0x393   : > { %1644 = vperm.xlu1 %2718, %v4535_v15   ;;  %v1900_v28 = vpop.permute.xlu1 %1899  ;;  %v1848_v27 = vpop.permute.xlu0 %1847  ;;  %v1842_v15 = vmul.f32 %v4641_v33, %v3820_v60  ;;  %v2407_v33 = vld [vmem:[#allocation8 + $0x120] sm:$0xff]  ;;  %v2161_v45 = vmul.f32 %v4662_v51, %v3820_v60  ;;  %v4950_v51 = vld [vmem:[#allocation19_spill] sm:$0xff] }
 0x394   : > { %v1663_v5 = vmul.f32 0.5, %v1659_v40  ;;  %v1914_v0 = vmul.f32 %v1900_v28, %v4948_v37  ;;  %v1862_v61 = vmul.f32 %v1848_v27, %v3822_v46  ;;  %2430 = vmatpush.msrb.mxu0 %v2407_v33 }
 0x395   : > { %2727 = vset.pattern.permute.xlu0 %v4947_v3 }
 0x396   : > { %2266 = vperm.xlu0 %2727, %v4581_v59   ;;  %v1667_v26 = vadd.f32 %v1663_v5, %v4666_v9  ;;  %v1918_v10 = vadd.f32 %v1914_v0, %v1894_v35  ;;  %v1866_v4 = vadd.f32 %v1862_v61, %v1842_v15  ;;  %2431 = vmatpush.msrb.mxu0 %v2406_v38  ;;  %v4951_v61 = vld [vmem:[#allocation17_spill] sm:$0xff]  ;;  %v4953_v15 = vld [vmem:[#allocation18_spill] sm:$0xff] }
 0x398   : > { %v1671_v7 = vmax.f32 %v1667_v26, 0.0  ;;  %v1922_v30 = vadd.f32 %v1918_v10, %v1866_v4  ;;  %2432 = vmatpush.msrb.mxu0 %v2405_v48 }
 0x39a   : > { %v2196_v58 = vpop.permute.xlu2 %2195  ;;  %1834 = vperm.xlu2 %2717, %v4564_v32   ;;  %2390 = vmatmul.f32.vlgmr.msrb.gmra.mxu3 %v1671_v7 }
 0x39b   : > { %1855 = vperm.xlu1 %2718, %v4564_v32   ;;  %v1956_v14 = vpop.permute.xlu1 %1955  ;;  %2433 = vmatpush.msrb.mxu0 %v2404_v20  ;;  %v1904_v0 = vpop.permute.xlu0 %1903 }
 0x39c   : > { %v1970_v55 = vmul.f32 %v1956_v14, %v3910_v56  ;;  %v1915_v48 = vmul.f32 %v1904_v0, %v4951_v61 }
 0x39d   : > { %2434 = vmatpush.msrb.mxu0 %v2403_v16 }
 0x39e   : > { %v1974_v31 = vadd.f32 %v1970_v55, %v1950_v22  ;;  %2729 = vset.pattern.permute.xlu0 %v4946_v43 }
 0x3a0   : > { %v1978_v19 = vadd.f32 %v1974_v31, %v1922_v30 }
 0x3a2   : > { %v1982_v41 = vmul.f32 0.5, %v1978_v19  ;;  %1942 = vperm.xlu2 %2717, %v4575_v57  }
 0x3a3   : > { %1907 = vperm.xlu1 %2718, %v4561_v6   ;;  %v2167_v32 = vpop.permute.xlu1 %2166  ;;  %v2275_v47 = vpop.permute.xlu2 %2274  ;;  %v2213_v6 = vmul.f32 %v2196_v58, %v3832_v62 }
 0x3a4   : > { %v1986_v53 = vadd.f32 %v1982_v41, %v4666_v9  ;;  %v2181_v25 = vmul.f32 %v2167_v32, %v3822_v46  ;;  %v2289_v50 = vmul.f32 %v2275_v47, %v3910_v56  ;;  %v1938_v33 = vpop.permute.xlu0 %1937 }
 0x3a6   : > { %v1990_v24 = vmax.f32 %v1986_v53, 0.0  ;;  %v2185_v40 = vadd.f32 %v2181_v25, %v2161_v45 }
 0x3a8   : > { %2361 = vmatmul.f32.vlgmr.msrb.gmra.mxu2 %v1990_v24 }
 0x3aa   : > { %2153 = vperm.xlu2 %2717, %v4579_v52  }
 0x3ab   : > { %1963 = vperm.xlu1 %2718, %v4575_v57   ;;  %v2219_v18 = vpop.permute.xlu1 %2218  ;;  %v1533_v44 = vpop.permute.xlu2 %1532 }
 0x3ac   : > { %v2233_v54 = vmul.f32 %v2219_v18, %v4948_v37  ;;  %v1544_v35 = vmul.f32 %v1533_v44, %v4953_v15  ;;  %v2149_v47 = vpop.permute.xlu0 %2148 }
 0x3ae   : > { %v2237_v39 = vadd.f32 %v2233_v54, %v2213_v6 }
 0x3b0   : > { %v2241_v62 = vadd.f32 %v2237_v39, %v2185_v40 }
 0x3b2   : > { %2720 = vset.pattern.permute.xlu2 %v4946_v43 }
 0x3b3   : > { %2174 = vperm.xlu1 %2718, %v4579_v52   ;;  %v1585_v36 = vpop.permute.xlu2 %1584  ;;  %2226 = vperm.xlu2 %2720, %v4569_v29  }
 0x3b4   : > { %v2252_v57 = vpop.permute.xlu1 %2251  ;;  %v1596_v26 = vmul.f32 %v1585_v36, %v4951_v61 }
 0x3b5   : > { %v2269_v37 = vmul.f32 %v2252_v57, %v4949_v34  ;;  %v2223_v36 = vpop.permute.xlu0 %2222 }
 0x3b6   : > { %v2234_v40 = vmul.f32 %v2223_v36, %v4951_v61 }
 0x3b7   : > { %v2293_v28 = vadd.f32 %v2289_v50, %v2269_v37  ;;  %v2162_v37 = vmul.f32 %v2149_v47, %v4952_v23 }
 0x3b9   : > { %v2297_v46 = vadd.f32 %v2293_v28, %v2241_v62 }
 0x3bb   : > { %v2301_v27 = vmul.f32 0.5, %v2297_v46  ;;  %2721 = vset.pattern.permute.xlu1 %v4947_v3  ;;  %v1641_v5 = vpop.permute.xlu2 %1640  ;;  %2723 = vset.pattern.permute.xlu2 %v4947_v3 }
 0x3bc   : > { %2261 = vperm.xlu1 %2721, %v4572_v8   ;;  %v1511_v60 = vpop.permute.xlu1 %1510  ;;  %1520 = vperm.xlu2 %2723, %v4590_v17  }
 0x3bd   : > { %v2305_v29 = vadd.f32 %v2301_v27, %v4666_v9  ;;  %v1524_v8 = vmul.f32 %v1511_v60, %v4952_v23 }
 0x3bf   : > { %v2309_v52 = vmax.f32 %v2305_v29, 0.0  ;;  %v1548_v58 = vadd.f32 %v1544_v35, %v1524_v8 }
 0x3c1   : > { %2435 = vmatmul.f32.vlgmr.msrb.gmra.mxu0 %v2309_v52  ;;  %v1624_v52 = vpop.permute.xlu0 %1623 }
 0x3c3   : > { %v1852_v56 = vpop.permute.xlu2 %1851 }
 0x3c4   : > { %1572 = vperm.xlu1 %2721, %v4593_v42   ;;  %v1563_v34 = vpop.permute.xlu1 %1562  ;;  %1628 = vperm.xlu2 %2723, %v4596_v2   ;;  %v4954_v42 = vld [vmem:[#allocation29_spill] sm:$0xff]  ;;  %v4955_v2 = vld [vmem:[#allocation30_spill] sm:$0xff]  ;;  %v1863_v20 = vmul.f32 %v1852_v56, %v4953_v15 }
 0x3c5   : > { %v1576_v11 = vmul.f32 %v1563_v34, %v4950_v51  ;;  %v1652_v4 = vmul.f32 %v1641_v5, %v4954_v42 }
 0x3c7   : > { %v1600_v17 = vadd.f32 %v1596_v26, %v1576_v11 }
 0x3c9   : > { %v1604_v22 = vadd.f32 %v1600_v17, %v1548_v58  ;;  %v1887_v26 = vpop.permute.xlu0 %1886  ;;  %v4957_v17 = vld [vmem:[#allocation21_spill] sm:$0xff] }
 0x3cb   : > { %v1960_v7 = vpop.permute.xlu2 %1959 }
 0x3cc   : > { %1839 = vperm.xlu1 %2721, %v4599_v21   ;;  %v1619_v10 = vpop.permute.xlu1 %1618  ;;  %1891 = vperm.xlu2 %2723, %v4602_v1   ;;  %v1971_v53 = vmul.f32 %v1960_v7, %v4954_v42  ;;  %v4958_v7 = vld [vmem:[#allocation23_spill] sm:$0xff] }
 0x3cd   : > { %v1632_v14 = vmul.f32 %v1619_v10, %v4955_v2  ;;  %v4959_v10 = vld [vmem:[#allocation20_spill] sm:$0xff] }
 0x3cf   : > { %v1656_v55 = vadd.f32 %v1652_v4, %v1632_v14  ;;  %v4960_v14 = vld [vmem:[#allocation32_spill] sm:$0xff] }
 0x3d1   : > { %v1660_v63 = vadd.f32 %v1656_v55, %v1604_v22  ;;  %v1633_v22 = vmul.f32 %v1624_v52, %v4960_v14  ;;  %v2206_v55 = vpop.permute.xlu0 %2205 }
 0x3d3   : > { %v2171_v30 = vpop.permute.xlu2 %2170  ;;  %v1664_v31 = vmul.f32 0.5, %v1660_v63 }
 0x3d4   : > { %1947 = vperm.xlu1 %2721, %v4604_v13   ;;  %v1830_v38 = vpop.permute.xlu1 %1829  ;;  %2724 = vset.pattern.permute.xlu2 %v4946_v43  ;;  %v2182_v50 = vmul.f32 %v2171_v30, %v4953_v15  ;;  %v4956_v15 = vld [vmem:[#allocation22_spill] sm:$0xff] }
 0x3d5   : > { %1967 = vperm.xlu2 %2724, %v4604_v13   ;;  %v1668_v21 = vadd.f32 %v1664_v31, %v4666_v9  ;;  %v1843_v19 = vmul.f32 %v1830_v38, %v4952_v23  ;;  %v1951_v13 = vmul.f32 %v1938_v33, %v4955_v2  ;;  %v4961_v33 = vld [vmem:[#allocation31_spill] sm:$0xff] }
 0x3d6   : > { %v2186_v27 = vadd.f32 %v2182_v50, %v2162_v37 }
 0x3d7   : > { %v1672_v1 = vmax.f32 %v1668_v21, 0.0  ;;  %v1867_v24 = vadd.f32 %v1863_v20, %v1843_v19  ;;  %v1975_v44 = vadd.f32 %v1971_v53, %v1951_v13  ;;  %v1896_v13 = vmul.f32 %v1887_v26, %v4957_v17 }
 0x3d9   : > { %2393 = vmatmul.f32.gmra.mxu3 %v1672_v1 }
 0x3dc   : > { %2726 = vset.pattern.permute.xlu1 %v4946_v43  ;;  %v1882_v41 = vpop.permute.xlu1 %1881  ;;  %v2257_v32 = vpop.permute.xlu2 %2256 }
 0x3dd   : > { %v1895_v16 = vmul.f32 %v1882_v41, %v4950_v51  ;;  %2178 = vperm.xlu1 %2726, %v4584_v12   ;;  %2725 = vset.pattern.permute.xlu2 %v4947_v3  ;;  %v2270_v5 = vmul.f32 %v2257_v32, %v4955_v2  ;;  %v2283_v32 = vpop.permute.xlu0 %2282 }
 0x3de   : > { %2158 = vperm.xlu2 %2725, %v4584_v12  }
 0x3df   : > { %v1919_v18 = vadd.f32 %v1915_v48, %v1895_v16 }
 0x3e1   : > { %v1923_v54 = vadd.f32 %v1919_v18, %v1867_v24 }
 0x3e3   : > { %v1979_v6 = vadd.f32 %v1975_v44, %v1923_v54 }
 0x3e4   : > { %v2201_v25 = vpop.permute.xlu1 %2200  ;;  %v1516_v45 = vpop.permute.xlu2 %1515 }
 0x3e5   : > { %2230 = vperm.xlu1 %2726, %v4587_v49   ;;  %v1983_v39 = vmul.f32 0.5, %v1979_v6  ;;  %v2214_v3 = vmul.f32 %v2201_v25, %v4950_v51  ;;  %v1541_v24 = vpop.permute.xlu0 %1540 }
 0x3e6   : > { %2210 = vperm.xlu2 %2725, %v4587_v49  }
 0x3e7   : > { %v1987_v57 = vadd.f32 %v1983_v39, %v4666_v9  ;;  %v2238_v62 = vadd.f32 %v2234_v40, %v2214_v3 }
 0x3e9   : > { %v1991_v12 = vmax.f32 %v1987_v57, 0.0  ;;  %v2242_v60 = vadd.f32 %v2238_v62, %v2186_v27 }
 0x3eb   : > { %2364 = vmatmul.f32.gmra.mxu2 %v1991_v12 }
 0x3ec   : > { %v1568_v28 = vpop.permute.xlu2 %1567 }
 0x3ed   : > { %v2279_v46 = vpop.permute.xlu1 %2278  ;;  %v1593_v40 = vpop.permute.xlu0 %1592 }
 0x3ee   : > { %v2290_v49 = vmul.f32 %v2279_v46, %v4954_v42  ;;  %2728 = vset.pattern.permute.xlu2 %v4946_v43  ;;  %v1577_v43 = vmul.f32 %v1568_v28, %v4957_v17  ;;  %v1525_v42 = vmul.f32 %v1516_v45, %v4959_v10 }
 0x3ef   : > { %2286 = vperm.xlu2 %2728, %v4581_v59  }
 0x3f0   : > { %v2294_v29 = vadd.f32 %v2290_v49, %v2270_v5  ;;  %v2215_v49 = vmul.f32 %v2206_v55, %v4957_v17  ;;  %v4967_v55 = vld [vmem:[#allocation34_spill] sm:$0xff] }
 0x3f2   : > { %v2298_v56 = vadd.f32 %v2294_v29, %v2242_v60 }
 0x3f4   : > { %v1835_v34 = vpop.permute.xlu2 %1834  ;;  %v2302_v51 = vmul.f32 0.5, %v2298_v56 }
 0x3f5   : > { %v1537_v11 = vpop.permute.xlu1 %1536  ;;  %v1844_v44 = vmul.f32 %v1835_v34, %v4959_v10  ;;  %v1649_v52 = vpop.permute.xlu0 %1648  ;;  %v2291_v34 = vmul.f32 %v2283_v32, %v4961_v33 }
 0x3f6   : > { %v2306_v0 = vadd.f32 %v2302_v51, %v4666_v9  ;;  %v1545_v59 = vmul.f32 %v1537_v11, %v4958_v7 }
 0x3f8   : > { %v2310_v61 = vmax.f32 %v2306_v0, 0.0  ;;  %v1549_v63 = vadd.f32 %v1545_v59, %v1525_v42  ;;  %v4964_v59 = vld [vmem:[#allocation28_spill] sm:$0xff] }
 0x3f9   : > { %v1598_v17 = vmul.f32 %v1593_v40, %v4964_v59 }
 0x3fa   : > { %2438 = vmatmul.f32.gmra.mxu0 %v2310_v61 }
 0x3fc   : > { %v1943_v23 = vpop.permute.xlu2 %1942 }
 0x3fd   : > { %v1589_v8 = vpop.permute.xlu1 %1588  ;;  %v1952_v25 = vmul.f32 %v1943_v23, %v4960_v14  ;;  %v4962_v23 = vld [vmem:[#allocation24_spill] sm:$0xff] }
 0x3fe   : > { %v1597_v35 = vmul.f32 %v1589_v8, %v4956_v15 }
 0x400   : > { %v1601_v4 = vadd.f32 %v1597_v35, %v1577_v43  ;;  %v4963_v43 = vld [vmem:[#allocation25_spill] sm:$0xff] }
 0x402   : > { %v1605_v31 = vadd.f32 %v1601_v4, %v1549_v63  ;;  %v1654_v63 = vmul.f32 %v1649_v52, %v4967_v55 }
 0x404   : > { %v2154_v58 = vpop.permute.xlu2 %2153 }
 0x405   : > { %v1645_v2 = vpop.permute.xlu1 %1644  ;;  %v2163_v27 = vmul.f32 %v2154_v58, %v4959_v10  ;;  %v4965_v10 = vld [vmem:[#allocation33_spill] sm:$0xff]  ;;  %v4966_v58 = vld [vmem:[#allocation26_spill] sm:$0xff] }
 0x406   : > { %v1653_v30 = vmul.f32 %v1645_v2, %v4961_v33 }
 0x408   : > { %v1657_v38 = vadd.f32 %v1653_v30, %v1633_v22 }
 0x40a   : > { %v1661_v21 = vadd.f32 %v1657_v38, %v1605_v31 }
 0x40c   : > { %v1665_v1 = vmul.f32 0.5, %v1661_v21 }
 0x40d   : > { %v1856_v19 = vpop.permute.xlu1 %1855  ;;  %v2227_v41 = vpop.permute.xlu2 %2226 }
 0x40e   : > { %v1669_v48 = vadd.f32 %v1665_v1, %v4666_v9  ;;  %v1864_v18 = vmul.f32 %v1856_v19, %v4958_v7  ;;  %v2235_v5 = vmul.f32 %v2227_v41, %v4956_v15  ;;  %v4766_v41 = vld [vmem:[#allocation8 + $0x180] ss:$0 sm:$0xff] }
 0x410   : > { %v1673_v47 = vmax.f32 %v1669_v48, 0.0  ;;  %v1868_v45 = vadd.f32 %v1864_v18, %v1844_v44  ;;  %v2239_v51 = vadd.f32 %v2235_v5, %v2215_v49 }
 0x412   : > { %2396 = vmatmul.f32.gmra.mxu3 %v1673_v47 }
 0x415   : > { %v1908_v20 = vpop.permute.xlu1 %1907 }
 0x416   : > { %v1916_v53 = vmul.f32 %v1908_v20, %v4956_v15  ;;  %v1521_v16 = vpop.permute.xlu2 %1520 }
 0x417   : > { %v1526_v8 = vmul.f32 %v1521_v16, %v4962_v23 }
 0x418   : > { %v1920_v54 = vadd.f32 %v1916_v53, %v1896_v13 }
 0x41a   : > { %v1924_v36 = vadd.f32 %v1920_v54, %v1868_v45 }
 0x41d   : > { %v1964_v6 = vpop.permute.xlu1 %1963  ;;  %v2391_v19 = vpop.f32.mrf.mxu3 }
 0x41e   : > { %v1972_v39 = vmul.f32 %v1964_v6, %v4961_v33  ;;  %v1629_v12 = vpop.permute.xlu2 %1628 }
 0x41f   : > { %v1634_v42 = vmul.f32 %v1629_v12, %v4965_v10 }
 0x420   : > { %v1976_v57 = vadd.f32 %v1972_v39, %v1952_v25 }
 0x421   : > { %v1658_v21 = vadd.f32 %v1654_v63, %v1634_v42 }
 0x422   : > { %v1980_v3 = vadd.f32 %v1976_v57, %v1924_v36 }
 0x424   : > { %v1984_v50 = vmul.f32 0.5, %v1980_v3 }
 0x425   : > { %v2175_v37 = vpop.permute.xlu1 %2174 }
 0x426   : > { %v1988_v62 = vadd.f32 %v1984_v50, %v4666_v9  ;;  %v2183_v46 = vmul.f32 %v2175_v37, %v4958_v7  ;;  %v1892_v29 = vpop.permute.xlu2 %1891  ;;  %v1546_v7 = vmul.f32 %v1541_v24, %v4963_v43 }
 0x427   : > { %v1897_v25 = vmul.f32 %v1892_v29, %v4966_v58 }
 0x428   : > { %v1992_v28 = vmax.f32 %v1988_v62, 0.0  ;;  %v2187_v60 = vadd.f32 %v2183_v46, %v2163_v27  ;;  %v1550_v33 = vadd.f32 %v1546_v7, %v1526_v8 }
 0x42a   : > { %2367 = vmatmul.f32.gmra.mxu2 %v1992_v28  ;;  %v2243_v0 = vadd.f32 %v2239_v51, %v2187_v60 }
 0x42b   : > { %v2362_v38 = vpop.f32.mrf.mxu2 }
 0x42c   : > { %v2392_v48 = vadd.f32 %v2391_v19, %v2362_v38 }
 0x42e   : > { %v2262_v56 = vpop.permute.xlu1 %2261 }
 0x42f   : > { %v2271_v11 = vmul.f32 %v2262_v56, %v4960_v14  ;;  %v1968_v4 = vpop.permute.xlu2 %1967  ;;  %v1860_v14 = vpop.permute.xlu0 %1859 }
 0x430   : > { %v1865_v6 = vmul.f32 %v1860_v14, %v4963_v43  ;;  %v1973_v12 = vmul.f32 %v1968_v4, %v4967_v55 }
 0x431   : > { %v2295_v61 = vadd.f32 %v2291_v34, %v2271_v11 }
 0x433   : > { %v2299_v26 = vadd.f32 %v2295_v61, %v2243_v0 }
 0x435   : > { %v2303_v35 = vmul.f32 0.5, %v2299_v26 }
 0x436   : > { %v1573_v15 = vpop.permute.xlu1 %1572 }
 0x437   : > { %v1578_v2 = vmul.f32 %v1573_v15, %v4966_v58  ;;  %v2307_v22 = vadd.f32 %v2303_v35, %v4666_v9  ;;  %v1912_v54 = vpop.permute.xlu0 %1911 }
 0x438   : > { %v2159_v13 = vpop.permute.xlu2 %2158  ;;  %v1917_v39 = vmul.f32 %v1912_v54, %v4964_v59 }
 0x439   : > { %v1602_v30 = vadd.f32 %v1598_v17, %v1578_v2  ;;  %v2311_v31 = vmax.f32 %v2307_v22, 0.0  ;;  %v2164_v34 = vmul.f32 %v2159_v13, %v4962_v23 }
 0x43a   : > { %v1921_v3 = vadd.f32 %v1917_v39, %v1897_v25 }
 0x43b   : > { %v1606_v1 = vadd.f32 %v1602_v30, %v1550_v33  ;;  %2441 = vmatmul.f32.gmra.mxu0 %v2311_v31 }
 0x43d   : > { %v1662_v32 = vadd.f32 %v1658_v21, %v1606_v1 }
 0x43e   : > { %v2436_v47 = vpop.f32.mrf.mxu0  ;;  %v1840_v20 = vpop.permute.xlu1 %1839 }
 0x43f   : > { %v2448_v53 = vadd.f32 %v2436_v47, %v2392_v48  ;;  %v1666_v16 = vmul.f32 0.5, %v1662_v32  ;;  %v1845_v18 = vmul.f32 %v1840_v20, %v4962_v23  ;;  %v2267_v52 = vpop.permute.xlu0 %2266 }
 0x440   : > { %v2211_v62 = vpop.permute.xlu2 %2210  ;;  %v2272_v61 = vmul.f32 %v2267_v52, %v4965_v10 }
 0x441   : > { %v2454_v24 = vadd.f32 %v4766_v41, %v2448_v53  ;;  %v1670_v44 = vadd.f32 %v1666_v16, %v4666_v9  ;;  %v1869_v36 = vadd.f32 %v1865_v6, %v1845_v18  ;;  %v2216_v51 = vmul.f32 %v2211_v62, %v4966_v58 }
 0x443   : > { %2458 = vst [vmem:[%s4773_s15] sm:$0xff] %v2454_v24  ;;  %v1674_v45 = vmax.f32 %v1670_v44, 0.0  ;;  %v1925_v50 = vadd.f32 %v1921_v3, %v1869_v36 }
 0x445   : > { %2399 = vmatmul.f32.gmra.mxu3 %v1674_v45 }
 0x446   : > { %v1948_v57 = vpop.permute.xlu1 %1947 }
 0x447   : > { %v1953_v40 = vmul.f32 %v1948_v57, %v4965_v10 }
 0x449   : > { %v1977_v37 = vadd.f32 %v1973_v12, %v1953_v40  ;;  %v2287_v60 = vpop.permute.xlu2 %2286 }
 0x44a   : > { %v2292_v11 = vmul.f32 %v2287_v60, %v4967_v55 }
 0x44b   : > { %v1981_v28 = vadd.f32 %v1977_v37, %v1925_v50 }
 0x44c   : > { %v2296_v35 = vadd.f32 %v2292_v11, %v2272_v61 }
 0x44d   : > { %v1985_v46 = vmul.f32 0.5, %v1981_v28 }
 0x44f   : > { %v2179_v27 = vpop.permute.xlu1 %2178  ;;  %v1989_v5 = vadd.f32 %v1985_v46, %v4666_v9 }
 0x450   : > { %v2184_v29 = vmul.f32 %v2179_v27, %v4963_v43 }
 0x451   : > { %v1993_v49 = vmax.f32 %v1989_v5, 0.0 }
 0x452   : > { %v2188_v26 = vadd.f32 %v2184_v29, %v2164_v34 }
 0x453   : > { %2370 = vmatmul.f32.gmra.mxu2 %v1993_v49 }
 0x457   : > { %v2231_v56 = vpop.permute.xlu1 %2230 }
 0x458   : > { %v2236_v0 = vmul.f32 %v2231_v56, %v4964_v59 }
 0x45a   : > { %v2240_v8 = vadd.f32 %v2236_v0, %v2216_v51 }
 0x45c   : > { %v2244_v7 = vadd.f32 %v2240_v8, %v2188_v26  ;;  %v2394_v4 = vpop.f32.mrf.mxu3 }
 0x45e   : > { %v2300_v15 = vadd.f32 %v2296_v35, %v2244_v7 }
 0x460   : > { %v2304_v17 = vmul.f32 0.5, %v2300_v15 }
 0x462   : > { %v2308_v43 = vadd.f32 %v2304_v17, %v4666_v9 }
 0x464   : > { %v2312_v42 = vmax.f32 %v2308_v43, 0.0 }
 0x466   : > { %2444 = vmatmul.f32.gmra.mxu0 %v2312_v42 }
 0x46e   : > { %v2365_v23 = vpop.f32.mrf.mxu2 }
 0x46f   : > { %v2395_v58 = vadd.f32 %v2394_v4, %v2365_v23 }
 0x477   : > { %v2439_v59 = vpop.f32.mrf.mxu0 }
 0x478   : > { %v2449_v2 = vadd.f32 %v2439_v59, %v2395_v58 }
 0x47a   : > { %v2455_v10 = vadd.f32 %v4766_v41, %v2449_v2 }
 0x47c   : > { %2459 = vst [vmem:[%s4773_s15 + $0x8] sm:$0xff] %v2455_v10 }
 0x495   : > { %v2397_v14 = vpop.f32.mrf.mxu3 }
 0x4ad   : > { %v2368_v22 = vpop.f32.mrf.mxu2 }
 0x4ae   : > { %v2398_v55 = vadd.f32 %v2397_v14, %v2368_v22 }
 0x4b8   : > { %v2442_v63 = vpop.f32.mrf.mxu0 }
 0x4b9   : > { %v2450_v33 = vadd.f32 %v2442_v63, %v2398_v55 }
 0x4bb   : > { %v2456_v9 = vadd.f32 %v4766_v41, %v2450_v33 }
 0x4bd   : > { %2460 = vst [vmem:[%s4773_s15 + $0x10] sm:$0xff] %v2456_v9 }
 0x4c8   : > { %v2400_v31 = vpop.f32.mrf.mxu3 }
 0x4d6   : > { %v2371_v30 = vpop.f32.mrf.mxu2 }
 0x4d7   : > { %v2401_v38 = vadd.f32 %v2400_v31, %v2371_v30 }
 0x4e3   : > { %v2445_v21 = vpop.f32.mrf.mxu0 }
 0x4e4   : > { %v2451_v1 = vadd.f32 %v2445_v21, %v2401_v38 }
 0x4e6   : > { %v2457_v19 = vadd.f32 %v4766_v41, %v2451_v1 }
 0x4e8   : > { %2461 = vst [vmem:[%s4773_s15 + $0x18] sm:$0xff] %v2457_v19 }
 0x4e9   : > { %2926 = shalt.err (!%p2923_p4)
}
 0x4ea   : > { %s2982_s28 = smov 128   ;;  %s2983_s5 = smov 8  }
 0x4eb   : > { %2648 = dma.vmem_to_hbm [thread:$0]  (%p3055_p6), %s2476_s25, 512, %s2478_s26, %s2463_s6, %s2982_s28, %s2982_s28, %s2983_s5  }
 0x4ec PF: > { %s2492_s13 = sand.u32 1, %s2959_s19   ;;  %p2658_p5 = pnand %p2572_p1, %p3061_p10 }
 0x4ed   : > { %s2493_s14 = scalar_lea.sflag [#allocation7], %s2492_s13 }
 0x4ee   : > { %p2659_p7 = pneg %p2658_p5 }
 0x4f0   : > { %2954 = dma.done.wait (%p2659_p7), %s2493_s14, 512  }
 0x4f1   : > { %2956 = vsyncadd (%p2659_p7), %s2493_s14, 4294966784  ;;  %p24_p8 = scmp.ge.s32.totalorder %s3037_s24, 4   ;;  %s4968_s19 = smov %s2963_s20 }
 0x4f2   : > { %s4969_s20 = smov %s2967_s21  ;;  %s4970_s21 = smov %s3049_s27 }
 0x4f3   : > { %s4971_s22 = smov %s3037_s24  ;;  %26 = sbr.rel (!%p24_p8) target bundleno = 11 (0xb), region = 123 }
 0x4f8   :  { %2499 = vsyncpa [#allocation6], 1 }
 0x4f9   :  { %2501 = vsyncpa [#allocation6 + $0x1], 1 }
 0x4fa   :  { %2502 = vsyncpa [#allocation9], 1 }
 0x4fb   :  { %2503 = vsyncpa [#allocation7], 1 }
 0x4fc   :  { %2505 = vsyncpa [#allocation7 + $0x1], 1 }

</bundles_post_ra>
